<compile_context>
chip_gen: v7x
topology: tpu7x:2x2x1
jax: 0.10.0
libtpu: 0.0.40
codegen_flags: <defaults>
</compile_context>

<pallas_src>
import math
import functools

import jax
import jax.numpy as jnp
from jax import lax
from jax.experimental import pallas as pl
from jax.experimental.pallas import tpu as pltpu


def _round_up(x, m):
    return ((x + m - 1) // m) * m


def _bf16_sigmoid_default():
    # v6e / v7x have a bf16 EUP path (~2x the f32 rate); v5e does not, where
    # bf16 on the elementwise path only adds pack/unpack work.
    try:
        kind = jax.devices()[0].device_kind.lower()
        return not any(s in kind for s in ("v5 lite", "v5e", "v5lite"))
    except Exception:
        return True


# ---------------------------------------------------------------------------
# Kernel 1: node-wise transform (KernelMLP + src_proj + dst_proj), tiled over
# node blocks. All weights are tiny and live fully in VMEM.
# Outputs: h (f32), src (bf16), dst (bf16, pre-scaled by 1/sqrt(P)).
# ---------------------------------------------------------------------------
def transform_kernel(x_ref, *refs, n_layers, scale):
    # refs = (w0, b0, ..., w_{L-1}, b_{L-1}, ws, bs, wd, bd, h_out, src_out, dst_out)
    weight_refs = refs[:2 * n_layers]
    ws_ref, bs_ref, wd_ref, bd_ref = refs[2 * n_layers:2 * n_layers + 4]
    h_ref, src_ref, dst_ref = refs[2 * n_layers + 4:]

    h = x_ref[...]
    for l in range(n_layers):
        w = weight_refs[2 * l][...]
        b = weight_refs[2 * l + 1][...]
        h = jnp.dot(h, w, preferred_element_type=jnp.float32) + b
        if l + 1 < n_layers:                      # ReLU on hidden layers only
            h = jnp.maximum(h, 0.0)

    h_ref[...] = h
    src_ref[...] = (jnp.dot(h, ws_ref[...], preferred_element_type=jnp.float32)
                    + bs_ref[...]).astype(src_ref.dtype)
    # Fold the 1/sqrt(proj_dim) score scale into dst: it never touches the
    # O(N^2) elementwise path of the aggregation kernel.
    dst_ref[...] = ((jnp.dot(h, wd_ref[...], preferred_element_type=jnp.float32)
                     + bd_ref[...]) * scale).astype(dst_ref.dtype)


def run_transform(x, mlp_params, src_params, dst_params, tile):
    N, in_dim = x.shape
    ws, bs = src_params
    wd, bd = dst_params
    P = ws.shape[1]
    n_layers = len(mlp_params)
    flat = [a for wb in mlp_params for a in wb] + [ws, bs, wd, bd]

    kernel = functools.partial(transform_kernel, n_layers=n_layers,
                               scale=1.0 / math.sqrt(P))

    in_specs = [pl.BlockSpec((tile, in_dim), lambda i: (i, 0))]
    in_specs += [pl.BlockSpec(a.shape, lambda i: (0, 0)) for a in flat]

    out_shape = (jax.ShapeDtypeStruct((N, P), jnp.float32),
                 jax.ShapeDtypeStruct((N, P), jnp.bfloat16),
                 jax.ShapeDtypeStruct((N, P), jnp.bfloat16))
    out_specs = (pl.BlockSpec((tile, P), lambda i: (i, 0)),) * 3

    dims = [in_dim] + [w.shape[1] for (w, _) in mlp_params]
    flops = sum(2 * N * a * b for a, b in zip(dims[:-1], dims[1:])) + 2 * 2 * N * P * P
    cost = pl.CostEstimate(flops=int(flops), transcendentals=0,
                           bytes_accessed=int(N * in_dim * 4 + N * P * 4 + 2 * N * P * 2))

    return pl.pallas_call(
        kernel,
        out_shape=out_shape,
        grid=(pl.cdiv(N, tile),),
        in_specs=in_specs,
        out_specs=out_specs,
        compiler_params=pltpu.CompilerParams(dimension_semantics=("parallel",)),
        cost_estimate=cost,
    )(x, *flat)


# ---------------------------------------------------------------------------
# Kernel 2: edge-weighted neighbor aggregation + fused output concat.
# Grid = (dst tiles [parallel], src tiles [arbitrary/reduction]).
#   scores[v, u] = <dst[v], src[u]>           (dst pre-scaled by 1/sqrt(P))
#   w[v, u]      = sigmoid(scores) * adj_in[v, u]
#   acc[v]      += sum_u w[v, u] * src[u]      (standard (M,K)x(K,N) matmul)
# Final output tile is (tile_dst, 2P) = [h | acc] via two direct slice stores.
# ---------------------------------------------------------------------------
def aggregate_kernel(h_ref, src_ref, dst_ref, adj_ref, out_ref, acc_ref, *,
                     proj_dim, n_nodes, tile_src, bf16_sigmoid, src_ragged):
    k = pl.program_id(1)

    @pl.when(k == 0)
    def _():
        acc_ref[...] = jnp.zeros_like(acc_ref)

    src = src_ref[...]                                  # (tk, P) bf16
    dst = dst_ref[...]                                  # (tn, P) bf16, pre-scaled

    if src_ragged:
        # Mask padded rows of the clamped edge block (selects, so garbage /
        # NaN padding can never reach the accumulator).
        row = lax.broadcasted_iota(jnp.int32, (tile_src, 1), 0) + k * tile_src
        src = jnp.where(row < n_nodes, src, jnp.zeros_like(src))

    # scores[v_local, u_local]: contraction over the feature axis ("NT" form).
    scores = lax.dot_general(dst, src, (((1,), (1,)), ((), ())),
                             preferred_element_type=jnp.float32)   # (tn, tk)
    if bf16_sigmoid:
        sig = jax.nn.sigmoid(scores.astype(jnp.bfloat16))
    else:
        sig = jax.nn.sigmoid(scores).astype(jnp.bfloat16)
    # Adjacency streamed in its native (narrow) dtype; promote per tile.
    w = sig * adj_ref[...].astype(jnp.bfloat16)                    # (tn, tk)

    # acc[v, :] += sum_u w[v, u] * src[u, :]   -- standard (M,K)x(K,N) matmul.
    acc_ref[...] += jnp.dot(w, src, preferred_element_type=jnp.float32)

    @pl.when(k == pl.num_programs(1) - 1)
    def _():
        P = proj_dim
        out_ref[:, :P] = h_ref[...]
        out_ref[:, P:] = acc_ref[...]


def run_aggregate(h, src, dst, adj_in, tile_dst, tile_src, bf16_sigmoid):
    N, P = src.shape
    src_ragged = (N % tile_src) != 0
    kernel = functools.partial(
        aggregate_kernel, proj_dim=P, n_nodes=N, tile_src=tile_src,
        bf16_sigmoid=bf16_sigmoid, src_ragged=src_ragged)

    grid = (pl.cdiv(N, tile_dst), pl.cdiv(N, tile_src))
    adj_bytes = jnp.dtype(adj_in.dtype).itemsize

    # VMEM budget (double-buffered inputs/outputs + accumulator), with headroom.
    vmem_need = (2 * (tile_dst * tile_src * adj_bytes        # adj tile
                      + tile_src * P * 2                     # src (bf16)
                      + 2 * tile_dst * P * 2                 # dst (bf16) + slack
                      + tile_dst * P * 4                     # h (f32)
                      + tile_dst * 2 * P * 4)                # out (f32)
                 + tile_dst * P * 4)                         # acc scratch
    vmem_limit = int(min(64 * 1024 * 1024, max(2 * vmem_need, 32 * 1024 * 1024)))

    cost = pl.CostEstimate(
        flops=int(4 * N * N * P + 3 * N * N),
        transcendentals=int(N * N),
        bytes_accessed=int(N * N * adj_bytes + grid[0] * N * P * 2
                           + N * P * (4 + 2) + N * 2 * P * 4),
    )

    return pl.pallas_call(
        kernel,
        out_shape=jax.ShapeDtypeStruct((N, 2 * P), jnp.float32),
        grid=grid,
        in_specs=[
            pl.BlockSpec((tile_dst, P), lambda i, k: (i, 0)),        # h   (dst rows)
            pl.BlockSpec((tile_src, P), lambda i, k: (k, 0)),        # src (src rows)
            pl.BlockSpec((tile_dst, P), lambda i, k: (i, 0)),        # dst (dst rows)
            pl.BlockSpec((tile_dst, tile_src), lambda i, k: (i, k)), # adj_in[v, u]
        ],
        out_specs=pl.BlockSpec((tile_dst, 2 * P), lambda i, k: (i, 0)),
        scratch_shapes=[pltpu.VMEM((tile_dst, P), jnp.float32)],
        compiler_params=pltpu.CompilerParams(
            dimension_semantics=("parallel", "arbitrary"),
            vmem_limit_bytes=vmem_limit),
        cost_estimate=cost,
    )(h, src, dst, adj_in)


def wls_mlp_layer_e(x, adj_in, mlp_params, src_params, dst_params, *,
                    tile_dst=1024, tile_src=2048, transform_tile=4096,
                    bf16_sigmoid=None):
    """Full forward pass.

    adj_in[v, u] = 1 iff there is an edge u -> v (in-edge adjacency, any
    numeric dtype; int8 recommended — it is streamed directly, no host
    pad/cast pass).  Output is (N, 2 * proj_dim) = concat([h, agg], -1).
    """
    N = x.shape[0]
    assert adj_in.shape == (N, N), adj_in.shape
    if bf16_sigmoid is None:
        bf16_sigmoid = _bf16_sigmoid_default()

    t_tile = min(transform_tile, N)
    tile_dst = min(tile_dst, N)
    tile_src = min(tile_src, N)
    # v7x megacore: keep the parallel (dst) axis >= 2 tiles on large graphs.
    if tile_dst >= N and N >= 512:
        tile_dst = _round_up(pl.cdiv(N, 2), 128)

    h, src, dst = run_transform(x, mlp_params, src_params, dst_params, t_tile)
    return run_aggregate(h, src, dst, adj_in, tile_dst, tile_src, bf16_sigmoid)


# ---------------------------------------------------------------------------
# Deterministic parameter construction (PyTorch-Linear-like uniform init,
# stored as (fan_in, fan_out) so kernels do x @ W + b directly).
# ---------------------------------------------------------------------------
def linear_params(key, fan_in, fan_out):
    kw, kb = jax.random.split(key)
    bound = 1.0 / math.sqrt(fan_in)
    w = jax.random.uniform(kw, (fan_in, fan_out), jnp.float32, -bound, bound)
    b = jax.random.uniform(kb, (1, fan_out), jnp.float32, -bound, bound)
    return w, b


if __name__ == "__main__":
    N, in_dim, out_dim, n_hidden, scale_hidden = 512, 16, 32, 2, 2
    P = out_dim // 2

    key = jax.random.PRNGKey(0)
    keys = jax.random.split(key, 8)

    # KernelMLP: in_dim -> in_dim*2 -> in_dim*4 -> P   (ReLU between)
    dims = [in_dim] + [in_dim * scale_hidden ** (i + 1) for i in range(n_hidden)] + [P]
    mlp_params = tuple(linear_params(keys[i], dims[i], dims[i + 1])
                       for i in range(len(dims) - 1))
    src_params = linear_params(keys[4], P, P)
    dst_params = linear_params(keys[5], P, P)

    x = jax.random.normal(keys[6], (N, in_dim), jnp.float32)
    # In-edge adjacency, stored int8 (narrowest stream): adj_in[v, u] = edge u -> v.
    adj_in = (jax.random.uniform(keys[7], (N, N)) < 0.03).astype(jnp.int8)

    # Small tiles here only to exercise multi-step grids at this tiny demo size;
    # production defaults are tile_dst=1024 / tile_src=2048 / transform_tile=4096.
    fwd = jax.jit(functools.partial(wls_mlp_layer_e,
                                    tile_dst=256, tile_src=256, transform_tile=256))
    out = jax.block_until_ready(fwd(x, adj_in, mlp_params, src_params, dst_params))
    assert out.shape == (N, out_dim), out.shape

    # Pure-JAX reference for validation.
    hh = x
    for i, (w, b) in enumerate(mlp_params):
        hh = hh @ w + b
        if i + 1 < len(mlp_params):
            hh = jnp.maximum(hh, 0.0)
    s = hh @ src_params[0] + src_params[1]
    d = hh @ dst_params[0] + dst_params[1]
    scores = (d @ s.T) / math.sqrt(P)               # scores[v, u]
    w_edge = jax.nn.sigmoid(scores) * adj_in.astype(jnp.float32)
    agg_ref = w_edge @ s                            # sum of weighted src over in-edges
    ref = jnp.concatenate([hh, agg_ref], axis=-1)

    err = float(jnp.max(jnp.abs(out - ref)))
    # Tolerance covers bf16 MXU operands (src / dst / edge weights) + bf16 sigmoid.
    assert jnp.allclose(out, ref, atol=5e-2, rtol=5e-2), err
    print("KERNEL_OK")
</pallas_src>

<mosaic_0001>
module attributes {stable_mosaic.version = 11 : i64} {
  func.func @aggregate_kernel(%arg0: i32, %arg1: i32, %arg2: memref<256x16xf32, #tpu.memory_space<vmem>>, %arg3: memref<256x16xbf16, #tpu.memory_space<vmem>>, %arg4: memref<256x16xbf16, #tpu.memory_space<vmem>>, %arg5: memref<256x256xi8, #tpu.memory_space<vmem>>, %arg6: memref<256x32xf32, #tpu.memory_space<vmem>>, %arg7: memref<256x16xf32, #tpu.memory_space<vmem>>) attributes {dimension_semantics = [#tpu.dimension_semantics<parallel>, #tpu.dimension_semantics<arbitrary>], iteration_bounds = array<i64: 2, 2>, scalar_prefetch = 0 : i64, scratch_operands = 1 : i64, tpu.core_type = #tpu.core_type<tc>, window_params = [{transform_indices = @transform_0, window_bounds = array<i64: 256, 16>}, {transform_indices = @transform_1, window_bounds = array<i64: 256, 16>}, {transform_indices = @transform_2, window_bounds = array<i64: 256, 16>}, {transform_indices = @transform_3, window_bounds = array<i64: 256, 256>}, {transform_indices = @transform_4, window_bounds = array<i64: 256, 32>}]} {
    %c0_i32 = arith.constant 0 : i32
    %0 = arith.cmpi eq, %arg1, %c0_i32 : i32
    %1 = arith.extui %0 : i1 to i32
    %c0_i32_0 = arith.constant 0 : i32
    %2 = arith.cmpi ne, %1, %c0_i32_0 : i32
    scf.if %2 {
      %cst_13 = arith.constant 0.000000e+00 : f32
      %22 = vector.broadcast %cst_13 : f32 to vector<256x16xf32>
      %c0_14 = arith.constant 0 : index
      %c0_15 = arith.constant 0 : index
      %23 = vector.load %arg7[%c0_14, %c0_15] : memref<256x16xf32, #tpu.memory_space<vmem>>, vector<256x16xf32>
      tpu.vector_store %arg7[%c0_14, %c0_15], %22 {strides = array<i32>} : memref<256x16xf32, #tpu.memory_space<vmem>>, vector<256x16xf32>,
    } else {
    }
    %c0 = arith.constant 0 : index
    %c0_1 = arith.constant 0 : index
    %3 = vector.load %arg3[%c0, %c0_1] : memref<256x16xbf16, #tpu.memory_space<vmem>>, vector<256x16xbf16>
    %c0_2 = arith.constant 0 : index
    %c0_3 = arith.constant 0 : index
    %4 = vector.load %arg4[%c0_2, %c0_3] : memref<256x16xbf16, #tpu.memory_space<vmem>>, vector<256x16xbf16>
    %cst = arith.constant dense<0.000000e+00> : vector<256x256xf32>
    %5 = tpu.matmul %4, %3, %cst {dimension_numbers = #tpu.dot_dimension_numbers<[1], [1], [0], [0], [0, 0, 1, 0], [], []>} : vector<256x16xbf16>, vector<256x16xbf16>, vector<256x256xf32> -> vector<256x256xf32>
    %6 = arith.truncf %5 : vector<256x256xf32> to vector<256x256xbf16>
    %7 = arith.negf %6 : vector<256x256xbf16>
    %8 = math.exp %7 : vector<256x256xbf16>
    %cst_4 = arith.constant 1.000000e+00 : bf16
    %9 = vector.broadcast %cst_4 : bf16 to vector<256x256xbf16>
    %10 = arith.addf %9, %8 : vector<256x256xbf16>
    %11 = arith.divf %9, %10 : vector<256x256xbf16>
    %c0_5 = arith.constant 0 : index
    %c0_6 = arith.constant 0 : index
    %12 = vector.load %arg5[%c0_5, %c0_6] : memref<256x256xi8, #tpu.memory_space<vmem>>, vector<256x256xi8>
    %13 = arith.sitofp %12 : vector<256x256xi8> to vector<256x256xbf16>
    %14 = arith.mulf %11, %13 : vector<256x256xbf16>
    %c0_7 = arith.constant 0 : index
    %c0_8 = arith.constant 0 : index
    %15 = vector.load %arg7[%c0_7, %c0_8] : memref<256x16xf32, #tpu.memory_space<vmem>>, vector<256x16xf32>
    %cst_9 = arith.constant dense<0.000000e+00> : vector<256x16xf32>
    %16 = tpu.matmul %14, %3, %cst_9 {dimension_numbers = #tpu.dot_dimension_numbers<[1], [0], [0], [1], [0, 0, 1, 1], [], []>} : vector<256x256xbf16>, vector<256x16xbf16>, vector<256x16xf32> -> vector<256x16xf32>
    %17 = arith.addf %15, %16 : vector<256x16xf32>
    %c0_10 = arith.constant 0 : index
    %c0_11 = arith.constant 0 : index
    %18 = vector.load %arg7[%c0_10, %c0_11] : memref<256x16xf32, #tpu.memory_space<vmem>>, vector<256x16xf32>
    tpu.vector_store %arg7[%c0_10, %c0_11], %17 {strides = array<i32>} : memref<256x16xf32, #tpu.memory_space<vmem>>, vector<256x16xf32>,
    %c1_i32 = arith.constant 1 : i32
    %19 = arith.cmpi eq, %arg1, %c1_i32 : i32
    %20 = arith.extui %19 : i1 to i32
    %c0_i32_12 = arith.constant 0 : i32
    %21 = arith.cmpi ne, %20, %c0_i32_12 : i32
    scf.if %21 {
      %c0_13 = arith.constant 0 : index
      %c0_14 = arith.constant 0 : index
      %22 = vector.load %arg2[%c0_13, %c0_14] : memref<256x16xf32, #tpu.memory_space<vmem>>, vector<256x16xf32>
      %c0_15 = arith.constant 0 : index
      %c0_16 = arith.constant 0 : index
      %23 = vector.load %arg6[%c0_15, %c0_16] : memref<256x32xf32, #tpu.memory_space<vmem>>, vector<256x16xf32>
      tpu.vector_store %arg6[%c0_15, %c0_16], %22 {strides = array<i32>} : memref<256x32xf32, #tpu.memory_space<vmem>>, vector<256x16xf32>,
      %c0_17 = arith.constant 0 : index
      %c0_18 = arith.constant 0 : index
      %24 = vector.load %arg7[%c0_17, %c0_18] : memref<256x16xf32, #tpu.memory_space<vmem>>, vector<256x16xf32>
      %c0_19 = arith.constant 0 : index
      %c16 = arith.constant 16 : index
      %25 = vector.load %arg6[%c0_19, %c16] : memref<256x32xf32, #tpu.memory_space<vmem>>, vector<256x16xf32>
      tpu.vector_store %arg6[%c0_19, %c16], %24 {strides = array<i32>} : memref<256x32xf32, #tpu.memory_space<vmem>>, vector<256x16xf32>,
    } else {
    }
    return
  }
  func.func @transform_0(%arg0: i32, %arg1: i32) -> (i32, i32) {
    %c0_i32 = arith.constant 0 : i32
    %c0_i32_0 = arith.constant 0 : i32
    return %arg0, %c0_i32 : i32, i32
  }
  func.func @transform_1(%arg0: i32, %arg1: i32) -> (i32, i32) {
    %c0_i32 = arith.constant 0 : i32
    %c0_i32_0 = arith.constant 0 : i32
    return %arg1, %c0_i32 : i32, i32
  }
  func.func @transform_2(%arg0: i32, %arg1: i32) -> (i32, i32) {
    %c0_i32 = arith.constant 0 : i32
    %c0_i32_0 = arith.constant 0 : i32
    return %arg0, %c0_i32 : i32, i32
  }
  func.func @transform_3(%arg0: i32, %arg1: i32) -> (i32, i32) {
    %c0_i32 = arith.constant 0 : i32
    return %arg0, %arg1 : i32, i32
  }
  func.func @transform_4(%arg0: i32, %arg1: i32) -> (i32, i32) {
    %c0_i32 = arith.constant 0 : i32
    %c0_i32_0 = arith.constant 0 : i32
    return %arg0, %c0_i32 : i32, i32
  }
}

module attributes {stable_mosaic.version = 11 : i64} {
  func.func @transform_kernel(%arg0: i32, %arg1: memref<256x16xf32, #tpu.memory_space<vmem>>, %arg2: memref<16x32xf32, #tpu.memory_space<vmem>>, %arg3: memref<1x32xf32, #tpu.memory_space<vmem>>, %arg4: memref<32x64xf32, #tpu.memory_space<vmem>>, %arg5: memref<1x64xf32, #tpu.memory_space<vmem>>, %arg6: memref<64x16xf32, #tpu.memory_space<vmem>>, %arg7: memref<1x16xf32, #tpu.memory_space<vmem>>, %arg8: memref<16x16xf32, #tpu.memory_space<vmem>>, %arg9: memref<1x16xf32, #tpu.memory_space<vmem>>, %arg10: memref<16x16xf32, #tpu.memory_space<vmem>>, %arg11: memref<1x16xf32, #tpu.memory_space<vmem>>, %arg12: memref<256x16xf32, #tpu.memory_space<vmem>>, %arg13: memref<256x16xbf16, #tpu.memory_space<vmem>>, %arg14: memref<256x16xbf16, #tpu.memory_space<vmem>>) attributes {dimension_semantics = [#tpu.dimension_semantics<parallel>], iteration_bounds = array<i64: 2>, scalar_prefetch = 0 : i64, scratch_operands = 0 : i64, tpu.core_type = #tpu.core_type<tc>, window_params = [{transform_indices = @transform_0, window_bounds = array<i64: 256, 16>}, {pipeline_mode = #tpu.pipeline_mode<synchronous>, transform_indices = @transform_1, window_bounds = array<i64: 16, 32>}, {pipeline_mode = #tpu.pipeline_mode<synchronous>, transform_indices = @transform_2, window_bounds = array<i64: 1, 32>}, {pipeline_mode = #tpu.pipeline_mode<synchronous>, transform_indices = @transform_3, window_bounds = array<i64: 32, 64>}, {pipeline_mode = #tpu.pipeline_mode<synchronous>, transform_indices = @transform_4, window_bounds = array<i64: 1, 64>}, {pipeline_mode = #tpu.pipeline_mode<synchronous>, transform_indices = @transform_5, window_bounds = array<i64: 64, 16>}, {pipeline_mode = #tpu.pipeline_mode<synchronous>, transform_indices = @transform_6, window_bounds = array<i64: 1, 16>}, {pipeline_mode = #tpu.pipeline_mode<synchronous>, transform_indices = @transform_7, window_bounds = array<i64: 16, 16>}, {pipeline_mode = #tpu.pipeline_mode<synchronous>, transform_indices = @transform_8, window_bounds = array<i64: 1, 16>}, {pipeline_mode = #tpu.pipeline_mode<synchronous>, transform_indices = @transform_9, window_bounds = array<i64: 16, 16>}, {pipeline_mode = #tpu.pipeline_mode<synchronous>, transform_indices = @transform_10, window_bounds = array<i64: 1, 16>}, {transform_indices = @transform_11, window_bounds = array<i64: 256, 16>}, {transform_indices = @transform_12, window_bounds = array<i64: 256, 16>}, {transform_indices = @transform_13, window_bounds = array<i64: 256, 16>}]} {
    %c0 = arith.constant 0 : index
    %c0_0 = arith.constant 0 : index
    %0 = vector.load %arg1[%c0, %c0_0] : memref<256x16xf32, #tpu.memory_space<vmem>>, vector<256x16xf32>
    %c0_1 = arith.constant 0 : index
    %c0_2 = arith.constant 0 : index
    %1 = vector.load %arg2[%c0_1, %c0_2] : memref<16x32xf32, #tpu.memory_space<vmem>>, vector<16x32xf32>
    %c0_3 = arith.constant 0 : index
    %c0_4 = arith.constant 0 : index
    %2 = vector.load %arg3[%c0_3, %c0_4] : memref<1x32xf32, #tpu.memory_space<vmem>>, vector<1x32xf32>
    %cst = arith.constant dense<0.000000e+00> : vector<256x32xf32>
    %3 = tpu.matmul %0, %1, %cst {dimension_numbers = #tpu.dot_dimension_numbers<[1], [0], [0], [1], [0, 0, 1, 1], [], []>} : vector<256x16xf32>, vector<16x32xf32>, vector<256x32xf32> -> vector<256x32xf32>
    %4 = vector.broadcast %2 : vector<1x32xf32> to vector<256x32xf32>
    %5 = arith.addf %3, %4 : vector<256x32xf32>
    %cst_5 = arith.constant 0.000000e+00 : f32
    %6 = vector.broadcast %cst_5 : f32 to vector<256x32xf32>
    %7 = arith.maximumf %5, %6 : vector<256x32xf32>
    %c0_6 = arith.constant 0 : index
    %c0_7 = arith.constant 0 : index
    %8 = vector.load %arg4[%c0_6, %c0_7] : memref<32x64xf32, #tpu.memory_space<vmem>>, vector<32x64xf32>
    %c0_8 = arith.constant 0 : index
    %c0_9 = arith.constant 0 : index
    %9 = vector.load %arg5[%c0_8, %c0_9] : memref<1x64xf32, #tpu.memory_space<vmem>>, vector<1x64xf32>
    %cst_10 = arith.constant dense<0.000000e+00> : vector<256x64xf32>
    %10 = tpu.matmul %7, %8, %cst_10 {dimension_numbers = #tpu.dot_dimension_numbers<[1], [0], [0], [1], [0, 0, 1, 1], [], []>} : vector<256x32xf32>, vector<32x64xf32>, vector<256x64xf32> -> vector<256x64xf32>
    %11 = vector.broadcast %9 : vector<1x64xf32> to vector<256x64xf32>
    %12 = arith.addf %10, %11 : vector<256x64xf32>
    %cst_11 = arith.constant 0.000000e+00 : f32
    %13 = vector.broadcast %cst_11 : f32 to vector<256x64xf32>
    %14 = arith.maximumf %12, %13 : vector<256x64xf32>
    %c0_12 = arith.constant 0 : index
    %c0_13 = arith.constant 0 : index
    %15 = vector.load %arg6[%c0_12, %c0_13] : memref<64x16xf32, #tpu.memory_space<vmem>>, vector<64x16xf32>
    %c0_14 = arith.constant 0 : index
    %c0_15 = arith.constant 0 : index
    %16 = vector.load %arg7[%c0_14, %c0_15] : memref<1x16xf32, #tpu.memory_space<vmem>>, vector<1x16xf32>
    %cst_16 = arith.constant dense<0.000000e+00> : vector<256x16xf32>
    %17 = tpu.matmul %14, %15, %cst_16 {dimension_numbers = #tpu.dot_dimension_numbers<[1], [0], [0], [1], [0, 0, 1, 1], [], []>} : vector<256x64xf32>, vector<64x16xf32>, vector<256x16xf32> -> vector<256x16xf32>
    %18 = vector.broadcast %16 : vector<1x16xf32> to vector<256x16xf32>
    %19 = arith.addf %17, %18 : vector<256x16xf32>
    %c0_17 = arith.constant 0 : index
    %c0_18 = arith.constant 0 : index
    %20 = vector.load %arg12[%c0_17, %c0_18] : memref<256x16xf32, #tpu.memory_space<vmem>>, vector<256x16xf32>
    tpu.vector_store %arg12[%c0_17, %c0_18], %19 {strides = array<i32>} : memref<256x16xf32, #tpu.memory_space<vmem>>, vector<256x16xf32>,
    %c0_19 = arith.constant 0 : index
    %c0_20 = arith.constant 0 : index
    %21 = vector.load %arg8[%c0_19, %c0_20] : memref<16x16xf32, #tpu.memory_space<vmem>>, vector<16x16xf32>
    %cst_21 = arith.constant dense<0.000000e+00> : vector<256x16xf32>
    %22 = tpu.matmul %19, %21, %cst_21 {dimension_numbers = #tpu.dot_dimension_numbers<[1], [0], [0], [1], [0, 0, 1, 1], [], []>} : vector<256x16xf32>, vector<16x16xf32>, vector<256x16xf32> -> vector<256x16xf32>
    %c0_22 = arith.constant 0 : index
    %c0_23 = arith.constant 0 : index
    %23 = vector.load %arg9[%c0_22, %c0_23] : memref<1x16xf32, #tpu.memory_space<vmem>>, vector<1x16xf32>
    %24 = vector.broadcast %23 : vector<1x16xf32> to vector<256x16xf32>
    %25 = arith.addf %22, %24 : vector<256x16xf32>
    %26 = arith.truncf %25 : vector<256x16xf32> to vector<256x16xbf16>
    %c0_24 = arith.constant 0 : index
    %c0_25 = arith.constant 0 : index
    %27 = vector.load %arg13[%c0_24, %c0_25] : memref<256x16xbf16, #tpu.memory_space<vmem>>, vector<256x16xbf16>
    tpu.vector_store %arg13[%c0_24, %c0_25], %26 {strides = array<i32>} : memref<256x16xbf16, #tpu.memory_space<vmem>>, vector<256x16xbf16>,
    %c0_26 = arith.constant 0 : index
    %c0_27 = arith.constant 0 : index
    %28 = vector.load %arg10[%c0_26, %c0_27] : memref<16x16xf32, #tpu.memory_space<vmem>>, vector<16x16xf32>
    %cst_28 = arith.constant dense<0.000000e+00> : vector<256x16xf32>
    %29 = tpu.matmul %19, %28, %cst_28 {dimension_numbers = #tpu.dot_dimension_numbers<[1], [0], [0], [1], [0, 0, 1, 1], [], []>} : vector<256x16xf32>, vector<16x16xf32>, vector<256x16xf32> -> vector<256x16xf32>
    %c0_29 = arith.constant 0 : index
    %c0_30 = arith.constant 0 : index
    %30 = vector.load %arg11[%c0_29, %c0_30] : memref<1x16xf32, #tpu.memory_space<vmem>>, vector<1x16xf32>
    %31 = vector.broadcast %30 : vector<1x16xf32> to vector<256x16xf32>
    %32 = arith.addf %29, %31 : vector<256x16xf32>
    %cst_31 = arith.constant 2.500000e-01 : f32
    %33 = vector.broadcast %cst_31 : f32 to vector<256x16xf32>
    %34 = arith.mulf %32, %33 : vector<256x16xf32>
    %35 = arith.truncf %34 : vector<256x16xf32> to vector<256x16xbf16>
    %c0_32 = arith.constant 0 : index
    %c0_33 = arith.constant 0 : index
    %36 = vector.load %arg14[%c0_32, %c0_33] : memref<256x16xbf16, #tpu.memory_space<vmem>>, vector<256x16xbf16>
    tpu.vector_store %arg14[%c0_32, %c0_33], %35 {strides = array<i32>} : memref<256x16xbf16, #tpu.memory_space<vmem>>, vector<256x16xbf16>,
    return
  }
  func.func @transform_0(%arg0: i32) -> (i32, i32) {
    %c0_i32 = arith.constant 0 : i32
    %c0_i32_0 = arith.constant 0 : i32
    return %arg0, %c0_i32 : i32, i32
  }
  func.func @transform_1(%arg0: i32) -> (i32, i32) {
    %c0_i32 = arith.constant 0 : i32
    %c0_i32_0 = arith.constant 0 : i32
    %c0_i32_1 = arith.constant 0 : i32
    return %c0_i32, %c0_i32_0 : i32, i32
  }
  func.func @transform_2(%arg0: i32) -> (i32, i32) {
    %c0_i32 = arith.constant 0 : i32
    %c0_i32_0 = arith.constant 0 : i32
    %c0_i32_1 = arith.constant 0 : i32
    return %c0_i32, %c0_i32_0 : i32, i32
  }
  func.func @transform_3(%arg0: i32) -> (i32, i32) {
    %c0_i32 = arith.constant 0 : i32
    %c0_i32_0 = arith.constant 0 : i32
    %c0_i32_1 = arith.constant 0 : i32
    return %c0_i32, %c0_i32_0 : i32, i32
  }
  func.func @transform_4(%arg0: i32) -> (i32, i32) {
    %c0_i32 = arith.constant 0 : i32
    %c0_i32_0 = arith.constant 0 : i32
    %c0_i32_1 = arith.constant 0 : i32
    return %c0_i32, %c0_i32_0 : i32, i32
  }
  func.func @transform_5(%arg0: i32) -> (i32, i32) {
    %c0_i32 = arith.constant 0 : i32
    %c0_i32_0 = arith.constant 0 : i32
    %c0_i32_1 = arith.constant 0 : i32
    return %c0_i32, %c0_i32_0 : i32, i32
  }
  func.func @transform_6(%arg0: i32) -> (i32, i32) {
    %c0_i32 = arith.constant 0 : i32
    %c0_i32_0 = arith.constant 0 : i32
    %c0_i32_1 = arith.constant 0 : i32
    return %c0_i32, %c0_i32_0 : i32, i32
  }
  func.func @transform_7(%arg0: i32) -> (i32, i32) {
    %c0_i32 = arith.constant 0 : i32
    %c0_i32_0 = arith.constant 0 : i32
    %c0_i32_1 = arith.constant 0 : i32
    return %c0_i32, %c0_i32_0 : i32, i32
  }
  func.func @transform_8(%arg0: i32) -> (i32, i32) {
    %c0_i32 = arith.constant 0 : i32
    %c0_i32_0 = arith.constant 0 : i32
    %c0_i32_1 = arith.constant 0 : i32
    return %c0_i32, %c0_i32_0 : i32, i32
  }
  func.func @transform_9(%arg0: i32) -> (i32, i32) {
    %c0_i32 = arith.constant 0 : i32
    %c0_i32_0 = arith.constant 0 : i32
    %c0_i32_1 = arith.constant 0 : i32
    return %c0_i32, %c0_i32_0 : i32, i32
  }
  func.func @transform_10(%arg0: i32) -> (i32, i32) {
    %c0_i32 = arith.constant 0 : i32
    %c0_i32_0 = arith.constant 0 : i32
    %c0_i32_1 = arith.constant 0 : i32
    return %c0_i32, %c0_i32_0 : i32, i32
  }
  func.func @transform_11(%arg0: i32) -> (i32, i32) {
    %c0_i32 = arith.constant 0 : i32
    %c0_i32_0 = arith.constant 0 : i32
    return %arg0, %c0_i32 : i32, i32
  }
  func.func @transform_12(%arg0: i32) -> (i32, i32) {
    %c0_i32 = arith.constant 0 : i32
    %c0_i32_0 = arith.constant 0 : i32
    return %arg0, %c0_i32 : i32, i32
  }
  func.func @transform_13(%arg0: i32) -> (i32, i32) {
    %c0_i32 = arith.constant 0 : i32
    %c0_i32_0 = arith.constant 0 : i32
    return %arg0, %c0_i32 : i32, i32
  }
}

</mosaic_0001>

<bundles_post_ra>
// kernel: wls_mlp_layer_e.3
= control target key start
LH: loop header
LB: loop body
LE: loop exit
PB: predicated region body
PF: predicated region fallthrough
CT: control target
= control target key end

     0   :  { %s2443_s15 = smov 0   ;;  %s2445_s16 = smov 0   ;;  %s2923_s0 = inlined_call_operand.vmem [shape: f32[512,16], index: 0, kind: input, shape index: {}]   ;;  %s2924_s1 = inlined_call_operand.vmem [shape: bf16[512,16], index: 1, kind: input, shape index: {}]   ;;  %s2925_s2 = inlined_call_operand.vmem [shape: bf16[512,16], index: 2, kind: input, shape index: {}]   ;;  %s2926_s3 = inlined_call_operand.vmem [shape: s8[512,512], index: 3, kind: input, shape index: {}]   ;;  %s2927_s4 = inlined_call_operand.vmem [shape: f32[512,32], index: 4, kind: output, shape index: {}]  }
   0x1   :  { %s2447_s17 = smov 0   ;;  %s2449_s18 = smov 0  }
   0x2   :  { %s2451_s19 = smov 0   ;;  %s2453_s20 = smov 0  }
   0x3   :  { %s2455_s21 = smov 0  }
   0x4 LB: > { %s23_s22 = sadd.s32 1, %s2406_s19  ;;  %s26_s23 = sadd.s32 1, %s2410_s20  ;;  %s2414_s21 = sphi %s2455_s21, %s14_s21   ;;  %s2410_s20 = sphi %s2453_s20, %s2933_s20   ;;  %s2406_s19 = sphi %s2451_s19, %s2932_s19   ;;  %s2402_s18 = sphi %s2449_s18, %s2931_s18   ;;  %s2398_s17 = sphi %s2447_s17, %s2930_s17   ;;  %s2394_s16 = sphi %s2445_s16, %s2929_s16   ;;  %s2390_s15 = sphi %s2443_s15, %s2928_s15  }
   0x5   : > { %p24_p0 = scmp.ge.s32.totalorder %s23_s22, 2  ;;  %p120_p1 = scmp.ne.s32.totalorder %s2394_s16, %s2390_s15 }
   0x6   : > { %p121_p2 = scmp.eq.s32.totalorder %s2414_s21, 0  ;;  %s113_s27 = sadd.s32 1, %s2394_s16 }
   0x7   : > { %s2935_s22 = smov (%p24_p0, %s23_s22), 0  ;;  %s2937_s23 = smov (!%p24_p0, %s26_s23), %s2410_s20 }
   0x8   : > { %p122_p3 = por %p121_p2, %p120_p1  ;;  %p28_p4 = scmp.ge.s32.totalorder %s2937_s23, 2 }
   0x9   : > { %s109_s24 = ssub.s32 %s2406_s19, %s2935_s22  ;;  %p1873_p6 = scmp.ge.s32.totalorder %s2414_s21, 4 }
   0xa   : > { %s2939_s23 = smov (%p28_p4, %s2937_s23), 0 }
   0xb   : > { %s108_s25 = ssub.s32 %s2410_s20, %s2939_s23  ;;  %172 = sbr.rel (%p1873_p6) target bundleno = 33 (0x21), region = 16 }
   0xc   : > { %s110_s26 = sor.u32 %s109_s24, %s108_s25 }
   0xd   : > { %p111_p5 = scmp.eq.s32.totalorder %s110_s26, 0 }
   0xf   : > { %s2494_s28 = scalar_select %p111_p5, %s2394_s16, %s113_s27  }
  0x12   : > { %202 = sbr.rel (!%p122_p3) target bundleno = 33 (0x21), region = 32  ;;  %s204_s29 = sand.u32 (%p122_p3), 1, %s2394_s16  }
  0x13   : > { %s1876_s30 = sshll.u32 (%p122_p3), %s2406_s19, 1  ;;  %s1874_s5 = sshll.u32 (%p122_p3), %s204_s29, 7 }
  0x14   : > { %s1973_s6 = sshll.u32 (%p122_p3), %s2410_s20, 5  ;;  %s206_s12 = scalar_lea.vmem (%p122_p3), [#allocation3], %s1874_s5 }
  0x15   : > { %s210_s7 = sadd.s32 (%p122_p3), %s1973_s6, %s1876_s30 }
  0x16   : > { %s1878_s8 = sshll.u32 (%p122_p3), %s210_s7, 3 }
  0x17   : > { %s2503_s11 = scalar_lea.vmem (%p122_p3), %s2926_s3, %s1878_s8 }
  0x18   : > { %v225_v0 = vld [vmem:[%s2503_s11] sm:$0xff] (%p122_p3)  ;;  %v227_v1 = vld [vmem:[%s2503_s11 + $0x8] sm:$0xff] (%p122_p3) }
  0x19   : > { %v229_v2 = vld [vmem:[%s2503_s11 + $0x20] sm:$0xff]  ;;  %226 = vst [vmem:[%s206_s12] sm:$0xff] %v225_v0  ;;  %228 = vst [vmem:[%s206_s12 + $0x8] sm:$0xff] %v227_v1  ;;  %v231_v3 = vld [vmem:[%s2503_s11 + $0x28] sm:$0xff] }
  0x1a   : > { %230 = vst [vmem:[%s206_s12 + $0x10] sm:$0xff] %v229_v2  ;;  %v233_v4 = vld [vmem:[%s2503_s11 + $0x40] sm:$0xff]  ;;  %v235_v5 = vld [vmem:[%s2503_s11 + $0x48] sm:$0xff]  ;;  %232 = vst [vmem:[%s206_s12 + $0x18] sm:$0xff] %v231_v3 }
  0x1b   : > { %234 = vst [vmem:[%s206_s12 + $0x20] sm:$0xff] %v233_v4  ;;  %236 = vst [vmem:[%s206_s12 + $0x28] sm:$0xff] %v235_v5  ;;  %v237_v6 = vld [vmem:[%s2503_s11 + $0x60] sm:$0xff]  ;;  %v239_v7 = vld [vmem:[%s2503_s11 + $0x68] sm:$0xff] }
  0x1c   : > { %v241_v8 = vld [vmem:[%s2503_s11 + $0x80] sm:$0xff]  ;;  %238 = vst [vmem:[%s206_s12 + $0x30] sm:$0xff] %v237_v6  ;;  %240 = vst [vmem:[%s206_s12 + $0x38] sm:$0xff] %v239_v7  ;;  %v243_v9 = vld [vmem:[%s2503_s11 + $0x88] sm:$0xff] }
  0x1d   : > { %242 = vst [vmem:[%s206_s12 + $0x40] sm:$0xff] %v241_v8  ;;  %v245_v10 = vld [vmem:[%s2503_s11 + $0xa0] sm:$0xff]  ;;  %v247_v11 = vld [vmem:[%s2503_s11 + $0xa8] sm:$0xff]  ;;  %244 = vst [vmem:[%s206_s12 + $0x48] sm:$0xff] %v243_v9 }
  0x1e   : > { %246 = vst [vmem:[%s206_s12 + $0x50] sm:$0xff] %v245_v10  ;;  %248 = vst [vmem:[%s206_s12 + $0x58] sm:$0xff] %v247_v11  ;;  %v249_v12 = vld [vmem:[%s2503_s11 + $0xc0] sm:$0xff]  ;;  %v251_v13 = vld [vmem:[%s2503_s11 + $0xc8] sm:$0xff] }
  0x1f   : > { %v253_v14 = vld [vmem:[%s2503_s11 + $0xe0] sm:$0xff]  ;;  %250 = vst [vmem:[%s206_s12 + $0x60] sm:$0xff] %v249_v12  ;;  %252 = vst [vmem:[%s206_s12 + $0x68] sm:$0xff] %v251_v13  ;;  %v255_v15 = vld [vmem:[%s2503_s11 + $0xe8] sm:$0xff] }
  0x20   : > { %254 = vst [vmem:[%s206_s12 + $0x70] sm:$0xff] %v253_v14  ;;  %256 = vst [vmem:[%s206_s12 + $0x78] sm:$0xff] %v255_v15 }
  0x21 PF: > { %p1879_p7 = scmp.ge.s32.totalorder %s2414_s21, 1  ;;  %p261_p8 = scmp.lt.s32.totalorder %s2414_s21, 5 }
  0x23   : > { %p262_p9 = pnand %p1879_p7, %p261_p8 }
  0x24   : > { %s268_s13 = sand.u32 (!%p262_p9), 1, %s2390_s15   ;;  %s1881_s14 = sshll.u32 (!%p262_p9), %s2402_s18, 5 }
  0x25   : > { %265 = sbr.rel (%p262_p9) target bundleno = 847 (0x34f), region = 55  ;;  %s1880_s24 = sshll.u32 (!%p262_p9), %s268_s13, 7 }
  0x26   : > { %p309_p10 = scmp.lt.s32.totalorder (!%p262_p9), %s1881_s14, 63  ;;  %s1883_s25 = sshll.u32 (!%p262_p9), %s2398_s17, 5 }
  0x27   : > { %p315_p11 = scmp.lt.s32.totalorder (!%p262_p9), %s1883_s25, 63  ;;  %p1889_p12 = scmp.ne.s32.totalorder (!%p262_p9), %s2398_s17, 0 }
  0x2c   : > { %s2941_s14 = smov (!%p309_p10, %s1881_s14), 63  ;;  %s2943_s25 = smov (!%p315_p11, %s1883_s25), 63 }
  0x2d   : > { %s1882_s26 = sshll.u32 %s2941_s14, 3  ;;  %s1886_s27 = sshll.u32 %s2941_s14, 2  ;;  %vm340_vm0 = vcmask (!%p1889_p12), 130048   ;;  %v2416_v16 = vmov (!%p1889_p12), 0.0  }
  0x2e   : > { %s2529_s5 = scalar_lea.vmem %s2923_s0, %s1882_s26  ;;  %s2534_s8 = scalar_lea.vmem %s2925_s2, %s1886_s27  ;;  %341 = vst.msk [vmem:[#allocation2] sm:$0xff] (!%p1889_p12), %vm340_vm0, %v2416_v16  ;;  %342 = vst.msk [vmem:[#allocation2 + $0x8] sm:$0xff] (!%p1889_p12), %vm340_vm0, %v2416_v16 }
  0x2f   : > { %s2539_s9 = scalar_lea.vmem %s2927_s4, %s1882_s26  ;;  %s1884_s10 = sshll.u32 %s2943_s25, 2  ;;  %343 = vst.msk [vmem:[#allocation2 + $0x10] sm:$0xff] (!%p1889_p12), %vm340_vm0, %v2416_v16  ;;  %344 = vst.msk [vmem:[#allocation2 + $0x18] sm:$0xff] (!%p1889_p12), %vm340_vm0, %v2416_v16 }
  0x30   : > { %s2544_s13 = scalar_lea.vmem %s2924_s1, %s1884_s10  ;;  %s2546_s14 = scalar_lea.vmem [#allocation3], %s1880_s24  ;;  %345 = vst.msk [vmem:[#allocation2 + $0x20] sm:$0xff] (!%p1889_p12), %vm340_vm0, %v2416_v16  ;;  %346 = vst.msk [vmem:[#allocation2 + $0x28] sm:$0xff] (!%p1889_p12), %vm340_vm0, %v2416_v16 }
  0x31   : > { %339 = sbr.rel (%p1889_p12) target bundleno = 62 (0x3e), region = 63  ;;  %347 = vst.msk [vmem:[#allocation2 + $0x30] sm:$0xff] (!%p1889_p12), %vm340_vm0, %v2416_v16  ;;  %348 = vst.msk [vmem:[#allocation2 + $0x38] sm:$0xff] (!%p1889_p12), %vm340_vm0, %v2416_v16 }
  0x32   : > { %349 = vst.msk [vmem:[#allocation2 + $0x40] sm:$0xff] (!%p1889_p12), %vm340_vm0, %v2416_v16  ;;  %350 = vst.msk [vmem:[#allocation2 + $0x48] sm:$0xff] (!%p1889_p12), %vm340_vm0, %v2416_v16 }
  0x33   : > { %351 = vst.msk [vmem:[#allocation2 + $0x50] sm:$0xff] (!%p1889_p12), %vm340_vm0, %v2416_v16  ;;  %352 = vst.msk [vmem:[#allocation2 + $0x58] sm:$0xff] (!%p1889_p12), %vm340_vm0, %v2416_v16 }
  0x34   : > { %353 = vst.msk [vmem:[#allocation2 + $0x60] sm:$0xff] (!%p1889_p12), %vm340_vm0, %v2416_v16  ;;  %354 = vst.msk [vmem:[#allocation2 + $0x68] sm:$0xff] (!%p1889_p12), %vm340_vm0, %v2416_v16 }
  0x35   : > { %355 = vst.msk [vmem:[#allocation2 + $0x70] sm:$0xff] (!%p1889_p12), %vm340_vm0, %v2416_v16  ;;  %356 = vst.msk [vmem:[#allocation2 + $0x78] sm:$0xff] (!%p1889_p12), %vm340_vm0, %v2416_v16 }
  0x36   : > { %357 = vst.msk [vmem:[#allocation2 + $0x80] sm:$0xff] (!%p1889_p12), %vm340_vm0, %v2416_v16  ;;  %358 = vst.msk [vmem:[#allocation2 + $0x88] sm:$0xff] (!%p1889_p12), %vm340_vm0, %v2416_v16 }
  0x37   : > { %359 = vst.msk [vmem:[#allocation2 + $0x90] sm:$0xff] (!%p1889_p12), %vm340_vm0, %v2416_v16  ;;  %360 = vst.msk [vmem:[#allocation2 + $0x98] sm:$0xff] (!%p1889_p12), %vm340_vm0, %v2416_v16 }
  0x38   : > { %361 = vst.msk [vmem:[#allocation2 + $0xa0] sm:$0xff] %vm340_vm0, %v2416_v16  ;;  %362 = vst.msk [vmem:[#allocation2 + $0xa8] sm:$0xff] %vm340_vm0, %v2416_v16 }
  0x39   : > { %363 = vst.msk [vmem:[#allocation2 + $0xb0] sm:$0xff] %vm340_vm0, %v2416_v16  ;;  %364 = vst.msk [vmem:[#allocation2 + $0xb8] sm:$0xff] %vm340_vm0, %v2416_v16 }
  0x3a   : > { %365 = vst.msk [vmem:[#allocation2 + $0xc0] sm:$0xff] %vm340_vm0, %v2416_v16  ;;  %366 = vst.msk [vmem:[#allocation2 + $0xc8] sm:$0xff] %vm340_vm0, %v2416_v16 }
  0x3b   : > { %367 = vst.msk [vmem:[#allocation2 + $0xd0] sm:$0xff] %vm340_vm0, %v2416_v16  ;;  %368 = vst.msk [vmem:[#allocation2 + $0xd8] sm:$0xff] %vm340_vm0, %v2416_v16 }
  0x3c   : > { %369 = vst.msk [vmem:[#allocation2 + $0xe0] sm:$0xff] %vm340_vm0, %v2416_v16  ;;  %370 = vst.msk [vmem:[#allocation2 + $0xe8] sm:$0xff] %vm340_vm0, %v2416_v16 }
  0x3d   : > { %371 = vst.msk [vmem:[#allocation2 + $0xf0] sm:$0xff] %vm340_vm0, %v2416_v16  ;;  %372 = vst.msk [vmem:[#allocation2 + $0xf8] sm:$0xff] %vm340_vm0, %v2416_v16 }
  0x3e PF: > { %v2200_v17 = vld [vmem:[%s2544_s13 + $0x40] sm:$0xff]   ;;  %vm597_vm1 = vcmask 130048   ;;  %v2202_v19 = vld [vmem:[%s2544_s13 + $0x48] sm:$0xff]   ;;  %v2204_v22 = vld [vmem:[%s2544_s13 + $0x50] sm:$0xff]   ;;  %p1970_p13 = scmp.ne.s32.totalorder %s2398_s17, 1 }
  0x3f   : > { %v2201_v18 = vld [vmem:[%s2544_s13] sm:$0xff]   ;;  %2134 = vmatprep.subr.msk.bf16.mxu0 %vm597_vm1, %v2200_v17  ;;  %2022 = vmatprep.subr.bf16.mxu1 %v2200_v17  ;;  %v2203_v21 = vld [vmem:[%s2544_s13 + $0x8] sm:$0xff]   ;;  %v2205_v24 = vld [vmem:[%s2544_s13 + $0x10] sm:$0xff]   ;;  %s2417_s24 = smov (!%p1970_p13), 16   ;;  %vm1724_vm2 = vcmask (!%p1970_p13), 261248  }
  0x40   : > { %v647_v20 = vsel %vm597_vm1, %v2201_v18, 0  ;;  %2023 = vmatpush3.bf16.msra.mxu1 %v2201_v18  ;;  %v650_v23 = vsel %vm597_vm1, %v2203_v21, 0  ;;  %v2206_v25 = vld [vmem:[%s2544_s13 + $0x58] sm:$0xff]   ;;  %v2208_v27 = vld [vmem:[%s2544_s13 + $0x60] sm:$0xff]   ;;  %v653_v29 = vsel %vm597_vm1, %v2205_v24, 0  ;;  %v2210_v31 = vld [vmem:[%s2544_s13 + $0x68] sm:$0xff]  }
  0x41   : > { %1975 = vmatpush3.bf16.xpose.msra.mxu0 %v647_v20  ;;  %2024 = vmatprep.subr.bf16.mxu1 %v2202_v19  ;;  %v2207_v26 = vld [vmem:[%s2544_s13 + $0x18] sm:$0xff]   ;;  %v2216_v28 = vld [vmem:[%s2534_s8] sm:$0xff]   ;;  %v2211_v32 = vld [vmem:[%s2544_s13 + $0x28] sm:$0xff]  }
  0x42   : > { %2135 = vmatprep.subr.msk.bf16.mxu0 %vm597_vm1, %v2202_v19  ;;  %v2209_v30 = vld [vmem:[%s2544_s13 + $0x20] sm:$0xff]   ;;  %1990 = vmatprep.mubr.msk.bf16.mxu0 %vm597_vm1, %v2216_v28  ;;  %v2212_v33 = vld [vmem:[%s2544_s13 + $0x70] sm:$0xff]   ;;  %v656_v34 = vsel %vm597_vm1, %v2207_v26, 0  ;;  %v2214_v36 = vld [vmem:[%s2544_s13 + $0x78] sm:$0xff]   ;;  %v662_v39 = vsel %vm597_vm1, %v2211_v32, 0 }
  0x43   : > { %v2213_v35 = vld [vmem:[%s2544_s13 + $0x30] sm:$0xff]   ;;  %v2215_v37 = vld [vmem:[%s2544_s13 + $0x38] sm:$0xff]   ;;  %v659_v38 = vsel %vm597_vm1, %v2209_v30, 0  ;;  %v2217_v42 = vld [vmem:[%s2534_s8 + $0x8] sm:$0xff]  }
  0x44   : > { %2025 = vmatpush3.bf16.msra.mxu1 %v2203_v21  ;;  %v665_v40 = vsel %vm597_vm1, %v2213_v35, 0  ;;  %v668_v41 = vsel %vm597_vm1, %v2215_v37, 0  ;;  %v2218_v43 = vld [vmem:[%s2534_s8 + $0x10] sm:$0xff]   ;;  %v2219_v44 = vld [vmem:[%s2534_s8 + $0x18] sm:$0xff]   ;;  %v2220_v45 = vld [vmem:[%s2534_s8 + $0x20] sm:$0xff]  }
  0x45   : > { %2026 = vmatprep.subr.bf16.mxu1 %v2204_v22  ;;  %v2221_v46 = vld [vmem:[%s2534_s8 + $0x28] sm:$0xff]   ;;  %v2222_v47 = vld [vmem:[%s2534_s8 + $0x30] sm:$0xff]   ;;  %v2223_v48 = vld [vmem:[%s2534_s8 + $0x38] sm:$0xff]  }
  0x46   : > { %v2224_v49 = vld [vmem:[%s2534_s8 + $0x40] sm:$0xff]   ;;  %v2225_v50 = vld [vmem:[%s2534_s8 + $0x48] sm:$0xff]   ;;  %v2226_v51 = vld [vmem:[%s2534_s8 + $0x50] sm:$0xff]  }
  0x47   : > { %v2227_v52 = vld [vmem:[%s2534_s8 + $0x58] sm:$0xff]   ;;  %v2228_v53 = vld [vmem:[%s2534_s8 + $0x60] sm:$0xff]   ;;  %v2229_v54 = vld [vmem:[%s2534_s8 + $0x68] sm:$0xff]  }
  0x48   : > { %2027 = vmatpush3.bf16.msra.mxu1 %v2205_v24  ;;  %v2230_v55 = vld [vmem:[%s2534_s8 + $0x70] sm:$0xff]   ;;  %v2231_v56 = vld [vmem:[%s2534_s8 + $0x78] sm:$0xff]  }
  0x49   : > { %1977 = vmatpush3.bf16.xpose.msra.mxu0 %v650_v23  ;;  %2028 = vmatprep.subr.bf16.mxu1 %v2206_v25 }
  0x4a   : > { %2136 = vmatprep.subr.msk.bf16.mxu0 %vm597_vm1, %v2204_v22 }
  0x4c   : > { %2029 = vmatpush3.bf16.msra.mxu1 %v2207_v26 }
  0x4d   : > { %2030 = vmatprep.subr.bf16.mxu1 %v2208_v27 }
  0x50   : > { %2031 = vmatpush3.bf16.msra.mxu1 %v2209_v30 }
  0x51   : > { %1979 = vmatpush3.bf16.xpose.msra.mxu0 %v653_v29  ;;  %2032 = vmatprep.subr.bf16.mxu1 %v2210_v31 }
  0x52   : > { %2137 = vmatprep.subr.msk.bf16.mxu0 %vm597_vm1, %v2206_v25 }
  0x54   : > { %2033 = vmatpush3.bf16.msra.mxu1 %v2211_v32  ;;  %v1144_v32 = vld [vmem:[%s2546_s14 + $0x8] sm:$0xff] }
  0x55   : > { %2034 = vmatprep.subr.bf16.mxu1 %v2212_v33 }
  0x58   : > { %2035 = vmatpush3.bf16.msra.mxu1 %v2213_v35 }
  0x59   : > { %1981 = vmatpush3.bf16.xpose.msra.mxu0 %v656_v34  ;;  %2036 = vmatprep.subr.bf16.mxu1 %v2214_v36  ;;  %v1143_v34 = vld [vmem:[%s2546_s14] sm:$0xff] }
  0x5a   : > { %2138 = vmatprep.subr.msk.bf16.mxu0 %vm597_vm1, %v2208_v27 }
  0x5c   : > { %2037 = vmatpush3.bf16.msra.mxu1 %v2215_v37  ;;  %v1160_v37 = vunpack.c.l.s8.bf16 %v1144_v32 }
  0x61   : > { %1983 = vmatpush3.bf16.xpose.msra.mxu0 %v659_v38 }
  0x62   : > { %2139 = vmatprep.subr.msk.bf16.mxu0 %vm597_vm1, %v2210_v31 }
  0x69   : > { %1985 = vmatpush3.bf16.xpose.msra.mxu0 %v662_v39 }
  0x6a   : > { %2140 = vmatprep.subr.msk.bf16.mxu0 %vm597_vm1, %v2212_v33 }
  0x71   : > { %1987 = vmatpush3.bf16.xpose.msra.mxu0 %v665_v40 }
  0x72   : > { %2141 = vmatprep.subr.msk.bf16.mxu0 %vm597_vm1, %v2214_v36 }
  0x79   : > { %1989 = vmatpush3.bf16.xpose.msra.mxu0 %v668_v41  ;;  %v1159_v41 = vunpack.c.l.s8.bf16 %v1143_v34 }
  0x80   : > { %1991 = vmatmul.mubr.msk.bf16.vlgmr.msra.gmra.mrb[0].mxu0 %vm597_vm1, %v2216_v28 }
  0x81   : > { %1992 = vmatprep.mubr.msk.bf16.mxu0 %vm597_vm1, %v2217_v42 }
  0x88   : > { %1993 = vmatmul.mubr.msk.bf16.gmra.mrb[4].mxu0 %vm597_vm1, %v2217_v42 }
  0x89   : > { %1994 = vmatprep.mubr.msk.bf16.mxu0 %vm597_vm1, %v2218_v43 }
  0x90   : > { %1995 = vmatmul.mubr.msk.bf16.gmra.mrb[8].mxu0 %vm597_vm1, %v2218_v43 }
  0x91   : > { %1996 = vmatprep.mubr.msk.bf16.mxu0 %vm597_vm1, %v2219_v44 }
  0x98   : > { %1997 = vmatmul.mubr.msk.bf16.gmra.mrb[12].mxu0 %vm597_vm1, %v2219_v44 }
  0x99   : > { %1998 = vmatprep.mubr.msk.bf16.mxu0 %vm597_vm1, %v2220_v45 }
  0xa0   : > { %1999 = vmatmul.mubr.msk.bf16.gmra.mrb[16].mxu0 %vm597_vm1, %v2220_v45 }
  0xa1   : > { %2000 = vmatprep.mubr.msk.bf16.mxu0 %vm597_vm1, %v2221_v46 }
  0xa8   : > { %2001 = vmatmul.mubr.msk.bf16.gmra.mrb[20].mxu0 %vm597_vm1, %v2221_v46 }
  0xa9   : > { %2002 = vmatprep.mubr.msk.bf16.mxu0 %vm597_vm1, %v2222_v47 }
  0xb0   : > { %2003 = vmatmul.mubr.msk.bf16.gmra.mrb[24].mxu0 %vm597_vm1, %v2222_v47 }
  0xb1   : > { %2004 = vmatprep.mubr.msk.bf16.mxu0 %vm597_vm1, %v2223_v48 }
  0xb8   : > { %2005 = vmatmul.mubr.msk.bf16.gmra.mrb[28].mxu0 %vm597_vm1, %v2223_v48 }
  0xb9   : > { %2006 = vmatprep.mubr.msk.bf16.mxu0 %vm597_vm1, %v2224_v49 }
  0xc0   : > { %2007 = vmatmul.mubr.msk.bf16.gmra.mrb[32].mxu0 %vm597_vm1, %v2224_v49 }
  0xc1   : > { %2008 = vmatprep.mubr.msk.bf16.mxu0 %vm597_vm1, %v2225_v50 }
  0xc8   : > { %2009 = vmatmul.mubr.msk.bf16.gmra.mrb[36].mxu0 %vm597_vm1, %v2225_v50 }
  0xc9   : > { %2010 = vmatprep.mubr.msk.bf16.mxu0 %vm597_vm1, %v2226_v51 }
  0xd0   : > { %2011 = vmatmul.mubr.msk.bf16.gmra.mrb[40].mxu0 %vm597_vm1, %v2226_v51 }
  0xd1   : > { %2012 = vmatprep.mubr.msk.bf16.mxu0 %vm597_vm1, %v2227_v52 }
  0xd8   : > { %2013 = vmatmul.mubr.msk.bf16.gmra.mrb[44].mxu0 %vm597_vm1, %v2227_v52 }
  0xd9   : > { %2014 = vmatprep.mubr.msk.bf16.mxu0 %vm597_vm1, %v2228_v53 }
  0xe0   : > { %2015 = vmatmul.mubr.msk.bf16.gmra.mrb[48].mxu0 %vm597_vm1, %v2228_v53 }
  0xe1   : > { %2016 = vmatprep.mubr.msk.bf16.mxu0 %vm597_vm1, %v2229_v54 }
  0xe8   : > { %2017 = vmatmul.mubr.msk.bf16.gmra.mrb[52].mxu0 %vm597_vm1, %v2229_v54 }
  0xe9   : > { %2018 = vmatprep.mubr.msk.bf16.mxu0 %vm597_vm1, %v2230_v55 }
  0xf0   : > { %2019 = vmatmul.mubr.msk.bf16.gmra.mrb[56].mxu0 %vm597_vm1, %v2230_v55 }
  0xf1   : > { %2020 = vmatprep.mubr.msk.bf16.mxu0 %vm597_vm1, %v2231_v56 }
  0xf8   : > { %2021 = vmatmul.mubr.msk.bf16.gmra.mrb[60].mxu0 %vm597_vm1, %v2231_v56  ;;  %v1162_v56 = vunpack.c.h.s8.bf16 %v1144_v32 }
 0x153   : > { %v728_v57 = vpop.f32.mrb[0].mxu0 }
 0x154   : > { %v730_v58 = vpop.f32.mrb[1].mxu0 }
 0x155   : > { %v732_v59 = vpop.f32.mrb[2].mxu0 }
 0x156   : > { %v887_v60 = vpack.c.bf16 %v732_v59, %v728_v57  ;;  %v734_v61 = vpop.f32.mrb[3].mxu0 }
 0x157   : > { %v888_v62 = vpack.c.bf16 %v734_v61, %v730_v58  ;;  %v1161_v61 = vunpack.c.h.s8.bf16 %v1143_v34 }
 0x158   : > { %v1938_v63 = vmul.bf16 3216621497, %v887_v60 }
 0x159   : > { %v1939_v0 = vmul.bf16 3216621497, %v888_v62 }
 0x15a   : > { %2232 = vpow.bf16 %v1938_v63 }
 0x15b   : > { %2234 = vpow.bf16 %v1939_v0  ;;  %v738_v1 = vpop.f32.mrb[4].mxu0 }
 0x15c   : > { %v740_v2 = vpop.f32.mrb[5].mxu0 }
 0x15d   : > { %v742_v3 = vpop.f32.mrb[6].mxu0 }
 0x15e   : > { %v889_v4 = vpack.c.bf16 %v742_v3, %v738_v1  ;;  %v744_v5 = vpop.f32.mrb[7].mxu0 }
 0x15f   : > { %v890_v6 = vpack.c.bf16 %v744_v5, %v740_v2 }
 0x160   : > { %v1940_v7 = vmul.bf16 3216621497, %v889_v4 }
 0x161   : > { %v1941_v8 = vmul.bf16 3216621497, %v890_v6 }
 0x162   : > { %2236 = vpow.bf16 %v1940_v7 }
 0x163   : > { %2238 = vpow.bf16 %v1941_v8  ;;  %v748_v9 = vpop.f32.mrb[8].mxu0 }
 0x164   : > { %v750_v10 = vpop.f32.mrb[9].mxu0 }
 0x165   : > { %v2233_v11 = vpop.eup %2232  ;;  %v752_v12 = vpop.f32.mrb[10].mxu0 }
 0x166   : > { %v2235_v13 = vpop.eup %2234  ;;  %v1047_v14 = vadd.bf16 1065369472, %v2233_v11  ;;  %v891_v15 = vpack.c.bf16 %v752_v12, %v748_v9  ;;  %v754_v16 = vpop.f32.mrb[11].mxu0  ;;  %v1145_v12 = vld [vmem:[%s2546_s14 + $0x10] sm:$0xff] }
 0x167   : > { %v1048_v17 = vadd.bf16 1065369472, %v2235_v13  ;;  %v892_v18 = vpack.c.bf16 %v754_v16, %v750_v10  ;;  %v1146_v10 = vld [vmem:[%s2546_s14 + $0x18] sm:$0xff] }
 0x168   : > { %2240 = vrcp.bf16 %v1047_v14  ;;  %v1942_v19 = vmul.bf16 3216621497, %v891_v15  ;;  %v1164_v15 = vunpack.c.l.s8.bf16 %v1146_v10 }
 0x169   : > { %v1943_v20 = vmul.bf16 3216621497, %v892_v18  ;;  %2242 = vrcp.bf16 %v1048_v17 }
 0x16a   : > { %2244 = vpow.bf16 %v1942_v19  ;;  %v1163_v19 = vunpack.c.l.s8.bf16 %v1145_v12 }
 0x16b   : > { %2246 = vpow.bf16 %v1943_v20  ;;  %v758_v21 = vpop.f32.mrb[12].mxu0 }
 0x16c   : > { %v760_v22 = vpop.f32.mrb[13].mxu0 }
 0x16d   : > { %v2237_v23 = vpop.eup %2236  ;;  %v762_v24 = vpop.f32.mrb[14].mxu0 }
 0x16e   : > { %v2239_v25 = vpop.eup %2238  ;;  %v1049_v26 = vadd.bf16 1065369472, %v2237_v23  ;;  %v893_v27 = vpack.c.bf16 %v762_v24, %v758_v21  ;;  %v764_v28 = vpop.f32.mrb[15].mxu0 }
 0x16f   : > { %v1050_v29 = vadd.bf16 1065369472, %v2239_v25  ;;  %v894_v30 = vpack.c.bf16 %v764_v28, %v760_v22 }
 0x170   : > { %2248 = vrcp.bf16 %v1049_v26  ;;  %v1944_v31 = vmul.bf16 3216621497, %v893_v27 }
 0x171   : > { %2250 = vrcp.bf16 %v1050_v29  ;;  %v1945_v33 = vmul.bf16 3216621497, %v894_v30 }
 0x172   : > { %2252 = vpow.bf16 %v1944_v31 }
 0x173   : > { %v2241_v35 = vpop.eup %2240  ;;  %2254 = vpow.bf16 %v1945_v33  ;;  %v768_v36 = vpop.f32.mrb[16].mxu0 }
 0x174   : > { %v2243_v38 = vpop.eup %2242  ;;  %v770_v39 = vpop.f32.mrb[17].mxu0  ;;  %v1080_v40 = vmul.bf16 1065369472, %v2241_v35  ;;  %v1166_v35 = vunpack.c.h.s8.bf16 %v1146_v10 }
 0x175   : > { %v2245_v42 = vpop.eup %2244  ;;  %v772_v43 = vpop.f32.mrb[18].mxu0  ;;  %v1082_v44 = vmul.bf16 1065369472, %v2243_v38 }
 0x176   : > { %v2247_v45 = vpop.eup %2246  ;;  %v1051_v46 = vadd.bf16 1065369472, %v2245_v42  ;;  %v895_v47 = vpack.c.bf16 %v772_v43, %v768_v36  ;;  %v774_v48 = vpop.f32.mrb[19].mxu0  ;;  %v1191_v53 = vmul.bf16 %v1159_v41, %v1080_v40 }
 0x177   : > { %v1052_v49 = vadd.bf16 1065369472, %v2247_v45  ;;  %v896_v50 = vpack.c.bf16 %v774_v48, %v770_v39  ;;  %v1192_v51 = vmul.bf16 %v1160_v37, %v1082_v44  ;;  %v1165_v39 = vunpack.c.h.s8.bf16 %v1145_v12 }
 0x178   : > { %2256 = vrcp.bf16 %v1051_v46  ;;  %v1946_v52 = vmul.bf16 3216621497, %v895_v47 }
 0x179   : > { %2258 = vrcp.bf16 %v1052_v49  ;;  %v1947_v54 = vmul.bf16 3216621497, %v896_v50  ;;  %1303 = vmatprep.mubr.bf16.mxu1 %v1192_v51 }
 0x17a   : > { %2260 = vpow.bf16 %v1946_v52  ;;  %1304 = vmatmul.mubr.bf16.vlgmr.msra.gmra.mrb[0].mxu1 %v1191_v53  ;;  %v1148_v52 = vld [vmem:[%s2546_s14 + $0x28] sm:$0xff] }
 0x17b   : > { %v2249_v55 = vpop.eup %2248  ;;  %2262 = vpow.bf16 %v1947_v54  ;;  %v778_v57 = vpop.f32.mrb[20].mxu0  ;;  %v1147_v54 = vld [vmem:[%s2546_s14 + $0x20] sm:$0xff] }
 0x17c   : > { %v2251_v58 = vpop.eup %2250  ;;  %v780_v59 = vpop.f32.mrb[21].mxu0  ;;  %v1084_v60 = vmul.bf16 1065369472, %v2249_v55 }
 0x17d   : > { %v2253_v62 = vpop.eup %2252  ;;  %v782_v63 = vpop.f32.mrb[22].mxu0  ;;  %v1086_v0 = vmul.bf16 1065369472, %v2251_v58 }
 0x17e   : > { %v2255_v1 = vpop.eup %2254  ;;  %v1053_v2 = vadd.bf16 1065369472, %v2253_v62  ;;  %v897_v3 = vpack.c.bf16 %v782_v63, %v778_v57  ;;  %v784_v4 = vpop.f32.mrb[23].mxu0  ;;  %v1193_v9 = vmul.bf16 %v1161_v61, %v1084_v60  ;;  %v1168_v57 = vunpack.c.l.s8.bf16 %v1148_v52 }
 0x17f   : > { %v1054_v5 = vadd.bf16 1065369472, %v2255_v1  ;;  %v898_v6 = vpack.c.bf16 %v784_v4, %v780_v59  ;;  %v1194_v7 = vmul.bf16 %v1162_v56, %v1086_v0  ;;  %v1167_v61 = vunpack.c.l.s8.bf16 %v1147_v54 }
 0x180   : > { %2264 = vrcp.bf16 %v1053_v2  ;;  %v1948_v8 = vmul.bf16 3216621497, %v897_v3 }
 0x181   : > { %2266 = vrcp.bf16 %v1054_v5  ;;  %v1949_v11 = vmul.bf16 3216621497, %v898_v6  ;;  %1311 = vmatprep.mubr.bf16.mxu1 %v1194_v7 }
 0x182   : > { %2268 = vpow.bf16 %v1948_v8  ;;  %1312 = vmatmul.mubr.bf16.gmra.mrb[4].mxu1 %v1193_v9 }
 0x183   : > { %v2257_v13 = vpop.eup %2256  ;;  %2270 = vpow.bf16 %v1949_v11  ;;  %v788_v14 = vpop.f32.mrb[24].mxu0 }
 0x184   : > { %v2259_v16 = vpop.eup %2258  ;;  %v790_v17 = vpop.f32.mrb[25].mxu0  ;;  %v1088_v18 = vmul.bf16 1065369472, %v2257_v13  ;;  %v1170_v13 = vunpack.c.h.s8.bf16 %v1148_v52 }
 0x185   : > { %v2261_v20 = vpop.eup %2260  ;;  %v792_v21 = vpop.f32.mrb[26].mxu0  ;;  %v1090_v22 = vmul.bf16 1065369472, %v2259_v16 }
 0x186   : > { %v2263_v23 = vpop.eup %2262  ;;  %v1055_v24 = vadd.bf16 1065369472, %v2261_v20  ;;  %v899_v25 = vpack.c.bf16 %v792_v21, %v788_v14  ;;  %v794_v26 = vpop.f32.mrb[27].mxu0  ;;  %v1195_v31 = vmul.bf16 %v1163_v19, %v1088_v18 }
 0x187   : > { %v1056_v27 = vadd.bf16 1065369472, %v2263_v23  ;;  %v900_v28 = vpack.c.bf16 %v794_v26, %v790_v17  ;;  %v1196_v29 = vmul.bf16 %v1164_v15, %v1090_v22  ;;  %v1169_v17 = vunpack.c.h.s8.bf16 %v1147_v54 }
 0x188   : > { %2272 = vrcp.bf16 %v1055_v24  ;;  %v1950_v30 = vmul.bf16 3216621497, %v899_v25 }
 0x189   : > { %2274 = vrcp.bf16 %v1056_v27  ;;  %v1951_v32 = vmul.bf16 3216621497, %v900_v28  ;;  %1319 = vmatprep.mubr.bf16.mxu1 %v1196_v29 }
 0x18a   : > { %2276 = vpow.bf16 %v1950_v30  ;;  %1320 = vmatmul.mubr.bf16.gmra.mrb[8].mxu1 %v1195_v31  ;;  %v1150_v30 = vld [vmem:[%s2546_s14 + $0x38] sm:$0xff] }
 0x18b   : > { %v2265_v33 = vpop.eup %2264  ;;  %2278 = vpow.bf16 %v1951_v32  ;;  %v798_v34 = vpop.f32.mrb[28].mxu0  ;;  %v1149_v32 = vld [vmem:[%s2546_s14 + $0x30] sm:$0xff] }
 0x18c   : > { %v2267_v36 = vpop.eup %2266  ;;  %v800_v37 = vpop.f32.mrb[29].mxu0  ;;  %v1092_v38 = vmul.bf16 1065369472, %v2265_v33 }
 0x18d   : > { %v2269_v40 = vpop.eup %2268  ;;  %v802_v41 = vpop.f32.mrb[30].mxu0  ;;  %v1094_v42 = vmul.bf16 1065369472, %v2267_v36 }
 0x18e   : > { %v2271_v43 = vpop.eup %2270  ;;  %v1057_v44 = vadd.bf16 1065369472, %v2269_v40  ;;  %v901_v45 = vpack.c.bf16 %v802_v41, %v798_v34  ;;  %v804_v46 = vpop.f32.mrb[31].mxu0  ;;  %v1197_v51 = vmul.bf16 %v1165_v39, %v1092_v38  ;;  %v1171_v39 = vunpack.c.l.s8.bf16 %v1149_v32 }
 0x18f   : > { %v1058_v47 = vadd.bf16 1065369472, %v2271_v43  ;;  %v902_v48 = vpack.c.bf16 %v804_v46, %v800_v37  ;;  %v1198_v49 = vmul.bf16 %v1166_v35, %v1094_v42  ;;  %v1172_v35 = vunpack.c.l.s8.bf16 %v1150_v30 }
 0x190   : > { %2280 = vrcp.bf16 %v1057_v44  ;;  %v1952_v50 = vmul.bf16 3216621497, %v901_v45 }
 0x191   : > { %2282 = vrcp.bf16 %v1058_v47  ;;  %v1953_v53 = vmul.bf16 3216621497, %v902_v48  ;;  %1327 = vmatprep.mubr.bf16.mxu1 %v1198_v49 }
 0x192   : > { %2284 = vpow.bf16 %v1952_v50  ;;  %1328 = vmatmul.mubr.bf16.gmra.mrb[12].mxu1 %v1197_v51 }
 0x193   : > { %v2273_v55 = vpop.eup %2272  ;;  %2286 = vpow.bf16 %v1953_v53  ;;  %v808_v56 = vpop.f32.mrb[32].mxu0 }
 0x194   : > { %v2275_v58 = vpop.eup %2274  ;;  %v810_v59 = vpop.f32.mrb[33].mxu0  ;;  %v1096_v60 = vmul.bf16 1065369472, %v2273_v55  ;;  %v1174_v55 = vunpack.c.h.s8.bf16 %v1150_v30 }
 0x195   : > { %v2277_v62 = vpop.eup %2276  ;;  %v812_v63 = vpop.f32.mrb[34].mxu0  ;;  %v1098_v0 = vmul.bf16 1065369472, %v2275_v58 }
 0x196   : > { %v2279_v1 = vpop.eup %2278  ;;  %v1059_v2 = vadd.bf16 1065369472, %v2277_v62  ;;  %v903_v3 = vpack.c.bf16 %v812_v63, %v808_v56  ;;  %v814_v4 = vpop.f32.mrb[35].mxu0  ;;  %v1199_v9 = vmul.bf16 %v1167_v61, %v1096_v60 }
 0x197   : > { %v1060_v5 = vadd.bf16 1065369472, %v2279_v1  ;;  %v904_v6 = vpack.c.bf16 %v814_v4, %v810_v59  ;;  %v1200_v7 = vmul.bf16 %v1168_v57, %v1098_v0  ;;  %v1173_v59 = vunpack.c.h.s8.bf16 %v1149_v32 }
 0x198   : > { %2288 = vrcp.bf16 %v1059_v2  ;;  %v1954_v8 = vmul.bf16 3216621497, %v903_v3 }
 0x199   : > { %2290 = vrcp.bf16 %v1060_v5  ;;  %v1955_v10 = vmul.bf16 3216621497, %v904_v6  ;;  %1335 = vmatprep.mubr.bf16.mxu1 %v1200_v7 }
 0x19a   : > { %2292 = vpow.bf16 %v1954_v8  ;;  %1336 = vmatmul.mubr.bf16.gmra.mrb[16].mxu1 %v1199_v9  ;;  %v1152_v8 = vld [vmem:[%s2546_s14 + $0x48] sm:$0xff] }
 0x19b   : > { %v2281_v11 = vpop.eup %2280  ;;  %2294 = vpow.bf16 %v1955_v10  ;;  %v818_v12 = vpop.f32.mrb[36].mxu0  ;;  %v1151_v10 = vld [vmem:[%s2546_s14 + $0x40] sm:$0xff] }
 0x19c   : > { %v2283_v14 = vpop.eup %2282  ;;  %v820_v15 = vpop.f32.mrb[37].mxu0  ;;  %v1100_v16 = vmul.bf16 1065369472, %v2281_v11 }
 0x19d   : > { %v2285_v18 = vpop.eup %2284  ;;  %v822_v19 = vpop.f32.mrb[38].mxu0  ;;  %v1102_v20 = vmul.bf16 1065369472, %v2283_v14 }
 0x19e   : > { %v2287_v21 = vpop.eup %2286  ;;  %v1061_v22 = vadd.bf16 1065369472, %v2285_v18  ;;  %v905_v23 = vpack.c.bf16 %v822_v19, %v818_v12  ;;  %v824_v24 = vpop.f32.mrb[39].mxu0  ;;  %v1201_v29 = vmul.bf16 %v1169_v17, %v1100_v16  ;;  %v1175_v17 = vunpack.c.l.s8.bf16 %v1151_v10 }
 0x19f   : > { %v1062_v25 = vadd.bf16 1065369472, %v2287_v21  ;;  %v906_v26 = vpack.c.bf16 %v824_v24, %v820_v15  ;;  %v1202_v27 = vmul.bf16 %v1170_v13, %v1102_v20  ;;  %v1176_v13 = vunpack.c.l.s8.bf16 %v1152_v8 }
 0x1a0   : > { %2296 = vrcp.bf16 %v1061_v22  ;;  %v1956_v28 = vmul.bf16 3216621497, %v905_v23 }
 0x1a1   : > { %2298 = vrcp.bf16 %v1062_v25  ;;  %v1957_v31 = vmul.bf16 3216621497, %v906_v26  ;;  %1343 = vmatprep.mubr.bf16.mxu1 %v1202_v27 }
 0x1a2   : > { %2300 = vpow.bf16 %v1956_v28  ;;  %1344 = vmatmul.mubr.bf16.gmra.mrb[20].mxu1 %v1201_v29 }
 0x1a3   : > { %v2289_v33 = vpop.eup %2288  ;;  %2302 = vpow.bf16 %v1957_v31  ;;  %v828_v34 = vpop.f32.mrb[40].mxu0 }
 0x1a4   : > { %v2291_v36 = vpop.eup %2290  ;;  %v830_v37 = vpop.f32.mrb[41].mxu0  ;;  %v1104_v38 = vmul.bf16 1065369472, %v2289_v33  ;;  %v1178_v33 = vunpack.c.h.s8.bf16 %v1152_v8 }
 0x1a5   : > { %v2293_v40 = vpop.eup %2292  ;;  %v832_v41 = vpop.f32.mrb[42].mxu0  ;;  %v1106_v42 = vmul.bf16 1065369472, %v2291_v36 }
 0x1a6   : > { %v2295_v43 = vpop.eup %2294  ;;  %v1063_v44 = vadd.bf16 1065369472, %v2293_v40  ;;  %v907_v45 = vpack.c.bf16 %v832_v41, %v828_v34  ;;  %v834_v46 = vpop.f32.mrb[43].mxu0  ;;  %v1203_v51 = vmul.bf16 %v1171_v39, %v1104_v38 }
 0x1a7   : > { %v1064_v47 = vadd.bf16 1065369472, %v2295_v43  ;;  %v908_v48 = vpack.c.bf16 %v834_v46, %v830_v37  ;;  %v1204_v49 = vmul.bf16 %v1172_v35, %v1106_v42  ;;  %v1177_v37 = vunpack.c.h.s8.bf16 %v1151_v10 }
 0x1a8   : > { %2304 = vrcp.bf16 %v1063_v44  ;;  %v1958_v50 = vmul.bf16 3216621497, %v907_v45 }
 0x1a9   : > { %2306 = vrcp.bf16 %v1064_v47  ;;  %v1959_v52 = vmul.bf16 3216621497, %v908_v48  ;;  %1351 = vmatprep.mubr.bf16.mxu1 %v1204_v49 }
 0x1aa   : > { %2308 = vpow.bf16 %v1958_v50  ;;  %1352 = vmatmul.mubr.bf16.gmra.mrb[24].mxu1 %v1203_v51  ;;  %v1154_v50 = vld [vmem:[%s2546_s14 + $0x58] sm:$0xff] }
 0x1ab   : > { %v2297_v53 = vpop.eup %2296  ;;  %2310 = vpow.bf16 %v1959_v52  ;;  %v838_v54 = vpop.f32.mrb[44].mxu0  ;;  %v1153_v52 = vld [vmem:[%s2546_s14 + $0x50] sm:$0xff] }
 0x1ac   : > { %v2299_v56 = vpop.eup %2298  ;;  %v840_v57 = vpop.f32.mrb[45].mxu0  ;;  %v1108_v58 = vmul.bf16 1065369472, %v2297_v53 }
 0x1ad   : > { %v2301_v60 = vpop.eup %2300  ;;  %v842_v61 = vpop.f32.mrb[46].mxu0  ;;  %v1110_v62 = vmul.bf16 1065369472, %v2299_v56 }
 0x1ae   : > { %v2303_v63 = vpop.eup %2302  ;;  %v1065_v0 = vadd.bf16 1065369472, %v2301_v60  ;;  %v909_v1 = vpack.c.bf16 %v842_v61, %v838_v54  ;;  %v844_v2 = vpop.f32.mrb[47].mxu0  ;;  %v1205_v7 = vmul.bf16 %v1173_v59, %v1108_v58  ;;  %v1179_v59 = vunpack.c.l.s8.bf16 %v1153_v52 }
 0x1af   : > { %v1066_v3 = vadd.bf16 1065369472, %v2303_v63  ;;  %v910_v4 = vpack.c.bf16 %v844_v2, %v840_v57  ;;  %v1206_v5 = vmul.bf16 %v1174_v55, %v1110_v62  ;;  %v1180_v55 = vunpack.c.l.s8.bf16 %v1154_v50 }
 0x1b0   : > { %2312 = vrcp.bf16 %v1065_v0  ;;  %v1960_v6 = vmul.bf16 3216621497, %v909_v1 }
 0x1b1   : > { %2314 = vrcp.bf16 %v1066_v3  ;;  %v1961_v9 = vmul.bf16 3216621497, %v910_v4  ;;  %1359 = vmatprep.mubr.bf16.mxu1 %v1206_v5 }
 0x1b2   : > { %2316 = vpow.bf16 %v1960_v6  ;;  %1360 = vmatmul.mubr.bf16.gmra.mrb[28].mxu1 %v1205_v7 }
 0x1b3   : > { %v2305_v11 = vpop.eup %2304  ;;  %2318 = vpow.bf16 %v1961_v9  ;;  %v848_v12 = vpop.f32.mrb[48].mxu0 }
 0x1b4   : > { %v2307_v14 = vpop.eup %2306  ;;  %v850_v15 = vpop.f32.mrb[49].mxu0  ;;  %v1112_v16 = vmul.bf16 1065369472, %v2305_v11  ;;  %v1182_v11 = vunpack.c.h.s8.bf16 %v1154_v50 }
 0x1b5   : > { %v2309_v18 = vpop.eup %2308  ;;  %v852_v19 = vpop.f32.mrb[50].mxu0  ;;  %v1114_v20 = vmul.bf16 1065369472, %v2307_v14 }
 0x1b6   : > { %v2311_v21 = vpop.eup %2310  ;;  %v1067_v22 = vadd.bf16 1065369472, %v2309_v18  ;;  %v911_v23 = vpack.c.bf16 %v852_v19, %v848_v12  ;;  %v854_v24 = vpop.f32.mrb[51].mxu0  ;;  %v1207_v29 = vmul.bf16 %v1175_v17, %v1112_v16 }
 0x1b7   : > { %v1068_v25 = vadd.bf16 1065369472, %v2311_v21  ;;  %v912_v26 = vpack.c.bf16 %v854_v24, %v850_v15  ;;  %v1208_v27 = vmul.bf16 %v1176_v13, %v1114_v20  ;;  %v1181_v15 = vunpack.c.h.s8.bf16 %v1153_v52 }
 0x1b8   : > { %2320 = vrcp.bf16 %v1067_v22  ;;  %v1962_v28 = vmul.bf16 3216621497, %v911_v23 }
 0x1b9   : > { %2322 = vrcp.bf16 %v1068_v25  ;;  %v1963_v30 = vmul.bf16 3216621497, %v912_v26  ;;  %1367 = vmatprep.mubr.bf16.mxu1 %v1208_v27 }
 0x1ba   : > { %2324 = vpow.bf16 %v1962_v28  ;;  %1368 = vmatmul.mubr.bf16.gmra.mrb[32].mxu1 %v1207_v29  ;;  %v1156_v28 = vld [vmem:[%s2546_s14 + $0x68] sm:$0xff] }
 0x1bb   : > { %v2313_v31 = vpop.eup %2312  ;;  %2326 = vpow.bf16 %v1963_v30  ;;  %v858_v32 = vpop.f32.mrb[52].mxu0  ;;  %v1155_v30 = vld [vmem:[%s2546_s14 + $0x60] sm:$0xff] }
 0x1bc   : > { %v2315_v34 = vpop.eup %2314  ;;  %v860_v35 = vpop.f32.mrb[53].mxu0  ;;  %v1116_v36 = vmul.bf16 1065369472, %v2313_v31 }
 0x1bd   : > { %v2317_v38 = vpop.eup %2316  ;;  %v862_v39 = vpop.f32.mrb[54].mxu0  ;;  %v1118_v40 = vmul.bf16 1065369472, %v2315_v34 }
 0x1be   : > { %v2319_v41 = vpop.eup %2318  ;;  %v1069_v42 = vadd.bf16 1065369472, %v2317_v38  ;;  %v913_v43 = vpack.c.bf16 %v862_v39, %v858_v32  ;;  %v864_v44 = vpop.f32.mrb[55].mxu0  ;;  %v1209_v49 = vmul.bf16 %v1177_v37, %v1116_v36  ;;  %v1184_v32 = vunpack.c.l.s8.bf16 %v1156_v28 }
 0x1bf   : > { %v1070_v45 = vadd.bf16 1065369472, %v2319_v41  ;;  %v914_v46 = vpack.c.bf16 %v864_v44, %v860_v35  ;;  %v1210_v47 = vmul.bf16 %v1178_v33, %v1118_v40  ;;  %v1183_v35 = vunpack.c.l.s8.bf16 %v1155_v30 }
 0x1c0   : > { %2328 = vrcp.bf16 %v1069_v42  ;;  %v1964_v48 = vmul.bf16 3216621497, %v913_v43  ;;  %v1186_v44 = vunpack.c.h.s8.bf16 %v1156_v28 }
 0x1c1   : > { %2330 = vrcp.bf16 %v1070_v45  ;;  %v1965_v51 = vmul.bf16 3216621497, %v914_v46  ;;  %1375 = vmatprep.mubr.bf16.mxu1 %v1210_v47  ;;  %v1185_v47 = vunpack.c.h.s8.bf16 %v1155_v30  ;;  %v1227_v30 = vld [vmem:[#allocation2 + $0x20] sm:$0xff] }
 0x1c2   : > { %2332 = vpow.bf16 %v1964_v48  ;;  %1376 = vmatmul.mubr.bf16.gmra.mrb[36].mxu1 %v1209_v49 }
 0x1c3   : > { %v2321_v53 = vpop.eup %2320  ;;  %2334 = vpow.bf16 %v1965_v51  ;;  %v868_v54 = vpop.f32.mrb[56].mxu0 }
 0x1c4   : > { %v2323_v56 = vpop.eup %2322  ;;  %v870_v57 = vpop.f32.mrb[57].mxu0  ;;  %v1120_v58 = vmul.bf16 1065369472, %v2321_v53 }
 0x1c5   : > { %v2325_v60 = vpop.eup %2324  ;;  %v872_v61 = vpop.f32.mrb[58].mxu0  ;;  %v1122_v62 = vmul.bf16 1065369472, %v2323_v56  ;;  %v1157_v56 = vld [vmem:[%s2546_s14 + $0x70] sm:$0xff] }
 0x1c6   : > { %v2327_v63 = vpop.eup %2326  ;;  %v1071_v0 = vadd.bf16 1065369472, %v2325_v60  ;;  %v915_v1 = vpack.c.bf16 %v872_v61, %v868_v54  ;;  %v874_v2 = vpop.f32.mrb[59].mxu0  ;;  %v1211_v7 = vmul.bf16 %v1179_v59, %v1120_v58  ;;  %v1187_v61 = vunpack.c.l.s8.bf16 %v1157_v56 }
 0x1c7   : > { %v1072_v3 = vadd.bf16 1065369472, %v2327_v63  ;;  %v916_v4 = vpack.c.bf16 %v874_v2, %v870_v57  ;;  %v1212_v5 = vmul.bf16 %v1180_v55, %v1122_v62  ;;  %v1158_v55 = vld [vmem:[%s2546_s14 + $0x78] sm:$0xff] }
 0x1c8   : > { %2336 = vrcp.bf16 %v1071_v0  ;;  %v1966_v6 = vmul.bf16 3216621497, %v915_v1  ;;  %v1188_v58 = vunpack.c.l.s8.bf16 %v1158_v55  ;;  %v1190_v2 = vunpack.c.h.s8.bf16 %v1158_v55 }
 0x1c9   : > { %2338 = vrcp.bf16 %v1072_v3  ;;  %v1967_v8 = vmul.bf16 3216621497, %v916_v4  ;;  %1383 = vmatprep.mubr.bf16.mxu1 %v1212_v5  ;;  %v1189_v5 = vunpack.c.h.s8.bf16 %v1157_v56 }
 0x1ca   : > { %2340 = vpow.bf16 %v1966_v6  ;;  %1384 = vmatmul.mubr.bf16.gmra.mrb[40].mxu1 %v1211_v7 }
 0x1cb   : > { %v2329_v9 = vpop.eup %2328  ;;  %2342 = vpow.bf16 %v1967_v8  ;;  %v878_v10 = vpop.f32.mrb[60].mxu0 }
 0x1cc   : > { %v2331_v12 = vpop.eup %2330  ;;  %v880_v13 = vpop.f32.mrb[61].mxu0  ;;  %v1124_v14 = vmul.bf16 1065369472, %v2329_v9 }
 0x1cd   : > { %v2333_v16 = vpop.eup %2332  ;;  %v882_v17 = vpop.f32.mrb[62].mxu0  ;;  %v1126_v18 = vmul.bf16 1065369472, %v2331_v12 }
 0x1ce   : > { %v2335_v19 = vpop.eup %2334  ;;  %v1073_v20 = vadd.bf16 1065369472, %v2333_v16  ;;  %v917_v21 = vpack.c.bf16 %v882_v17, %v878_v10  ;;  %v884_v22 = vpop.f32.mrb[63].mxu0  ;;  %v1213_v27 = vmul.bf16 %v1181_v15, %v1124_v14  ;;  %v1223_v10 = vld [vmem:[#allocation2] sm:$0xff]  ;;  %v1224_v14 = vld [vmem:[#allocation2 + $0x8] sm:$0xff] }
 0x1cf   : > { %v1074_v23 = vadd.bf16 1065369472, %v2335_v19  ;;  %v918_v24 = vpack.c.bf16 %v884_v22, %v880_v13  ;;  %v1214_v25 = vmul.bf16 %v1182_v11, %v1126_v18 }
 0x1d0   : > { %2344 = vrcp.bf16 %v1073_v20  ;;  %v1968_v26 = vmul.bf16 3216621497, %v917_v21  ;;  %v1225_v20 = vld [vmem:[#allocation2 + $0x10] sm:$0xff] }
 0x1d1   : > { %2346 = vrcp.bf16 %v1074_v23  ;;  %v1969_v29 = vmul.bf16 3216621497, %v918_v24  ;;  %1391 = vmatprep.mubr.bf16.mxu1 %v1214_v25  ;;  %v1226_v24 = vld [vmem:[#allocation2 + $0x18] sm:$0xff] }
 0x1d2   : > { %2348 = vpow.bf16 %v1968_v26  ;;  %1392 = vmatmul.mubr.bf16.gmra.mrb[44].mxu1 %v1213_v27 }
 0x1d3   : > { %v2337_v31 = vpop.eup %2336  ;;  %2350 = vpow.bf16 %v1969_v29 }
 0x1d4   : > { %v2339_v33 = vpop.eup %2338  ;;  %v1128_v34 = vmul.bf16 1065369472, %v2337_v31 }
 0x1d5   : > { %v2341_v36 = vpop.eup %2340  ;;  %v1130_v37 = vmul.bf16 1065369472, %v2339_v33 }
 0x1d6   : > { %v2343_v38 = vpop.eup %2342  ;;  %v1075_v39 = vadd.bf16 1065369472, %v2341_v36  ;;  %v1215_v42 = vmul.bf16 %v1183_v35, %v1128_v34  ;;  %v1228_v34 = vld [vmem:[#allocation2 + $0x28] sm:$0xff] }
 0x1d7   : > { %v1076_v40 = vadd.bf16 1065369472, %v2343_v38  ;;  %v1216_v41 = vmul.bf16 %v1184_v32, %v1130_v37 }
 0x1d8   : > { %2352 = vrcp.bf16 %v1075_v39 }
 0x1d9   : > { %2354 = vrcp.bf16 %v1076_v40  ;;  %1399 = vmatprep.mubr.bf16.mxu1 %v1216_v41  ;;  %v1229_v40 = vld [vmem:[#allocation2 + $0x30] sm:$0xff] }
 0x1da   : > { %1400 = vmatmul.mubr.bf16.gmra.mrb[48].mxu1 %v1215_v42 }
 0x1db   : > { %v2345_v43 = vpop.eup %2344 }
 0x1dc   : > { %v2347_v45 = vpop.eup %2346  ;;  %v1132_v46 = vmul.bf16 1065369472, %v2345_v43 }
 0x1dd   : > { %v2349_v48 = vpop.eup %2348  ;;  %v1134_v49 = vmul.bf16 1065369472, %v2347_v45 }
 0x1de   : > { %v2351_v50 = vpop.eup %2350  ;;  %v1077_v51 = vadd.bf16 1065369472, %v2349_v48  ;;  %v1217_v54 = vmul.bf16 %v1185_v47, %v1132_v46 }
 0x1df   : > { %v1078_v52 = vadd.bf16 1065369472, %v2351_v50  ;;  %v1218_v53 = vmul.bf16 %v1186_v44, %v1134_v49  ;;  %v1230_v44 = vld [vmem:[#allocation2 + $0x38] sm:$0xff]  ;;  %v1231_v50 = vld [vmem:[#allocation2 + $0x40] sm:$0xff] }
 0x1e0   : > { %2356 = vrcp.bf16 %v1077_v51 }
 0x1e1   : > { %2358 = vrcp.bf16 %v1078_v52  ;;  %1407 = vmatprep.mubr.bf16.mxu1 %v1218_v53 }
 0x1e2   : > { %1408 = vmatmul.mubr.bf16.gmra.mrb[52].mxu1 %v1217_v54  ;;  %v1232_v54 = vld [vmem:[#allocation2 + $0x48] sm:$0xff] }
 0x1e3   : > { %v2353_v57 = vpop.eup %2352 }
 0x1e4   : > { %v2355_v59 = vpop.eup %2354  ;;  %v1136_v60 = vmul.bf16 1065369472, %v2353_v57 }
 0x1e5   : > { %v1138_v62 = vmul.bf16 1065369472, %v2355_v59 }
 0x1e6   : > { %v1219_v0 = vmul.bf16 %v1187_v61, %v1136_v60  ;;  %v1233_v60 = vld [vmem:[#allocation2 + $0x50] sm:$0xff] }
 0x1e7   : > { %v1220_v63 = vmul.bf16 %v1188_v58, %v1138_v62 }
 0x1e9   : > { %1415 = vmatprep.mubr.bf16.mxu1 %v1220_v63 }
 0x1ea   : > { %1416 = vmatmul.mubr.bf16.gmra.mrb[56].mxu1 %v1219_v0  ;;  %v1234_v0 = vld [vmem:[#allocation2 + $0x58] sm:$0xff] }
 0x1eb   : > { %v2357_v1 = vpop.eup %2356 }
 0x1ec   : > { %v2359_v3 = vpop.eup %2358  ;;  %v1140_v4 = vmul.bf16 1065369472, %v2357_v1 }
 0x1ed   : > { %v1142_v6 = vmul.bf16 1065369472, %v2359_v3 }
 0x1ee   : > { %v1221_v8 = vmul.bf16 %v1189_v5, %v1140_v4 }
 0x1ef   : > { %v1222_v7 = vmul.bf16 %v1190_v2, %v1142_v6  ;;  %v1235_v6 = vld [vmem:[#allocation2 + $0x60] sm:$0xff] }
 0x1f1   : > { %1423 = vmatprep.mubr.bf16.mxu1 %v1222_v7 }
 0x1f2   : > { %1424 = vmatmul.mubr.bf16.gmra.mrb[60].mxu1 %v1221_v8 }
 0x24d   : > { %v2038_v9 = vpop.f32.mrb[0].mxu1 }
 0x24e   : > { %v2039_v11 = vpop.f32.mrb[1].mxu1 }
 0x24f   : > { %v2040_v12 = vadd.f32 %v2039_v11, %v2038_v9  ;;  %v2041_v13 = vpop.f32.mrb[2].mxu1 }
 0x250   : > { %v2042_v15 = vpop.f32.mrb[3].mxu1 }
 0x251   : > { %v1432_v16 = vadd.f32 %v2040_v12, %v1223_v10  ;;  %v2043_v17 = vadd.f32 %v2042_v15, %v2041_v13  ;;  %v1236_v10 = vld [vmem:[#allocation2 + $0x68] sm:$0xff] }
 0x253   : > { %1464 = vst.msk [vmem:[#allocation2] sm:$0xff] %vm597_vm1, %v1432_v16  ;;  %v1433_v18 = vadd.f32 %v2043_v17, %v1224_v14  ;;  %v1237_v16 = vld [vmem:[#allocation2 + $0x70] sm:$0xff] }
 0x255   : > { %1465 = vst.msk [vmem:[#allocation2 + $0x8] sm:$0xff] %vm597_vm1, %v1433_v18  ;;  %v2044_v19 = vpop.f32.mrb[4].mxu1 }
 0x256   : > { %v2045_v21 = vpop.f32.mrb[5].mxu1 }
 0x257   : > { %v2046_v22 = vadd.f32 %v2045_v21, %v2044_v19  ;;  %v2047_v23 = vpop.f32.mrb[6].mxu1 }
 0x258   : > { %v2048_v25 = vpop.f32.mrb[7].mxu1 }
 0x259   : > { %v1434_v26 = vadd.f32 %v2046_v22, %v1225_v20  ;;  %v2049_v27 = vadd.f32 %v2048_v25, %v2047_v23  ;;  %v1238_v20 = vld [vmem:[#allocation2 + $0x78] sm:$0xff] }
 0x25b   : > { %1466 = vst.msk [vmem:[#allocation2 + $0x10] sm:$0xff] %vm597_vm1, %v1434_v26  ;;  %v1435_v28 = vadd.f32 %v2049_v27, %v1226_v24  ;;  %v1239_v26 = vld [vmem:[#allocation2 + $0x80] sm:$0xff] }
 0x25d   : > { %1467 = vst.msk [vmem:[#allocation2 + $0x18] sm:$0xff] %vm597_vm1, %v1435_v28  ;;  %v2050_v29 = vpop.f32.mrb[8].mxu1 }
 0x25e   : > { %v2051_v31 = vpop.f32.mrb[9].mxu1 }
 0x25f   : > { %v2052_v32 = vadd.f32 %v2051_v31, %v2050_v29  ;;  %v2053_v33 = vpop.f32.mrb[10].mxu1 }
 0x260   : > { %v2054_v35 = vpop.f32.mrb[11].mxu1 }
 0x261   : > { %v1436_v36 = vadd.f32 %v2052_v32, %v1227_v30  ;;  %v2055_v37 = vadd.f32 %v2054_v35, %v2053_v33  ;;  %v1240_v30 = vld [vmem:[#allocation2 + $0x88] sm:$0xff] }
 0x263   : > { %1468 = vst.msk [vmem:[#allocation2 + $0x20] sm:$0xff] %vm597_vm1, %v1436_v36  ;;  %v1437_v38 = vadd.f32 %v2055_v37, %v1228_v34  ;;  %v1241_v36 = vld [vmem:[#allocation2 + $0x90] sm:$0xff] }
 0x265   : > { %1469 = vst.msk [vmem:[#allocation2 + $0x28] sm:$0xff] %vm597_vm1, %v1437_v38  ;;  %v2056_v39 = vpop.f32.mrb[12].mxu1 }
 0x266   : > { %v2057_v41 = vpop.f32.mrb[13].mxu1 }
 0x267   : > { %v2058_v42 = vadd.f32 %v2057_v41, %v2056_v39  ;;  %v2059_v43 = vpop.f32.mrb[14].mxu1 }
 0x268   : > { %v2060_v45 = vpop.f32.mrb[15].mxu1 }
 0x269   : > { %v1438_v46 = vadd.f32 %v2058_v42, %v1229_v40  ;;  %v2061_v47 = vadd.f32 %v2060_v45, %v2059_v43  ;;  %v1242_v40 = vld [vmem:[#allocation2 + $0x98] sm:$0xff] }
 0x26b   : > { %1470 = vst.msk [vmem:[#allocation2 + $0x30] sm:$0xff] %vm597_vm1, %v1438_v46  ;;  %v1439_v48 = vadd.f32 %v2061_v47, %v1230_v44  ;;  %v1243_v46 = vld [vmem:[#allocation2 + $0xa0] sm:$0xff] }
 0x26d   : > { %1471 = vst.msk [vmem:[#allocation2 + $0x38] sm:$0xff] %vm597_vm1, %v1439_v48  ;;  %v2062_v49 = vpop.f32.mrb[16].mxu1 }
 0x26e   : > { %v2063_v51 = vpop.f32.mrb[17].mxu1 }
 0x26f   : > { %v2064_v52 = vadd.f32 %v2063_v51, %v2062_v49  ;;  %v2065_v53 = vpop.f32.mrb[18].mxu1 }
 0x270   : > { %v2066_v55 = vpop.f32.mrb[19].mxu1 }
 0x271   : > { %v1440_v56 = vadd.f32 %v2064_v52, %v1231_v50  ;;  %v2067_v57 = vadd.f32 %v2066_v55, %v2065_v53  ;;  %v1244_v50 = vld [vmem:[#allocation2 + $0xa8] sm:$0xff] }
 0x273   : > { %1472 = vst.msk [vmem:[#allocation2 + $0x40] sm:$0xff] %vm597_vm1, %v1440_v56  ;;  %v1441_v58 = vadd.f32 %v2067_v57, %v1232_v54  ;;  %v1245_v56 = vld [vmem:[#allocation2 + $0xb0] sm:$0xff] }
 0x275   : > { %1473 = vst.msk [vmem:[#allocation2 + $0x48] sm:$0xff] %vm597_vm1, %v1441_v58  ;;  %v2068_v59 = vpop.f32.mrb[20].mxu1 }
 0x276   : > { %v2069_v61 = vpop.f32.mrb[21].mxu1 }
 0x277   : > { %v2070_v62 = vadd.f32 %v2069_v61, %v2068_v59  ;;  %v2071_v63 = vpop.f32.mrb[22].mxu1 }
 0x278   : > { %v2072_v1 = vpop.f32.mrb[23].mxu1 }
 0x279   : > { %v1442_v2 = vadd.f32 %v2070_v62, %v1233_v60  ;;  %v2073_v3 = vadd.f32 %v2072_v1, %v2071_v63  ;;  %v1246_v60 = vld [vmem:[#allocation2 + $0xb8] sm:$0xff] }
 0x27b   : > { %1474 = vst.msk [vmem:[#allocation2 + $0x50] sm:$0xff] %vm597_vm1, %v1442_v2  ;;  %v1443_v4 = vadd.f32 %v2073_v3, %v1234_v0  ;;  %v1247_v2 = vld [vmem:[#allocation2 + $0xc0] sm:$0xff] }
 0x27d   : > { %1475 = vst.msk [vmem:[#allocation2 + $0x58] sm:$0xff] %vm597_vm1, %v1443_v4  ;;  %v2074_v5 = vpop.f32.mrb[24].mxu1 }
 0x27e   : > { %v2075_v7 = vpop.f32.mrb[25].mxu1 }
 0x27f   : > { %v2076_v8 = vadd.f32 %v2075_v7, %v2074_v5  ;;  %v2077_v9 = vpop.f32.mrb[26].mxu1 }
 0x280   : > { %v2078_v11 = vpop.f32.mrb[27].mxu1 }
 0x281   : > { %v1444_v12 = vadd.f32 %v2076_v8, %v1235_v6  ;;  %v2079_v13 = vadd.f32 %v2078_v11, %v2077_v9  ;;  %v1248_v6 = vld [vmem:[#allocation2 + $0xc8] sm:$0xff] }
 0x283   : > { %1476 = vst.msk [vmem:[#allocation2 + $0x60] sm:$0xff] %vm597_vm1, %v1444_v12  ;;  %v1445_v14 = vadd.f32 %v2079_v13, %v1236_v10  ;;  %v1249_v12 = vld [vmem:[#allocation2 + $0xd0] sm:$0xff] }
 0x285   : > { %1477 = vst.msk [vmem:[#allocation2 + $0x68] sm:$0xff] %vm597_vm1, %v1445_v14  ;;  %v2080_v15 = vpop.f32.mrb[28].mxu1 }
 0x286   : > { %v2081_v17 = vpop.f32.mrb[29].mxu1 }
 0x287   : > { %v2082_v18 = vadd.f32 %v2081_v17, %v2080_v15  ;;  %v2083_v19 = vpop.f32.mrb[30].mxu1 }
 0x288   : > { %v2084_v21 = vpop.f32.mrb[31].mxu1 }
 0x289   : > { %v1446_v22 = vadd.f32 %v2082_v18, %v1237_v16  ;;  %v2085_v23 = vadd.f32 %v2084_v21, %v2083_v19  ;;  %v1250_v16 = vld [vmem:[#allocation2 + $0xd8] sm:$0xff] }
 0x28b   : > { %1478 = vst.msk [vmem:[#allocation2 + $0x70] sm:$0xff] %vm597_vm1, %v1446_v22  ;;  %v1447_v24 = vadd.f32 %v2085_v23, %v1238_v20  ;;  %v1251_v22 = vld [vmem:[#allocation2 + $0xe0] sm:$0xff] }
 0x28d   : > { %1479 = vst.msk [vmem:[#allocation2 + $0x78] sm:$0xff] %vm597_vm1, %v1447_v24  ;;  %v2086_v25 = vpop.f32.mrb[32].mxu1 }
 0x28e   : > { %v2087_v27 = vpop.f32.mrb[33].mxu1 }
 0x28f   : > { %v2088_v28 = vadd.f32 %v2087_v27, %v2086_v25  ;;  %v2089_v29 = vpop.f32.mrb[34].mxu1 }
 0x290   : > { %v2090_v31 = vpop.f32.mrb[35].mxu1 }
 0x291   : > { %v1448_v32 = vadd.f32 %v2088_v28, %v1239_v26  ;;  %v2091_v33 = vadd.f32 %v2090_v31, %v2089_v29  ;;  %v1252_v26 = vld [vmem:[#allocation2 + $0xe8] sm:$0xff] }
 0x293   : > { %1480 = vst.msk [vmem:[#allocation2 + $0x80] sm:$0xff] %vm597_vm1, %v1448_v32  ;;  %v1449_v34 = vadd.f32 %v2091_v33, %v1240_v30  ;;  %v1253_v32 = vld [vmem:[#allocation2 + $0xf0] sm:$0xff] }
 0x295   : > { %1481 = vst.msk [vmem:[#allocation2 + $0x88] sm:$0xff] %vm597_vm1, %v1449_v34  ;;  %v2092_v35 = vpop.f32.mrb[36].mxu1 }
 0x296   : > { %v2093_v37 = vpop.f32.mrb[37].mxu1 }
 0x297   : > { %v2094_v38 = vadd.f32 %v2093_v37, %v2092_v35  ;;  %v2095_v39 = vpop.f32.mrb[38].mxu1 }
 0x298   : > { %v2096_v41 = vpop.f32.mrb[39].mxu1 }
 0x299   : > { %v1450_v42 = vadd.f32 %v2094_v38, %v1241_v36  ;;  %v2097_v43 = vadd.f32 %v2096_v41, %v2095_v39  ;;  %v1254_v36 = vld [vmem:[#allocation2 + $0xf8] sm:$0xff]  ;;  %v1566_v41 = vld [vmem:[#allocation2 + $0x10] sm:$0xff] (!%p1970_p13) }
 0x29a   : > { %1632 = vrot.lane.b32.xlu1 (!%p1970_p13), %v1566_v41, %s2417_s24 }
 0x29b   : > { %1482 = vst.msk [vmem:[#allocation2 + $0x90] sm:$0xff] %vm597_vm1, %v1450_v42  ;;  %v1451_v44 = vadd.f32 %v2097_v43, %v1242_v40  ;;  %v1564_v42 = vld [vmem:[#allocation2] sm:$0xff] (!%p1970_p13)  ;;  %v1567_v43 = vld [vmem:[#allocation2 + $0x18] sm:$0xff] (!%p1970_p13) }
 0x29c   : > { %1628 = vrot.lane.b32.xlu0 (!%p1970_p13), %v1564_v42, %s2417_s24 }
 0x29d   : > { %1483 = vst.msk [vmem:[#allocation2 + $0x98] sm:$0xff] %vm597_vm1, %v1451_v44  ;;  %v2098_v45 = vpop.f32.mrb[40].mxu1  ;;  %v1565_v44 = vld [vmem:[#allocation2 + $0x8] sm:$0xff] (!%p1970_p13) }
 0x29e   : > { %v2099_v47 = vpop.f32.mrb[41].mxu1  ;;  %1634 = vrot.lane.b32.xlu1 (!%p1970_p13), %v1567_v43, %s2417_s24 }
 0x29f   : > { %v2100_v48 = vadd.f32 %v2099_v47, %v2098_v45  ;;  %v2101_v49 = vpop.f32.mrb[42].mxu1  ;;  %v1569_v45 = vld [vmem:[#allocation2 + $0x28] sm:$0xff] (!%p1970_p13)  ;;  %v1571_v47 = vld [vmem:[#allocation2 + $0x38] sm:$0xff] (!%p1970_p13) }
 0x2a0   : > { %v2102_v51 = vpop.f32.mrb[43].mxu1  ;;  %1630 = vrot.lane.b32.xlu0 (!%p1970_p13), %v1565_v44, %s2417_s24 }
 0x2a1   : > { %v1452_v52 = vadd.f32 %v2100_v48, %v1243_v46  ;;  %v2103_v53 = vadd.f32 %v2102_v51, %v2101_v49  ;;  %v1568_v46 = vld [vmem:[#allocation2 + $0x20] sm:$0xff] (!%p1970_p13)  ;;  %v1570_v48 = vld [vmem:[#allocation2 + $0x30] sm:$0xff] (!%p1970_p13)  ;;  %v1503_v51 = vld [vmem:[%s2529_s5 + $0x18] sm:$0xff] (!%p1970_p13) }
 0x2a2   : > { %1638 = vrot.lane.b32.xlu1 (!%p1970_p13), %v1569_v45, %s2417_s24  ;;  %v1502_v49 = vld [vmem:[%s2529_s5 + $0x10] sm:$0xff] (!%p1970_p13)  ;;  %1535 = vst.msk [vmem:[%s2539_s9 + $0x18] sm:$0xff] (!%p1970_p13), %vm597_vm1, %v1503_v51 }
 0x2a3   : > { %1484 = vst.msk [vmem:[#allocation2 + $0xa0] sm:$0xff] %vm597_vm1, %v1452_v52  ;;  %v1453_v54 = vadd.f32 %v2103_v53, %v1244_v50  ;;  %1534 = vst.msk [vmem:[%s2539_s9 + $0x10] sm:$0xff] (!%p1970_p13), %vm597_vm1, %v1502_v49  ;;  %v1500_v50 = vld [vmem:[%s2529_s5] sm:$0xff] (!%p1970_p13)  ;;  %v1501_v52 = vld [vmem:[%s2529_s5 + $0x8] sm:$0xff] (!%p1970_p13) }
 0x2a4   : > { %1636 = vrot.lane.b32.xlu0 (!%p1970_p13), %v1568_v46, %s2417_s24  ;;  %v1573_v53 = vld [vmem:[#allocation2 + $0x48] sm:$0xff] (!%p1970_p13)  ;;  %1532 = vst.msk [vmem:[%s2539_s9] sm:$0xff] (!%p1970_p13), %vm597_vm1, %v1500_v50  ;;  %1533 = vst.msk [vmem:[%s2539_s9 + $0x8] sm:$0xff] (!%p1970_p13), %vm597_vm1, %v1501_v52 }
 0x2a5   : > { %1485 = vst.msk [vmem:[#allocation2 + $0xa8] sm:$0xff] %vm597_vm1, %v1453_v54  ;;  %v2104_v55 = vpop.f32.mrb[44].mxu1  ;;  %v1505_v54 = vld [vmem:[%s2529_s5 + $0x28] sm:$0xff] (!%p1970_p13) }
 0x2a6   : > { %v2105_v57 = vpop.f32.mrb[45].mxu1  ;;  %1642 = vrot.lane.b32.xlu1 (!%p1970_p13), %v1571_v47, %s2417_s24  ;;  %1537 = vst.msk [vmem:[%s2539_s9 + $0x28] sm:$0xff] (!%p1970_p13), %vm597_vm1, %v1505_v54 }
 0x2a7   : > { %v2106_v58 = vadd.f32 %v2105_v57, %v2104_v55  ;;  %v2107_v59 = vpop.f32.mrb[46].mxu1  ;;  %v1504_v55 = vld [vmem:[%s2529_s5 + $0x20] sm:$0xff] (!%p1970_p13) }
 0x2a8   : > { %v2108_v61 = vpop.f32.mrb[47].mxu1  ;;  %1640 = vrot.lane.b32.xlu0 (!%p1970_p13), %v1570_v48, %s2417_s24  ;;  %v1572_v57 = vld [vmem:[#allocation2 + $0x40] sm:$0xff] (!%p1970_p13)  ;;  %1536 = vst.msk [vmem:[%s2539_s9 + $0x20] sm:$0xff] (!%p1970_p13), %vm597_vm1, %v1504_v55 }
 0x2a9   : > { %v1454_v62 = vadd.f32 %v2106_v58, %v1245_v56  ;;  %v2109_v63 = vadd.f32 %v2108_v61, %v2107_v59  ;;  %v1507_v56 = vld [vmem:[%s2529_s5 + $0x38] sm:$0xff] (!%p1970_p13)  ;;  %v1506_v58 = vld [vmem:[%s2529_s5 + $0x30] sm:$0xff] (!%p1970_p13)  ;;  %v1509_v59 = vld [vmem:[%s2529_s5 + $0x48] sm:$0xff] (!%p1970_p13) }
 0x2aa   : > { %1539 = vst.msk [vmem:[%s2539_s9 + $0x38] sm:$0xff] (!%p1970_p13), %vm597_vm1, %v1507_v56  ;;  %1538 = vst.msk [vmem:[%s2539_s9 + $0x30] sm:$0xff] (!%p1970_p13), %vm597_vm1, %v1506_v58  ;;  %v1511_v61 = vld [vmem:[%s2529_s5 + $0x58] sm:$0xff] (!%p1970_p13)  ;;  %1646 = vrot.lane.b32.xlu1 (!%p1970_p13), %v1573_v53, %s2417_s24 }
 0x2ab   : > { %1486 = vst.msk [vmem:[#allocation2 + $0xb0] sm:$0xff] %vm597_vm1, %v1454_v62  ;;  %v1455_v0 = vadd.f32 %v2109_v63, %v1246_v60  ;;  %1541 = vst.msk [vmem:[%s2539_s9 + $0x48] sm:$0xff] (!%p1970_p13), %vm597_vm1, %v1509_v59  ;;  %v1508_v60 = vld [vmem:[%s2529_s5 + $0x40] sm:$0xff] (!%p1970_p13)  ;;  %v1510_v62 = vld [vmem:[%s2529_s5 + $0x50] sm:$0xff] (!%p1970_p13) }
 0x2ac   : > { %1540 = vst.msk [vmem:[%s2539_s9 + $0x40] sm:$0xff] (!%p1970_p13), %vm597_vm1, %v1508_v60  ;;  %1543 = vst.msk [vmem:[%s2539_s9 + $0x58] sm:$0xff] (!%p1970_p13), %vm597_vm1, %v1511_v61  ;;  %v1513_v63 = vld [vmem:[%s2529_s5 + $0x68] sm:$0xff] (!%p1970_p13)  ;;  %1644 = vrot.lane.b32.xlu0 (!%p1970_p13), %v1572_v57, %s2417_s24 }
 0x2ad   : > { %1487 = vst.msk [vmem:[#allocation2 + $0xb8] sm:$0xff] %vm597_vm1, %v1455_v0  ;;  %v2110_v1 = vpop.f32.mrb[48].mxu1  ;;  %1542 = vst.msk [vmem:[%s2539_s9 + $0x50] sm:$0xff] (!%p1970_p13), %vm597_vm1, %v1510_v62  ;;  %v1512_v0 = vld [vmem:[%s2529_s5 + $0x60] sm:$0xff] (!%p1970_p13) }
 0x2ae   : > { %v2111_v3 = vpop.f32.mrb[49].mxu1  ;;  %1545 = vst.msk [vmem:[%s2539_s9 + $0x68] sm:$0xff] (!%p1970_p13), %vm597_vm1, %v1513_v63  ;;  %1544 = vst.msk [vmem:[%s2539_s9 + $0x60] sm:$0xff] (!%p1970_p13), %vm597_vm1, %v1512_v0 }
 0x2af   : > { %v2112_v4 = vadd.f32 %v2111_v3, %v2110_v1  ;;  %v2113_v5 = vpop.f32.mrb[50].mxu1  ;;  %v1515_v1 = vld [vmem:[%s2529_s5 + $0x78] sm:$0xff] (!%p1970_p13) }
 0x2b0   : > { %v2114_v7 = vpop.f32.mrb[51].mxu1  ;;  %1547 = vst.msk [vmem:[%s2539_s9 + $0x78] sm:$0xff] (!%p1970_p13), %vm597_vm1, %v1515_v1  ;;  %v1575_v3 = vld [vmem:[#allocation2 + $0x58] sm:$0xff] (!%p1970_p13) }
 0x2b1   : > { %v1456_v8 = vadd.f32 %v2112_v4, %v1247_v2  ;;  %v2115_v9 = vadd.f32 %v2114_v7, %v2113_v5  ;;  %v1514_v2 = vld [vmem:[%s2529_s5 + $0x70] sm:$0xff] (!%p1970_p13)  ;;  %v1517_v5 = vld [vmem:[%s2529_s5 + $0x88] sm:$0xff] (!%p1970_p13)  ;;  %1650 = vrot.lane.b32.xlu1 (!%p1970_p13), %v1575_v3, %s2417_s24 }
 0x2b2   : > { %1546 = vst.msk [vmem:[%s2539_s9 + $0x70] sm:$0xff] (!%p1970_p13), %vm597_vm1, %v1514_v2  ;;  %v1574_v4 = vld [vmem:[#allocation2 + $0x50] sm:$0xff] (!%p1970_p13)  ;;  %1549 = vst.msk [vmem:[%s2539_s9 + $0x88] sm:$0xff] (!%p1970_p13), %vm597_vm1, %v1517_v5  ;;  %v1577_v7 = vld [vmem:[#allocation2 + $0x68] sm:$0xff] (!%p1970_p13) }
 0x2b3   : > { %1488 = vst.msk [vmem:[#allocation2 + $0xc0] sm:$0xff] %vm597_vm1, %v1456_v8  ;;  %v1457_v10 = vadd.f32 %v2115_v9, %v1248_v6  ;;  %v1516_v6 = vld [vmem:[%s2529_s5 + $0x80] sm:$0xff] (!%p1970_p13)  ;;  %1648 = vrot.lane.b32.xlu0 (!%p1970_p13), %v1574_v4, %s2417_s24  ;;  %v1519_v9 = vld [vmem:[%s2529_s5 + $0x98] sm:$0xff] (!%p1970_p13) }
 0x2b4   : > { %1548 = vst.msk [vmem:[%s2539_s9 + $0x80] sm:$0xff] (!%p1970_p13), %vm597_vm1, %v1516_v6  ;;  %v1576_v8 = vld [vmem:[#allocation2 + $0x60] sm:$0xff] (!%p1970_p13)  ;;  %1551 = vst.msk [vmem:[%s2539_s9 + $0x98] sm:$0xff] (!%p1970_p13), %vm597_vm1, %v1519_v9 }
 0x2b5   : > { %1489 = vst.msk [vmem:[#allocation2 + $0xc8] sm:$0xff] %vm597_vm1, %v1457_v10  ;;  %v2116_v11 = vpop.f32.mrb[52].mxu1  ;;  %v1518_v10 = vld [vmem:[%s2529_s5 + $0x90] sm:$0xff] (!%p1970_p13)  ;;  %1654 = vrot.lane.b32.xlu1 (!%p1970_p13), %v1577_v7, %s2417_s24 }
 0x2b6   : > { %v2117_v13 = vpop.f32.mrb[53].mxu1  ;;  %1550 = vst.msk [vmem:[%s2539_s9 + $0x90] sm:$0xff] (!%p1970_p13), %vm597_vm1, %v1518_v10 }
 0x2b7   : > { %v2118_v14 = vadd.f32 %v2117_v13, %v2116_v11  ;;  %v2119_v15 = vpop.f32.mrb[54].mxu1  ;;  %1652 = vrot.lane.b32.xlu0 (!%p1970_p13), %v1576_v8, %s2417_s24  ;;  %v1579_v11 = vld [vmem:[#allocation2 + $0x78] sm:$0xff] (!%p1970_p13)  ;;  %v1521_v13 = vld [vmem:[%s2529_s5 + $0xa8] sm:$0xff] (!%p1970_p13) }
 0x2b8   : > { %v2120_v17 = vpop.f32.mrb[55].mxu1  ;;  %1553 = vst.msk [vmem:[%s2539_s9 + $0xa8] sm:$0xff] (!%p1970_p13), %vm597_vm1, %v1521_v13 }
 0x2b9   : > { %v1458_v18 = vadd.f32 %v2118_v14, %v1249_v12  ;;  %v2121_v19 = vadd.f32 %v2120_v17, %v2119_v15  ;;  %v1578_v12 = vld [vmem:[#allocation2 + $0x70] sm:$0xff] (!%p1970_p13)  ;;  %v1520_v14 = vld [vmem:[%s2529_s5 + $0xa0] sm:$0xff] (!%p1970_p13)  ;;  %1658 = vrot.lane.b32.xlu1 (!%p1970_p13), %v1579_v11, %s2417_s24  ;;  %v1581_v15 = vld [vmem:[#allocation2 + $0x88] sm:$0xff] (!%p1970_p13) }
 0x2ba   : > { %1552 = vst.msk [vmem:[%s2539_s9 + $0xa0] sm:$0xff] (!%p1970_p13), %vm597_vm1, %v1520_v14  ;;  %v1523_v17 = vld [vmem:[%s2529_s5 + $0xb8] sm:$0xff] (!%p1970_p13) }
 0x2bb   : > { %1490 = vst.msk [vmem:[#allocation2 + $0xd0] sm:$0xff] %vm597_vm1, %v1458_v18  ;;  %v1459_v20 = vadd.f32 %v2121_v19, %v1250_v16  ;;  %1656 = vrot.lane.b32.xlu0 (!%p1970_p13), %v1578_v12, %s2417_s24  ;;  %v1580_v16 = vld [vmem:[#allocation2 + $0x80] sm:$0xff] (!%p1970_p13)  ;;  %v1522_v18 = vld [vmem:[%s2529_s5 + $0xb0] sm:$0xff] (!%p1970_p13)  ;;  %1555 = vst.msk [vmem:[%s2539_s9 + $0xb8] sm:$0xff] (!%p1970_p13), %vm597_vm1, %v1523_v17 }
 0x2bc   : > { %1554 = vst.msk [vmem:[%s2539_s9 + $0xb0] sm:$0xff] (!%p1970_p13), %vm597_vm1, %v1522_v18  ;;  %v1583_v19 = vld [vmem:[#allocation2 + $0x98] sm:$0xff] (!%p1970_p13) }
 0x2bd   : > { %1491 = vst.msk [vmem:[#allocation2 + $0xd8] sm:$0xff] %vm597_vm1, %v1459_v20  ;;  %v2122_v21 = vpop.f32.mrb[56].mxu1  ;;  %1662 = vrot.lane.b32.xlu1 (!%p1970_p13), %v1581_v15, %s2417_s24  ;;  %v1582_v20 = vld [vmem:[#allocation2 + $0x90] sm:$0xff] (!%p1970_p13) }
 0x2be   : > { %v2123_v23 = vpop.f32.mrb[57].mxu1 }
 0x2bf   : > { %v2124_v24 = vadd.f32 %v2123_v23, %v2122_v21  ;;  %v2125_v25 = vpop.f32.mrb[58].mxu1  ;;  %1660 = vrot.lane.b32.xlu0 (!%p1970_p13), %v1580_v16, %s2417_s24  ;;  %v1525_v21 = vld [vmem:[%s2529_s5 + $0xc8] sm:$0xff] (!%p1970_p13) }
 0x2c0   : > { %v2126_v27 = vpop.f32.mrb[59].mxu1  ;;  %1557 = vst.msk [vmem:[%s2539_s9 + $0xc8] sm:$0xff] (!%p1970_p13), %vm597_vm1, %v1525_v21  ;;  %v1585_v23 = vld [vmem:[#allocation2 + $0xa8] sm:$0xff] (!%p1970_p13) }
 0x2c1   : > { %v1460_v28 = vadd.f32 %v2124_v24, %v1251_v22  ;;  %v2127_v29 = vadd.f32 %v2126_v27, %v2125_v25  ;;  %v1524_v22 = vld [vmem:[%s2529_s5 + $0xc0] sm:$0xff] (!%p1970_p13)  ;;  %1666 = vrot.lane.b32.xlu1 (!%p1970_p13), %v1583_v19, %s2417_s24  ;;  %v1527_v25 = vld [vmem:[%s2529_s5 + $0xd8] sm:$0xff] (!%p1970_p13) }
 0x2c2   : > { %1556 = vst.msk [vmem:[%s2539_s9 + $0xc0] sm:$0xff] (!%p1970_p13), %vm597_vm1, %v1524_v22  ;;  %v1584_v24 = vld [vmem:[#allocation2 + $0xa0] sm:$0xff] (!%p1970_p13)  ;;  %1559 = vst.msk [vmem:[%s2539_s9 + $0xd8] sm:$0xff] (!%p1970_p13), %vm597_vm1, %v1527_v25  ;;  %v1587_v27 = vld [vmem:[#allocation2 + $0xb8] sm:$0xff] (!%p1970_p13) }
 0x2c3   : > { %1492 = vst.msk [vmem:[#allocation2 + $0xe0] sm:$0xff] %vm597_vm1, %v1460_v28  ;;  %v1461_v30 = vadd.f32 %v2127_v29, %v1252_v26  ;;  %1664 = vrot.lane.b32.xlu0 (!%p1970_p13), %v1582_v20, %s2417_s24  ;;  %v1526_v26 = vld [vmem:[%s2529_s5 + $0xd0] sm:$0xff] (!%p1970_p13)  ;;  %v1529_v29 = vld [vmem:[%s2529_s5 + $0xe8] sm:$0xff] (!%p1970_p13) }
 0x2c4   : > { %1558 = vst.msk [vmem:[%s2539_s9 + $0xd0] sm:$0xff] (!%p1970_p13), %vm597_vm1, %v1526_v26  ;;  %v1586_v28 = vld [vmem:[#allocation2 + $0xb0] sm:$0xff] (!%p1970_p13)  ;;  %1561 = vst.msk [vmem:[%s2539_s9 + $0xe8] sm:$0xff] (!%p1970_p13), %vm597_vm1, %v1529_v29 }
 0x2c5   : > { %1493 = vst.msk [vmem:[#allocation2 + $0xe8] sm:$0xff] %vm597_vm1, %v1461_v30  ;;  %v2128_v31 = vpop.f32.mrb[60].mxu1  ;;  %1670 = vrot.lane.b32.xlu1 (!%p1970_p13), %v1585_v23, %s2417_s24  ;;  %v1528_v30 = vld [vmem:[%s2529_s5 + $0xe0] sm:$0xff] (!%p1970_p13) }
 0x2c6   : > { %v2129_v33 = vpop.f32.mrb[61].mxu1  ;;  %1560 = vst.msk [vmem:[%s2539_s9 + $0xe0] sm:$0xff] (!%p1970_p13), %vm597_vm1, %v1528_v30 }
 0x2c7   : > { %v2130_v34 = vadd.f32 %v2129_v33, %v2128_v31  ;;  %v2131_v35 = vpop.f32.mrb[62].mxu1  ;;  %1499 = sbr.rel (%p1970_p13) target bundleno = 847 (0x34f), region = 67  ;;  %1668 = vrot.lane.b32.xlu0 (!%p1970_p13), %v1584_v24, %s2417_s24  ;;  %v1589_v31 = vld [vmem:[#allocation2 + $0xc8] sm:$0xff] (!%p1970_p13)  ;;  %v1531_v33 = vld [vmem:[%s2529_s5 + $0xf8] sm:$0xff] (!%p1970_p13) }
 0x2c8   : > { %v2132_v37 = vpop.f32.mrb[63].mxu1  ;;  %1563 = vst.msk [vmem:[%s2539_s9 + $0xf8] sm:$0xff] (!%p1970_p13), %vm597_vm1, %v1531_v33 }
 0x2c9   : > { %v1462_v38 = vadd.f32 %v2130_v34, %v1253_v32  ;;  %v2133_v39 = vadd.f32 %v2132_v37, %v2131_v35  ;;  %1674 = vrot.lane.b32.xlu1 (!%p1970_p13), %v1587_v27, %s2417_s24  ;;  %v1588_v32 = vld [vmem:[#allocation2 + $0xc0] sm:$0xff] (!%p1970_p13)  ;;  %v1530_v34 = vld [vmem:[%s2529_s5 + $0xf0] sm:$0xff] (!%p1970_p13)  ;;  %v1591_v35 = vld [vmem:[#allocation2 + $0xd8] sm:$0xff] (!%p1970_p13) }
 0x2ca   : > { %1562 = vst.msk [vmem:[%s2539_s9 + $0xf0] sm:$0xff] (!%p1970_p13), %vm597_vm1, %v1530_v34 }
 0x2cb   : > { %1494 = vst.msk [vmem:[#allocation2 + $0xf0] sm:$0xff] %vm597_vm1, %v1462_v38  ;;  %v1463_v40 = vadd.f32 %v2133_v39, %v1254_v36  ;;  %1672 = vrot.lane.b32.xlu0 (!%p1970_p13), %v1586_v28, %s2417_s24  ;;  %v1590_v36 = vld [vmem:[#allocation2 + $0xd0] sm:$0xff] (!%p1970_p13)  ;;  %v1592_v38 = vld [vmem:[#allocation2 + $0xe0] sm:$0xff] (!%p1970_p13) }
 0x2cc   : > { %v1593_v37 = vld [vmem:[#allocation2 + $0xe8] sm:$0xff] (!%p1970_p13) }
 0x2cd   : > { %1495 = vst.msk [vmem:[#allocation2 + $0xf8] sm:$0xff] %vm597_vm1, %v1463_v40  ;;  %1678 = vrot.lane.b32.xlu1 (!%p1970_p13), %v1589_v31, %s2417_s24 }
 0x2cf   : > { %1676 = vrot.lane.b32.xlu0 %v1588_v32, %s2417_s24 }
 0x2d1   : > { %1682 = vrot.lane.b32.xlu1 %v1591_v35, %s2417_s24 }
 0x2d2   : > { %v1594_v40 = vld [vmem:[#allocation2 + $0xf0] sm:$0xff] }
 0x2d3   : > { %1680 = vrot.lane.b32.xlu0 %v1590_v36, %s2417_s24 }
 0x2d4   : > { %v1595_v39 = vld [vmem:[#allocation2 + $0xf8] sm:$0xff] }
 0x2d5   : > { %1686 = vrot.lane.b32.xlu1 %v1593_v37, %s2417_s24 }
 0x2d7   : > { %1684 = vrot.lane.b32.xlu0 %v1592_v38, %s2417_s24 }
 0x2d9   : > { %1690 = vrot.lane.b32.xlu1 %v1595_v39, %s2417_s24 }
 0x2db   : > { %1688 = vrot.lane.b32.xlu0 %v1594_v40, %s2417_s24 }
 0x30c   : > { %v1633_v41 = vpop.permute.xlu1 %1632 }
 0x30d   : > { %1727 = vst.msk [vmem:[%s2539_s9 + $0x10] sm:$0xff] %vm1724_vm2, %v1633_v41 }
 0x30e   : > { %v1629_v42 = vpop.permute.xlu0 %1628 }
 0x30f   : > { %1725 = vst.msk [vmem:[%s2539_s9] sm:$0xff] %vm1724_vm2, %v1629_v42 }
 0x310   : > { %v1635_v43 = vpop.permute.xlu1 %1634 }
 0x311   : > { %1728 = vst.msk [vmem:[%s2539_s9 + $0x18] sm:$0xff] %vm1724_vm2, %v1635_v43 }
 0x312   : > { %v1631_v44 = vpop.permute.xlu0 %1630 }
 0x313   : > { %1726 = vst.msk [vmem:[%s2539_s9 + $0x8] sm:$0xff] %vm1724_vm2, %v1631_v44 }
 0x314   : > { %v1639_v45 = vpop.permute.xlu1 %1638 }
 0x315   : > { %1730 = vst.msk [vmem:[%s2539_s9 + $0x28] sm:$0xff] %vm1724_vm2, %v1639_v45 }
 0x316   : > { %v1637_v46 = vpop.permute.xlu0 %1636 }
 0x317   : > { %1729 = vst.msk [vmem:[%s2539_s9 + $0x20] sm:$0xff] %vm1724_vm2, %v1637_v46 }
 0x318   : > { %v1643_v47 = vpop.permute.xlu1 %1642 }
 0x319   : > { %1732 = vst.msk [vmem:[%s2539_s9 + $0x38] sm:$0xff] %vm1724_vm2, %v1643_v47 }
 0x31a   : > { %v1641_v48 = vpop.permute.xlu0 %1640 }
 0x31b   : > { %1731 = vst.msk [vmem:[%s2539_s9 + $0x30] sm:$0xff] %vm1724_vm2, %v1641_v48 }
 0x31c   : > { %v1647_v49 = vpop.permute.xlu1 %1646 }
 0x31d   : > { %1734 = vst.msk [vmem:[%s2539_s9 + $0x48] sm:$0xff] %vm1724_vm2, %v1647_v49 }
 0x31e   : > { %v1645_v50 = vpop.permute.xlu0 %1644 }
 0x31f   : > { %1733 = vst.msk [vmem:[%s2539_s9 + $0x40] sm:$0xff] %vm1724_vm2, %v1645_v50 }
 0x323   : > { %v1651_v51 = vpop.permute.xlu1 %1650 }
 0x324   : > { %1736 = vst.msk [vmem:[%s2539_s9 + $0x58] sm:$0xff] %vm1724_vm2, %v1651_v51 }
 0x325   : > { %v1649_v52 = vpop.permute.xlu0 %1648 }
 0x326   : > { %1735 = vst.msk [vmem:[%s2539_s9 + $0x50] sm:$0xff] %vm1724_vm2, %v1649_v52 }
 0x327   : > { %v1655_v53 = vpop.permute.xlu1 %1654 }
 0x328   : > { %1738 = vst.msk [vmem:[%s2539_s9 + $0x68] sm:$0xff] %vm1724_vm2, %v1655_v53 }
 0x329   : > { %v1653_v54 = vpop.permute.xlu0 %1652 }
 0x32a   : > { %1737 = vst.msk [vmem:[%s2539_s9 + $0x60] sm:$0xff] %vm1724_vm2, %v1653_v54 }
 0x32b   : > { %v1659_v55 = vpop.permute.xlu1 %1658 }
 0x32c   : > { %1740 = vst.msk [vmem:[%s2539_s9 + $0x78] sm:$0xff] %vm1724_vm2, %v1659_v55 }
 0x32d   : > { %v1657_v56 = vpop.permute.xlu0 %1656 }
 0x32e   : > { %1739 = vst.msk [vmem:[%s2539_s9 + $0x70] sm:$0xff] %vm1724_vm2, %v1657_v56 }
 0x32f   : > { %v1663_v57 = vpop.permute.xlu1 %1662 }
 0x330   : > { %1742 = vst.msk [vmem:[%s2539_s9 + $0x88] sm:$0xff] %vm1724_vm2, %v1663_v57 }
 0x331   : > { %v1661_v58 = vpop.permute.xlu0 %1660 }
 0x332   : > { %1741 = vst.msk [vmem:[%s2539_s9 + $0x80] sm:$0xff] %vm1724_vm2, %v1661_v58 }
 0x333   : > { %v1667_v59 = vpop.permute.xlu1 %1666 }
 0x334   : > { %1744 = vst.msk [vmem:[%s2539_s9 + $0x98] sm:$0xff] %vm1724_vm2, %v1667_v59 }
 0x335   : > { %v1665_v60 = vpop.permute.xlu0 %1664 }
 0x336   : > { %1743 = vst.msk [vmem:[%s2539_s9 + $0x90] sm:$0xff] %vm1724_vm2, %v1665_v60 }
 0x337   : > { %v1671_v61 = vpop.permute.xlu1 %1670 }
 0x338   : > { %1746 = vst.msk [vmem:[%s2539_s9 + $0xa8] sm:$0xff] %vm1724_vm2, %v1671_v61 }
 0x339   : > { %v1669_v62 = vpop.permute.xlu0 %1668 }
 0x33a   : > { %1745 = vst.msk [vmem:[%s2539_s9 + $0xa0] sm:$0xff] %vm1724_vm2, %v1669_v62 }
 0x33b   : > { %v1675_v63 = vpop.permute.xlu1 %1674 }
 0x33c   : > { %1748 = vst.msk [vmem:[%s2539_s9 + $0xb8] sm:$0xff] %vm1724_vm2, %v1675_v63 }
 0x33d   : > { %v1673_v0 = vpop.permute.xlu0 %1672 }
 0x33e   : > { %1747 = vst.msk [vmem:[%s2539_s9 + $0xb0] sm:$0xff] %vm1724_vm2, %v1673_v0 }
 0x33f   : > { %v1679_v1 = vpop.permute.xlu1 %1678 }
 0x340   : > { %1750 = vst.msk [vmem:[%s2539_s9 + $0xc8] sm:$0xff] %vm1724_vm2, %v1679_v1 }
 0x341   : > { %v1677_v2 = vpop.permute.xlu0 %1676 }
 0x342   : > { %1749 = vst.msk [vmem:[%s2539_s9 + $0xc0] sm:$0xff] %vm1724_vm2, %v1677_v2 }
 0x343   : > { %v1683_v3 = vpop.permute.xlu1 %1682 }
 0x344   : > { %1752 = vst.msk [vmem:[%s2539_s9 + $0xd8] sm:$0xff] %vm1724_vm2, %v1683_v3 }
 0x345   : > { %v1681_v4 = vpop.permute.xlu0 %1680 }
 0x346   : > { %1751 = vst.msk [vmem:[%s2539_s9 + $0xd0] sm:$0xff] %vm1724_vm2, %v1681_v4 }
 0x347   : > { %v1687_v5 = vpop.permute.xlu1 %1686 }
 0x348   : > { %1754 = vst.msk [vmem:[%s2539_s9 + $0xe8] sm:$0xff] %vm1724_vm2, %v1687_v5 }
 0x349   : > { %v1685_v6 = vpop.permute.xlu0 %1684 }
 0x34a   : > { %1753 = vst.msk [vmem:[%s2539_s9 + $0xe0] sm:$0xff] %vm1724_vm2, %v1685_v6 }
 0x34b   : > { %v1691_v7 = vpop.permute.xlu1 %1690 }
 0x34c   : > { %1756 = vst.msk [vmem:[%s2539_s9 + $0xf8] sm:$0xff] %vm1724_vm2, %v1691_v7 }
 0x34d   : > { %v1689_v8 = vpop.permute.xlu0 %1688 }
 0x34e   : > { %1755 = vst.msk [vmem:[%s2539_s9 + $0xf0] sm:$0xff] %vm1724_vm2, %v1689_v8 }
 0x34f PF: > { %s14_s21 = sadd.s32 1, %s2414_s21   ;;  %s2928_s15 = smov %s2394_s16 }
 0x350   : > { %p11_p0 = scmp.ge.s32.totalorder %s14_s21, 6   ;;  %s2929_s16 = smov %s2494_s28 }
 0x351   : > { %s2930_s17 = smov %s2406_s19  ;;  %s2931_s18 = smov %s2410_s20 }
 0x352   : > { %s2932_s19 = smov %s2935_s22  ;;  %s2933_s20 = smov %s2939_s23 }
 0x353   :  { %13 = sbr.rel (!%p11_p0) target bundleno = 4 (0x4), region = 111 }

// kernel: wls_mlp_layer_e.2
= control target key start
LH: loop header
LB: loop body
LE: loop exit
PB: predicated region body
PF: predicated region fallthrough
CT: control target
= control target key end

     0   :  { %s3527_s25 = smov 0   ;;  %s4198_s0 = inlined_call_operand.vmem [shape: f32[512,16], index: 0, kind: input, shape index: {}]   ;;  %s4199_s1 = inlined_call_operand.vmem [shape: f32[16,32], index: 1, kind: input, shape index: {}]   ;;  %s4200_s2 = inlined_call_operand.vmem [shape: f32[1,32], index: 2, kind: input, shape index: {}]   ;;  %s4201_s3 = inlined_call_operand.vmem [shape: f32[32,64], index: 3, kind: input, shape index: {}]   ;;  %s4202_s4 = inlined_call_operand.vmem [shape: f32[1,64], index: 4, kind: input, shape index: {}]   ;;  %s4203_s5 = inlined_call_operand.vmem [shape: f32[64,16], index: 5, kind: input, shape index: {}]   ;;  %s4204_s6 = inlined_call_operand.vmem [shape: f32[1,16], index: 6, kind: input, shape index: {}]   ;;  %s4205_s7 = inlined_call_operand.vmem [shape: f32[16,16], index: 7, kind: input, shape index: {}]   ;;  %s4206_s8 = inlined_call_operand.vmem [shape: f32[1,16], index: 8, kind: input, shape index: {}]   ;;  %s4207_s9 = inlined_call_operand.vmem [shape: f32[16,16], index: 9, kind: input, shape index: {}]   ;;  %s4208_s10 = inlined_call_operand.vmem [shape: f32[1,16], index: 10, kind: input, shape index: {}]   ;;  %s4209_s11 = inlined_call_operand.vmem [shape: f32[512,16], index: 11, kind: output, shape index: {0}]   ;;  %s4210_s12 = inlined_call_operand.vmem [shape: bf16[512,16], index: 12, kind: output, shape index: {1}]   ;;  %s4211_s13 = inlined_call_operand.vmem [shape: bf16[512,16], index: 13, kind: output, shape index: {2}]  }
   0x1 LB: > { %s2641_s26 = sadd.s32 4294967295, %s3455_s25   ;;  %p2645_p0 = scmp.ge.s32.totalorder %s3455_s25, 1  ;;  %s3455_s25 = sphi %s3527_s25, %s24_s25  }
   0x2   : > { %p393_p1 = scmp.lt.s32.totalorder %s3455_s25, 3 }
   0x4   : > { %p394_p2 = pnand %p2645_p0, %p393_p1 }
   0x5   : > { %v503_v0 = vld [vmem:[%s4199_s1] sm:$0xff] (!%p394_p2)  ;;  %v504_v1 = vld [vmem:[%s4199_s1 + $0x8] sm:$0xff] (!%p394_p2)  ;;  %s2646_s14 = sshll.u32 (!%p394_p2), %s2641_s26, 5  ;;  %vm512_vm0 = vcmask (!%p394_p2), 130048   ;;  %v868_v9 = vld [vmem:[%s4201_s3 + $0x10] sm:$0xff] (!%p394_p2)  ;;  %vm877_vm1 = vcmask (!%p394_p2), 261120  }
   0x6   : > { %397 = sbr.rel (%p394_p2) target bundleno = 950 (0x3b6), region = 64  ;;  %v866_v2 = vld [vmem:[%s4201_s3] sm:$0xff] (!%p394_p2)  ;;  %v3403_v3 = vpack.c.bf16 (!%p394_p2), %v504_v1, %v503_v0  ;;  %p448_p3 = scmp.lt.s32.totalorder (!%p394_p2), %s2646_s14, 63  ;;  %v867_v4 = vld [vmem:[%s4201_s3 + $0x8] sm:$0xff] (!%p394_p2)  ;;  %v869_v10 = vld [vmem:[%s4201_s3 + $0x18] sm:$0xff] (!%p394_p2)  ;;  %vm1246_vm2 = vcmask (!%p394_p2), 523264  }
   0x7   : > { %v3407_v5 = vpack.c.bf16 (!%p394_p2), %v867_v4, %v866_v2  ;;  %v3411_v15 = vpack.c.bf16 (!%p394_p2), %v869_v10, %v868_v9  ;;  %v1231_v41 = vld [vmem:[%s4203_s5] sm:$0xff] (!%p394_p2)  ;;  %v1232_v42 = vld [vmem:[%s4203_s5 + $0x8] sm:$0xff] (!%p394_p2)  ;;  %v1233_v43 = vld [vmem:[%s4203_s5 + $0x10] sm:$0xff] (!%p394_p2)  ;;  %vm2058_vm3 = vcmask (!%p394_p2), 125952  }
   0x8   : > { %3404 = vmatprep.subr.bf16.mxu0 (!%p394_p2), %v3403_v3  ;;  %3439 = vmatprep.subr.bf16.mxu1 (!%p394_p2), %v3403_v3  ;;  %v3415_v44 = vpack.c.bf16 (!%p394_p2), %v1232_v42, %v1231_v41  ;;  %v1234_v45 = vld [vmem:[%s4203_s5 + $0x18] sm:$0xff] (!%p394_p2)  ;;  %v1235_v47 = vld [vmem:[%s4203_s5 + $0x20] sm:$0xff] (!%p394_p2)  ;;  %v1236_v48 = vld [vmem:[%s4203_s5 + $0x28] sm:$0xff] (!%p394_p2) }
   0x9   : > { %3406 = vmatpush3.bf16.msra.mxu0 (!%p394_p2), %v3403_v3  ;;  %3440 = vmatpush3.bf16.msra.mxu1 (!%p394_p2), %v3403_v3  ;;  %v3419_v46 = vpack.c.bf16 (!%p394_p2), %v1234_v45, %v1233_v43  ;;  %v3423_v49 = vpack.c.bf16 (!%p394_p2), %v1236_v48, %v1235_v47  ;;  %v1237_v50 = vld [vmem:[%s4203_s5 + $0x30] sm:$0xff] (!%p394_p2)  ;;  %v1238_v51 = vld [vmem:[%s4203_s5 + $0x38] sm:$0xff] (!%p394_p2)  ;;  %v3654_v53 = vld [vmem:[%s4200_s2] ss:$0 sm:$0xff] (!%p394_p2) }
   0xa   : > { %3408 = vmatprep.subr.bf16.mxu1 (!%p394_p2), %v3407_v5  ;;  %3416 = vmatprep.subr.bf16.mxu0 (!%p394_p2), %v3415_v44  ;;  %v3427_v52 = vpack.c.bf16 (!%p394_p2), %v1238_v51, %v1237_v50 }
   0xd   : > { %s4213_s14 = smov (!%p448_p3, %s2646_s14), 63 }
   0xe   : > { %s2647_s19 = sshll.u32 %s4213_s14, 3  ;;  %s2651_s21 = sshll.u32 %s4213_s14, 2 }
   0xf   : > { %s3555_s22 = scalar_lea.vmem %s4198_s0, %s2647_s19  ;;  %s3820_s16 = scalar_lea.vmem %s4209_s11, %s2647_s19 }
  0x10   : > { %v471_v6 = vld [vmem:[%s3555_s22] sm:$0xff]  ;;  %v472_v7 = vld [vmem:[%s3555_s22 + $0x8] sm:$0xff]  ;;  %v473_v8 = vld [vmem:[%s3555_s22 + $0x10] sm:$0xff]  ;;  %s3998_s24 = scalar_lea.vmem %s4210_s12, %s2651_s21  ;;  %s4005_s27 = scalar_lea.vmem %s4211_s13, %s2651_s21 }
  0x11   : > { %3131 = vmatprep.mubr.msk.f32.mxu0 %vm512_vm0, %v471_v6  ;;  %v474_v11 = vld [vmem:[%s3555_s22 + $0x18] sm:$0xff]  ;;  %v475_v12 = vld [vmem:[%s3555_s22 + $0x20] sm:$0xff]  ;;  %v488_v14 = vld [vmem:[%s3555_s22 + $0x88] sm:$0xff] }
  0x12   : > { %3132 = vmatmul.mubr.msk.f32.vlgmr.msra.gmra.mrb[0].mxu0 %vm512_vm0, %v472_v7  ;;  %v487_v13 = vld [vmem:[%s3555_s22 + $0x80] sm:$0xff]  ;;  %v489_v16 = vld [vmem:[%s3555_s22 + $0x90] sm:$0xff]  ;;  %v476_v17 = vld [vmem:[%s3555_s22 + $0x28] sm:$0xff] }
  0x13   : > { %3134 = vmatprep.mubr.msk.f32.mxu0 %vm512_vm0, %v473_v8  ;;  %3155 = vmatprep.mubr.msk.f32.mxu1 %vm512_vm0, %v487_v13  ;;  %v477_v18 = vld [vmem:[%s3555_s22 + $0x30] sm:$0xff]  ;;  %v490_v19 = vld [vmem:[%s3555_s22 + $0x98] sm:$0xff]  ;;  %v491_v20 = vld [vmem:[%s3555_s22 + $0xa0] sm:$0xff] }
  0x14   : > { %3156 = vmatmul.mubr.msk.f32.vlgmr.msra.gmra.mrb[0].mxu1 %vm512_vm0, %v488_v14  ;;  %v478_v21 = vld [vmem:[%s3555_s22 + $0x38] sm:$0xff]  ;;  %v479_v22 = vld [vmem:[%s3555_s22 + $0x40] sm:$0xff]  ;;  %v492_v23 = vld [vmem:[%s3555_s22 + $0xa8] sm:$0xff]  ;;  %3418 = vmatpush3.bf16.msra.mxu0 %v3415_v44 }
  0x15   : > { %3158 = vmatprep.mubr.msk.f32.mxu1 %vm512_vm0, %v489_v16  ;;  %3410 = vmatpush3.bf16.msra.mxu1 %v3407_v5  ;;  %v493_v24 = vld [vmem:[%s3555_s22 + $0xb0] sm:$0xff]  ;;  %v480_v25 = vld [vmem:[%s3555_s22 + $0x48] sm:$0xff]  ;;  %v494_v27 = vld [vmem:[%s3555_s22 + $0xb8] sm:$0xff] }
  0x16   : > { %3135 = vmatmul.mubr.msk.f32.gmra.mrb[2].mxu0 %vm512_vm0, %v474_v11  ;;  %3412 = vmatprep.subr.bf16.mxu1 %v3411_v15  ;;  %v481_v26 = vld [vmem:[%s3555_s22 + $0x50] sm:$0xff]  ;;  %v495_v28 = vld [vmem:[%s3555_s22 + $0xc0] sm:$0xff]  ;;  %v482_v29 = vld [vmem:[%s3555_s22 + $0x58] sm:$0xff] }
  0x17   : > { %3137 = vmatprep.mubr.msk.f32.mxu0 %vm512_vm0, %v475_v12  ;;  %v483_v30 = vld [vmem:[%s3555_s22 + $0x60] sm:$0xff]  ;;  %v496_v31 = vld [vmem:[%s3555_s22 + $0xc8] sm:$0xff]  ;;  %v497_v32 = vld [vmem:[%s3555_s22 + $0xd0] sm:$0xff]  ;;  %3420 = vmatprep.subr.bf16.mxu0 %v3419_v46 }
  0x18   : > { %3159 = vmatmul.mubr.msk.f32.gmra.mrb[2].mxu1 %vm512_vm0, %v490_v19  ;;  %v484_v33 = vld [vmem:[%s3555_s22 + $0x68] sm:$0xff]  ;;  %v485_v34 = vld [vmem:[%s3555_s22 + $0x70] sm:$0xff]  ;;  %v498_v35 = vld [vmem:[%s3555_s22 + $0xd8] sm:$0xff]  ;;  %3422 = vmatpush3.bf16.msra.mxu0 %v3419_v46 }
  0x19   : > { %3161 = vmatprep.mubr.msk.f32.mxu1 %vm512_vm0, %v491_v20  ;;  %3414 = vmatpush3.bf16.msra.mxu1 %v3411_v15  ;;  %v499_v36 = vld [vmem:[%s3555_s22 + $0xe0] sm:$0xff]  ;;  %v486_v37 = vld [vmem:[%s3555_s22 + $0x78] sm:$0xff]  ;;  %v500_v38 = vld [vmem:[%s3555_s22 + $0xe8] sm:$0xff] }
  0x1a   : > { %3138 = vmatmul.mubr.msk.f32.gmra.mrb[4].mxu0 %vm512_vm0, %v476_v17  ;;  %v501_v39 = vld [vmem:[%s3555_s22 + $0xf0] sm:$0xff]  ;;  %v502_v40 = vld [vmem:[%s3555_s22 + $0xf8] sm:$0xff]  ;;  %3424 = vmatprep.subr.bf16.mxu0 %v3423_v49 }
  0x1b   : > { %3140 = vmatprep.mubr.msk.f32.mxu0 %vm512_vm0, %v477_v18 }
  0x1c   : > { %3162 = vmatmul.mubr.msk.f32.gmra.mrb[4].mxu1 %vm512_vm0, %v492_v23  ;;  %3426 = vmatpush3.bf16.msra.mxu0 %v3423_v49 }
  0x1d   : > { %3164 = vmatprep.mubr.msk.f32.mxu1 %vm512_vm0, %v493_v24  ;;  %3428 = vmatprep.subr.bf16.mxu0 %v3427_v52 }
  0x1e   : > { %3141 = vmatmul.mubr.msk.f32.gmra.mrb[6].mxu0 %vm512_vm0, %v478_v21 }
  0x1f   : > { %3143 = vmatprep.mubr.msk.f32.mxu0 %vm512_vm0, %v479_v22 }
  0x20   : > { %3165 = vmatmul.mubr.msk.f32.gmra.mrb[6].mxu1 %vm512_vm0, %v494_v27  ;;  %3430 = vmatpush3.bf16.msra.mxu0 %v3427_v52 }
  0x21   : > { %3167 = vmatprep.mubr.msk.f32.mxu1 %vm512_vm0, %v495_v28 }
  0x22   : > { %3144 = vmatmul.mubr.msk.f32.gmra.mrb[8].mxu0 %vm512_vm0, %v480_v25 }
  0x23   : > { %3146 = vmatprep.mubr.msk.f32.mxu0 %vm512_vm0, %v481_v26 }
  0x24   : > { %3168 = vmatmul.mubr.msk.f32.gmra.mrb[8].mxu1 %vm512_vm0, %v496_v31 }
  0x25   : > { %3170 = vmatprep.mubr.msk.f32.mxu1 %vm512_vm0, %v497_v32 }
  0x26   : > { %3147 = vmatmul.mubr.msk.f32.gmra.mrb[10].mxu0 %vm512_vm0, %v482_v29 }
  0x27   : > { %3149 = vmatprep.mubr.msk.f32.mxu0 %vm512_vm0, %v483_v30 }
  0x28   : > { %3171 = vmatmul.mubr.msk.f32.gmra.mrb[10].mxu1 %vm512_vm0, %v498_v35 }
  0x29   : > { %3173 = vmatprep.mubr.msk.f32.mxu1 %vm512_vm0, %v499_v36 }
  0x2a   : > { %3150 = vmatmul.mubr.msk.f32.gmra.mrb[12].mxu0 %vm512_vm0, %v484_v33 }
  0x2b   : > { %3152 = vmatprep.mubr.msk.f32.mxu0 %vm512_vm0, %v485_v34 }
  0x2c   : > { %3174 = vmatmul.mubr.msk.f32.gmra.mrb[12].mxu1 %vm512_vm0, %v500_v38 }
  0x2d   : > { %3176 = vmatprep.mubr.msk.f32.mxu1 %vm512_vm0, %v501_v39 }
  0x2e   : > { %3153 = vmatmul.mubr.msk.f32.gmra.mrb[14].mxu0 %vm512_vm0, %v486_v37 }
  0x30   : > { %3177 = vmatmul.mubr.msk.f32.gmra.mrb[14].mxu1 %vm512_vm0, %v502_v40 }
  0xe5   : > { %v3133_v54 = vpop.f32.mrb[0].mxu0 }
  0xe6   : > { %v681_v55 = vadd.f32 %v3133_v54, %v3654_v53  ;;  %v675_v56 = vpop.f32.mrb[1].mxu0 }
  0xe7   : > { %v676_v57 = vadd.f32 %v3654_v53, %v675_v56  ;;  %v3659_v63 = vpop.f32.mrb[0].mxu1 }
  0xe8   : > { %v835_v60 = vmax.f32 %v681_v55, 0.0  ;;  %v755_v1 = vpop.f32.mrb[1].mxu1  ;;  %v761_v56 = vadd.f32 %v3659_v63, %v3654_v53 }
  0xe9   : > { %v834_v58 = vmax.f32 %v676_v57, 0.0  ;;  %v3136_v59 = vpop.f32.mrb[2].mxu0  ;;  %v756_v44 = vadd.f32 %v3654_v53, %v755_v1 }
  0xea   : > { %v691_v61 = vadd.f32 %v3136_v59, %v3654_v53  ;;  %v685_v62 = vpop.f32.mrb[3].mxu0 }
  0xeb   : > { %v686_v0 = vadd.f32 %v3654_v53, %v685_v62  ;;  %3187 = vmatprep.mubr.msk.f32.mxu1 %vm877_vm1, %v834_v58  ;;  %v3665_v7 = vpop.f32.mrb[2].mxu1  ;;  %v850_v52 = vmax.f32 %v756_v44, 0.0 }
  0xec   : > { %3188 = vmatmul.mubr.msk.f32.vlgmr.msra.gmra.mrb[16].mxu1 %vm877_vm1, %v835_v60  ;;  %v837_v4 = vmax.f32 %v691_v61, 0.0  ;;  %v765_v9 = vpop.f32.mrb[3].mxu1  ;;  %v851_v61 = vmax.f32 %v761_v56, 0.0  ;;  %v771_v62 = vadd.f32 %v3665_v7, %v3654_v53 }
  0xed   : > { %v836_v2 = vmax.f32 %v686_v0, 0.0  ;;  %v3139_v3 = vpop.f32.mrb[4].mxu0  ;;  %v766_v54 = vadd.f32 %v3654_v53, %v765_v9 }
  0xee   : > { %v701_v5 = vadd.f32 %v3139_v3, %v3654_v53  ;;  %v695_v6 = vpop.f32.mrb[5].mxu0  ;;  %v853_v1 = vmax.f32 %v771_v62, 0.0 }
  0xef   : > { %v696_v8 = vadd.f32 %v3654_v53, %v695_v6  ;;  %3190 = vmatprep.mubr.msk.f32.mxu1 %vm877_vm1, %v836_v2  ;;  %v3671_v15 = vpop.f32.mrb[4].mxu1  ;;  %v852_v59 = vmax.f32 %v766_v54, 0.0 }
  0xf0   : > { %3191 = vmatmul.mubr.msk.f32.gmra.mrb[18].mxu1 %vm877_vm1, %v837_v4  ;;  %v839_v12 = vmax.f32 %v701_v5, 0.0  ;;  %v775_v17 = vpop.f32.mrb[5].mxu1  ;;  %v781_v2 = vadd.f32 %v3671_v15, %v3654_v53 }
  0xf1   : > { %v838_v10 = vmax.f32 %v696_v8, 0.0  ;;  %v3142_v11 = vpop.f32.mrb[6].mxu0  ;;  %v776_v60 = vadd.f32 %v3654_v53, %v775_v17 }
  0xf2   : > { %v711_v13 = vadd.f32 %v3142_v11, %v3654_v53  ;;  %v705_v14 = vpop.f32.mrb[7].mxu0  ;;  %v855_v5 = vmax.f32 %v781_v2, 0.0 }
  0xf3   : > { %v706_v16 = vadd.f32 %v3654_v53, %v705_v14  ;;  %3193 = vmatprep.mubr.msk.f32.mxu1 %vm877_vm1, %v838_v10  ;;  %v3166_v23 = vpop.f32.mrb[6].mxu1  ;;  %v854_v0 = vmax.f32 %v776_v60, 0.0 }
  0xf4   : > { %3194 = vmatmul.mubr.msk.f32.gmra.mrb[20].mxu1 %vm877_vm1, %v839_v12  ;;  %v841_v20 = vmax.f32 %v711_v13, 0.0  ;;  %v785_v25 = vpop.f32.mrb[7].mxu1  ;;  %v791_v6 = vadd.f32 %v3166_v23, %v3654_v53  ;;  %v2091_v23 = vld [vmem:[%s4207_s9] sm:$0xff] }
  0xf5   : > { %v840_v18 = vmax.f32 %v706_v16, 0.0  ;;  %v3145_v19 = vpop.f32.mrb[8].mxu0  ;;  %v786_v63 = vadd.f32 %v3654_v53, %v785_v25  ;;  %v1600_v25 = vld [vmem:[%s4205_s7] sm:$0xff] }
  0xf6   : > { %v721_v21 = vadd.f32 %v3145_v19, %v3654_v53  ;;  %v715_v22 = vpop.f32.mrb[9].mxu0  ;;  %v857_v9 = vmax.f32 %v791_v6, 0.0 }
  0xf7   : > { %v716_v24 = vadd.f32 %v3654_v53, %v715_v22  ;;  %3196 = vmatprep.mubr.msk.f32.mxu1 %vm877_vm1, %v840_v18  ;;  %v3169_v31 = vpop.f32.mrb[8].mxu1  ;;  %v856_v3 = vmax.f32 %v786_v63, 0.0 }
  0xf8   : > { %3197 = vmatmul.mubr.msk.f32.gmra.mrb[22].mxu1 %vm877_vm1, %v841_v20  ;;  %v843_v28 = vmax.f32 %v721_v21, 0.0  ;;  %v795_v33 = vpop.f32.mrb[9].mxu1  ;;  %v801_v10 = vadd.f32 %v3169_v31, %v3654_v53 }
  0xf9   : > { %v842_v26 = vmax.f32 %v716_v24, 0.0  ;;  %v3148_v27 = vpop.f32.mrb[10].mxu0  ;;  %v796_v4 = vadd.f32 %v3654_v53, %v795_v33  ;;  %v2092_v24 = vld [vmem:[%s4207_s9 + $0x8] sm:$0xff] }
  0xfa   : > { %v731_v29 = vadd.f32 %v3148_v27, %v3654_v53  ;;  %v725_v30 = vpop.f32.mrb[11].mxu0  ;;  %v859_v13 = vmax.f32 %v801_v10, 0.0 }
  0xfb   : > { %v726_v32 = vadd.f32 %v3654_v53, %v725_v30  ;;  %3199 = vmatprep.mubr.msk.f32.mxu1 %vm877_vm1, %v842_v26  ;;  %v3172_v39 = vpop.f32.mrb[10].mxu1  ;;  %v858_v7 = vmax.f32 %v796_v4, 0.0  ;;  %v1601_v26 = vld [vmem:[%s4205_s7 + $0x8] sm:$0xff] }
  0xfc   : > { %3200 = vmatmul.mubr.msk.f32.gmra.mrb[24].mxu1 %vm877_vm1, %v843_v28  ;;  %v845_v36 = vmax.f32 %v731_v29, 0.0  ;;  %v805_v41 = vpop.f32.mrb[11].mxu1  ;;  %v811_v14 = vadd.f32 %v3172_v39, %v3654_v53  ;;  %v3431_v27 = vpack.c.bf16 %v1601_v26, %v1600_v25  ;;  %v3744_v28 = vld [vmem:[%s4202_s4] ss:$0 sm:$0xff] }
  0xfd   : > { %v844_v34 = vmax.f32 %v726_v32, 0.0  ;;  %v3151_v35 = vpop.f32.mrb[12].mxu0  ;;  %v806_v8 = vadd.f32 %v3654_v53, %v805_v41 }
  0xfe   : > { %v741_v37 = vadd.f32 %v3151_v35, %v3654_v53  ;;  %v735_v38 = vpop.f32.mrb[13].mxu0  ;;  %v861_v17 = vmax.f32 %v811_v14, 0.0  ;;  %3432 = vmatprep.subr.bf16.mxu1 %v3431_v27 }
  0xff   : > { %v736_v40 = vadd.f32 %v3654_v53, %v735_v38  ;;  %3202 = vmatprep.mubr.msk.f32.mxu1 %vm877_vm1, %v844_v34  ;;  %v3175_v48 = vpop.f32.mrb[12].mxu1  ;;  %v860_v11 = vmax.f32 %v806_v8, 0.0  ;;  %3434 = vmatpush3.bf16.msra.mxu1 %v3431_v27 }
 0x100   : > { %3203 = vmatmul.mubr.msk.f32.gmra.mrb[26].mxu1 %vm877_vm1, %v845_v36  ;;  %v847_v45 = vmax.f32 %v741_v37, 0.0  ;;  %v815_v50 = vpop.f32.mrb[13].mxu1  ;;  %v821_v18 = vadd.f32 %v3175_v48, %v3654_v53 }
 0x101   : > { %v846_v42 = vmax.f32 %v736_v40, 0.0  ;;  %v3154_v43 = vpop.f32.mrb[14].mxu0  ;;  %v816_v12 = vadd.f32 %v3654_v53, %v815_v50 }
 0x102   : > { %v751_v46 = vadd.f32 %v3154_v43, %v3654_v53  ;;  %v745_v47 = vpop.f32.mrb[15].mxu0  ;;  %v863_v20 = vmax.f32 %v821_v18, 0.0 }
 0x103   : > { %v746_v49 = vadd.f32 %v3654_v53, %v745_v47  ;;  %3205 = vmatprep.mubr.msk.f32.mxu1 %vm877_vm1, %v846_v42  ;;  %v3178_v57 = vpop.f32.mrb[14].mxu1  ;;  %v862_v15 = vmax.f32 %v816_v12, 0.0 }
 0x104   : > { %3206 = vmatmul.mubr.msk.f32.gmra.mrb[28].mxu1 %vm877_vm1, %v847_v45  ;;  %v849_v55 = vmax.f32 %v751_v46, 0.0  ;;  %v825_v58 = vpop.f32.mrb[15].mxu1  ;;  %v831_v21 = vadd.f32 %v3178_v57, %v3654_v53 }
 0x105   : > { %v848_v51 = vmax.f32 %v746_v49, 0.0  ;;  %v826_v16 = vadd.f32 %v3654_v53, %v825_v58  ;;  %v3435_v53 = vpack.c.bf16 %v2092_v24, %v2091_v23 }
 0x106   : > { %v865_v22 = vmax.f32 %v831_v21, 0.0 }
 0x107   : > { %3208 = vmatprep.mubr.msk.f32.mxu1 %vm877_vm1, %v848_v51  ;;  %v864_v19 = vmax.f32 %v826_v16, 0.0  ;;  %3436 = vmatprep.subr.bf16.mxu0 %v3435_v53 }
 0x108   : > { %3209 = vmatmul.mubr.msk.f32.gmra.mrb[30].mxu1 %vm877_vm1, %v849_v55 }
 0x109   : > { %3211 = vmatprep.mubr.msk.f32.mxu1 %vm877_vm1, %v850_v52 }
 0x10c   : > { %3212 = vmatmul.mubr.msk.f32.gmra.mrb[32].mxu1 %vm877_vm1, %v851_v61 }
 0x10d   : > { %3214 = vmatprep.mubr.msk.f32.mxu1 %vm877_vm1, %v852_v59 }
 0x110   : > { %3215 = vmatmul.mubr.msk.f32.gmra.mrb[34].mxu1 %vm877_vm1, %v853_v1 }
 0x111   : > { %3217 = vmatprep.mubr.msk.f32.mxu1 %vm877_vm1, %v854_v0 }
 0x114   : > { %3218 = vmatmul.mubr.msk.f32.gmra.mrb[36].mxu1 %vm877_vm1, %v855_v5 }
 0x115   : > { %3220 = vmatprep.mubr.msk.f32.mxu1 %vm877_vm1, %v856_v3 }
 0x118   : > { %3221 = vmatmul.mubr.msk.f32.gmra.mrb[38].mxu1 %vm877_vm1, %v857_v9 }
 0x119   : > { %3223 = vmatprep.mubr.msk.f32.mxu1 %vm877_vm1, %v858_v7 }
 0x11c   : > { %3224 = vmatmul.mubr.msk.f32.gmra.mrb[40].mxu1 %vm877_vm1, %v859_v13 }
 0x11d   : > { %3226 = vmatprep.mubr.msk.f32.mxu1 %vm877_vm1, %v860_v11 }
 0x120   : > { %3227 = vmatmul.mubr.msk.f32.gmra.mrb[42].mxu1 %vm877_vm1, %v861_v17 }
 0x121   : > { %3229 = vmatprep.mubr.msk.f32.mxu1 %vm877_vm1, %v862_v15 }
 0x124   : > { %3230 = vmatmul.mubr.msk.f32.gmra.mrb[44].mxu1 %vm877_vm1, %v863_v20 }
 0x125   : > { %3232 = vmatprep.mubr.msk.f32.mxu1 %vm877_vm1, %v864_v19 }
 0x128   : > { %3233 = vmatmul.mubr.msk.f32.gmra.mrb[46].mxu1 %vm877_vm1, %v865_v22 }
 0x1bf   : > { %v3189_v29 = vpop.f32.mrb[16].mxu1 }
 0x1c0   : > { %v1046_v30 = vadd.f32 %v3189_v29, %v3744_v28  ;;  %v1040_v31 = vpop.f32.mrb[17].mxu1 }
 0x1c1   : > { %v1041_v32 = vadd.f32 %v3744_v28, %v1040_v31 }
 0x1c2   : > { %v1200_v35 = vmax.f32 %v1046_v30, 0.0 }
 0x1c3   : > { %v1199_v33 = vmax.f32 %v1041_v32, 0.0  ;;  %v3192_v34 = vpop.f32.mrb[18].mxu1 }
 0x1c4   : > { %v1056_v36 = vadd.f32 %v3192_v34, %v3744_v28  ;;  %v1050_v37 = vpop.f32.mrb[19].mxu1 }
 0x1c5   : > { %v1051_v38 = vadd.f32 %v3744_v28, %v1050_v37  ;;  %3251 = vmatprep.mubr.msk.f32.mxu0 %vm1246_vm2, %v1199_v33 }
 0x1c6   : > { %3252 = vmatmul.mubr.msk.f32.vlgmr.msra.gmra.mrb[16].mxu0 %vm1246_vm2, %v1200_v35  ;;  %v1202_v41 = vmax.f32 %v1056_v36, 0.0 }
 0x1c7   : > { %v1201_v39 = vmax.f32 %v1051_v38, 0.0  ;;  %v3195_v40 = vpop.f32.mrb[20].mxu1  ;;  %3438 = vmatpush3.bf16.msra.mxu0 %v3435_v53 }
 0x1c8   : > { %v1066_v42 = vadd.f32 %v3195_v40, %v3744_v28  ;;  %v1060_v43 = vpop.f32.mrb[21].mxu1 }
 0x1c9   : > { %v1061_v44 = vadd.f32 %v3744_v28, %v1060_v43  ;;  %3254 = vmatprep.mubr.msk.f32.mxu0 %vm1246_vm2, %v1201_v39 }
 0x1ca   : > { %3255 = vmatmul.mubr.msk.f32.gmra.mrb[18].mxu0 %vm1246_vm2, %v1202_v41  ;;  %v1204_v47 = vmax.f32 %v1066_v42, 0.0 }
 0x1cb   : > { %v1203_v45 = vmax.f32 %v1061_v44, 0.0  ;;  %v3198_v46 = vpop.f32.mrb[22].mxu1 }
 0x1cc   : > { %v1076_v48 = vadd.f32 %v3198_v46, %v3744_v28  ;;  %v1070_v49 = vpop.f32.mrb[23].mxu1 }
 0x1cd   : > { %v1071_v50 = vadd.f32 %v3744_v28, %v1070_v49  ;;  %3257 = vmatprep.mubr.msk.f32.mxu0 %vm1246_vm2, %v1203_v45 }
 0x1ce   : > { %3258 = vmatmul.mubr.msk.f32.gmra.mrb[20].mxu0 %vm1246_vm2, %v1204_v47  ;;  %v1206_v54 = vmax.f32 %v1076_v48, 0.0 }
 0x1cf   : > { %v1205_v51 = vmax.f32 %v1071_v50, 0.0  ;;  %v3201_v52 = vpop.f32.mrb[24].mxu1 }
 0x1d0   : > { %v1086_v55 = vadd.f32 %v3201_v52, %v3744_v28  ;;  %v1080_v56 = vpop.f32.mrb[25].mxu1 }
 0x1d1   : > { %v1081_v57 = vadd.f32 %v3744_v28, %v1080_v56  ;;  %3260 = vmatprep.mubr.msk.f32.mxu0 %vm1246_vm2, %v1205_v51 }
 0x1d2   : > { %3261 = vmatmul.mubr.msk.f32.gmra.mrb[22].mxu0 %vm1246_vm2, %v1206_v54  ;;  %v1208_v60 = vmax.f32 %v1086_v55, 0.0 }
 0x1d3   : > { %v1207_v58 = vmax.f32 %v1081_v57, 0.0  ;;  %v3204_v59 = vpop.f32.mrb[26].mxu1 }
 0x1d4   : > { %v1096_v61 = vadd.f32 %v3204_v59, %v3744_v28  ;;  %v1090_v62 = vpop.f32.mrb[27].mxu1 }
 0x1d5   : > { %v1091_v0 = vadd.f32 %v3744_v28, %v1090_v62  ;;  %3263 = vmatprep.mubr.msk.f32.mxu0 %vm1246_vm2, %v1207_v58 }
 0x1d6   : > { %3264 = vmatmul.mubr.msk.f32.gmra.mrb[24].mxu0 %vm1246_vm2, %v1208_v60  ;;  %v1210_v2 = vmax.f32 %v1096_v61, 0.0 }
 0x1d7   : > { %v1209_v63 = vmax.f32 %v1091_v0, 0.0  ;;  %v3207_v1 = vpop.f32.mrb[28].mxu1  ;;  %v3813_v0 = vld [vmem:[%s4204_s6] ss:$0 sm:$0xff] }
 0x1d8   : > { %v1106_v3 = vadd.f32 %v3207_v1, %v3744_v28  ;;  %v1100_v4 = vpop.f32.mrb[29].mxu1 }
 0x1d9   : > { %v1101_v5 = vadd.f32 %v3744_v28, %v1100_v4  ;;  %3266 = vmatprep.mubr.msk.f32.mxu0 %vm1246_vm2, %v1209_v63 }
 0x1da   : > { %3267 = vmatmul.mubr.msk.f32.gmra.mrb[26].mxu0 %vm1246_vm2, %v1210_v2  ;;  %v1212_v8 = vmax.f32 %v1106_v3, 0.0 }
 0x1db   : > { %v1211_v6 = vmax.f32 %v1101_v5, 0.0  ;;  %v3210_v7 = vpop.f32.mrb[30].mxu1 }
 0x1dc   : > { %v1116_v9 = vadd.f32 %v3210_v7, %v3744_v28  ;;  %v1110_v10 = vpop.f32.mrb[31].mxu1 }
 0x1dd   : > { %v1111_v11 = vadd.f32 %v3744_v28, %v1110_v10  ;;  %3269 = vmatprep.mubr.msk.f32.mxu0 %vm1246_vm2, %v1211_v6 }
 0x1de   : > { %3270 = vmatmul.mubr.msk.f32.gmra.mrb[28].mxu0 %vm1246_vm2, %v1212_v8  ;;  %v1214_v14 = vmax.f32 %v1116_v9, 0.0 }
 0x1df   : > { %v1213_v12 = vmax.f32 %v1111_v11, 0.0  ;;  %v3213_v13 = vpop.f32.mrb[32].mxu1 }
 0x1e0   : > { %v1126_v15 = vadd.f32 %v3213_v13, %v3744_v28  ;;  %v1120_v16 = vpop.f32.mrb[33].mxu1 }
 0x1e1   : > { %v1121_v17 = vadd.f32 %v3744_v28, %v1120_v16  ;;  %3272 = vmatprep.mubr.msk.f32.mxu0 %vm1246_vm2, %v1213_v12 }
 0x1e2   : > { %3273 = vmatmul.mubr.msk.f32.gmra.mrb[30].mxu0 %vm1246_vm2, %v1214_v14  ;;  %v1216_v20 = vmax.f32 %v1126_v15, 0.0 }
 0x1e3   : > { %v1215_v18 = vmax.f32 %v1121_v17, 0.0  ;;  %v3216_v19 = vpop.f32.mrb[34].mxu1 }
 0x1e4   : > { %v1136_v21 = vadd.f32 %v3216_v19, %v3744_v28  ;;  %v1130_v22 = vpop.f32.mrb[35].mxu1 }
 0x1e5   : > { %v1131_v23 = vadd.f32 %v3744_v28, %v1130_v22  ;;  %3275 = vmatprep.mubr.msk.f32.mxu0 %vm1246_vm2, %v1215_v18 }
 0x1e6   : > { %3276 = vmatmul.mubr.msk.f32.gmra.mrb[32].mxu0 %vm1246_vm2, %v1216_v20  ;;  %v1218_v53 = vmax.f32 %v1136_v21, 0.0 }
 0x1e7   : > { %v1217_v24 = vmax.f32 %v1131_v23, 0.0  ;;  %v3219_v25 = vpop.f32.mrb[36].mxu1 }
 0x1e8   : > { %v1146_v26 = vadd.f32 %v3219_v25, %v3744_v28  ;;  %v1140_v27 = vpop.f32.mrb[37].mxu1 }
 0x1e9   : > { %v1141_v29 = vadd.f32 %v3744_v28, %v1140_v27  ;;  %3278 = vmatprep.mubr.msk.f32.mxu0 %vm1246_vm2, %v1217_v24 }
 0x1ea   : > { %3279 = vmatmul.mubr.msk.f32.gmra.mrb[34].mxu0 %vm1246_vm2, %v1218_v53  ;;  %v1220_v32 = vmax.f32 %v1146_v26, 0.0 }
 0x1eb   : > { %v1219_v30 = vmax.f32 %v1141_v29, 0.0  ;;  %v3222_v31 = vpop.f32.mrb[38].mxu1 }
 0x1ec   : > { %v1156_v33 = vadd.f32 %v3222_v31, %v3744_v28  ;;  %v1150_v34 = vpop.f32.mrb[39].mxu1 }
 0x1ed   : > { %v1151_v35 = vadd.f32 %v3744_v28, %v1150_v34  ;;  %3281 = vmatprep.mubr.msk.f32.mxu0 %vm1246_vm2, %v1219_v30 }
 0x1ee   : > { %3282 = vmatmul.mubr.msk.f32.gmra.mrb[36].mxu0 %vm1246_vm2, %v1220_v32  ;;  %v1222_v38 = vmax.f32 %v1156_v33, 0.0 }
 0x1ef   : > { %v1221_v36 = vmax.f32 %v1151_v35, 0.0  ;;  %v3225_v37 = vpop.f32.mrb[40].mxu1 }
 0x1f0   : > { %v1166_v39 = vadd.f32 %v3225_v37, %v3744_v28  ;;  %v1160_v40 = vpop.f32.mrb[41].mxu1 }
 0x1f1   : > { %v1161_v41 = vadd.f32 %v3744_v28, %v1160_v40  ;;  %3284 = vmatprep.mubr.msk.f32.mxu0 %vm1246_vm2, %v1221_v36 }
 0x1f2   : > { %3285 = vmatmul.mubr.msk.f32.gmra.mrb[38].mxu0 %vm1246_vm2, %v1222_v38  ;;  %v1224_v44 = vmax.f32 %v1166_v39, 0.0 }
 0x1f3   : > { %v1223_v42 = vmax.f32 %v1161_v41, 0.0  ;;  %v3228_v43 = vpop.f32.mrb[42].mxu1 }
 0x1f4   : > { %v1176_v45 = vadd.f32 %v3228_v43, %v3744_v28  ;;  %v1170_v46 = vpop.f32.mrb[43].mxu1 }
 0x1f5   : > { %v1171_v47 = vadd.f32 %v3744_v28, %v1170_v46  ;;  %3287 = vmatprep.mubr.msk.f32.mxu0 %vm1246_vm2, %v1223_v42 }
 0x1f6   : > { %3288 = vmatmul.mubr.msk.f32.gmra.mrb[40].mxu0 %vm1246_vm2, %v1224_v44  ;;  %v1226_v50 = vmax.f32 %v1176_v45, 0.0 }
 0x1f7   : > { %v1225_v48 = vmax.f32 %v1171_v47, 0.0  ;;  %v3231_v49 = vpop.f32.mrb[44].mxu1 }
 0x1f8   : > { %v1186_v51 = vadd.f32 %v3231_v49, %v3744_v28  ;;  %v1180_v52 = vpop.f32.mrb[45].mxu1 }
 0x1f9   : > { %v1181_v54 = vadd.f32 %v3744_v28, %v1180_v52  ;;  %3290 = vmatprep.mubr.msk.f32.mxu0 %vm1246_vm2, %v1225_v48 }
 0x1fa   : > { %3291 = vmatmul.mubr.msk.f32.gmra.mrb[42].mxu0 %vm1246_vm2, %v1226_v50  ;;  %v1228_v57 = vmax.f32 %v1186_v51, 0.0 }
 0x1fb   : > { %v1227_v55 = vmax.f32 %v1181_v54, 0.0  ;;  %v3234_v56 = vpop.f32.mrb[46].mxu1 }
 0x1fc   : > { %v1196_v58 = vadd.f32 %v3234_v56, %v3744_v28  ;;  %v1190_v59 = vpop.f32.mrb[47].mxu1 }
 0x1fd   : > { %v1191_v60 = vadd.f32 %v3744_v28, %v1190_v59  ;;  %3293 = vmatprep.mubr.msk.f32.mxu0 %vm1246_vm2, %v1227_v55 }
 0x1fe   : > { %3294 = vmatmul.mubr.msk.f32.gmra.mrb[44].mxu0 %vm1246_vm2, %v1228_v57  ;;  %v1230_v62 = vmax.f32 %v1196_v58, 0.0 }
 0x1ff   : > { %v1229_v61 = vmax.f32 %v1191_v60, 0.0 }
 0x201   : > { %3296 = vmatprep.mubr.msk.f32.mxu0 %vm1246_vm2, %v1229_v61 }
 0x202   : > { %3297 = vmatmul.mubr.msk.f32.gmra.mrb[46].mxu0 %vm1246_vm2, %v1230_v62 }
 0x299   : > { %v3253_v28 = vpop.f32.mrb[16].mxu0 }
 0x29a   : > { %v1415_v63 = vadd.f32 %v3253_v28, %v3813_v0  ;;  %v1409_v1 = vpop.f32.mrb[17].mxu0 }
 0x29b   : > { %v1410_v2 = vadd.f32 %v3813_v0, %v1409_v1 }
 0x29c   : > { %1569 = vst.msk [vmem:[%s3820_s16 + $0x8] sm:$0xff] %vm512_vm0, %v1415_v63 }
 0x29d   : > { %1568 = vst.msk [vmem:[%s3820_s16] sm:$0xff] %vm512_vm0, %v1410_v2  ;;  %v3256_v3 = vpop.f32.mrb[18].mxu0  ;;  %3303 = vmatprep.mubr.msk.f32.mxu1 %vm512_vm0, %v1410_v2  ;;  %3355 = vmatprep.mubr.msk.f32.mxu0 %vm512_vm0, %v1410_v2 }
 0x29e   : > { %v1425_v4 = vadd.f32 %v3256_v3, %v3813_v0  ;;  %v1419_v5 = vpop.f32.mrb[19].mxu0  ;;  %3304 = vmatmul.mubr.msk.f32.vlgmr.msra.gmra.mrb[48].mxu1 %vm512_vm0, %v1415_v63  ;;  %3356 = vmatmul.mubr.msk.f32.vlgmr.msra.gmra.mrb[48].mxu0 %vm512_vm0, %v1415_v63  ;;  %v3985_v63 = vld [vmem:[%s4206_s8] ss:$0 sm:$0xff] }
 0x29f   : > { %v1420_v6 = vadd.f32 %v3813_v0, %v1419_v5 }
 0x2a0   : > { %1571 = vst.msk [vmem:[%s3820_s16 + $0x18] sm:$0xff] %vm512_vm0, %v1425_v4 }
 0x2a1   : > { %1570 = vst.msk [vmem:[%s3820_s16 + $0x10] sm:$0xff] %vm512_vm0, %v1420_v6  ;;  %v3259_v7 = vpop.f32.mrb[20].mxu0  ;;  %3306 = vmatprep.mubr.msk.f32.mxu1 %vm512_vm0, %v1420_v6  ;;  %3358 = vmatprep.mubr.msk.f32.mxu0 %vm512_vm0, %v1420_v6 }
 0x2a2   : > { %v1435_v8 = vadd.f32 %v3259_v7, %v3813_v0  ;;  %v1429_v9 = vpop.f32.mrb[21].mxu0  ;;  %3307 = vmatmul.mubr.msk.f32.gmra.mrb[50].mxu1 %vm512_vm0, %v1425_v4  ;;  %3359 = vmatmul.mubr.msk.f32.gmra.mrb[50].mxu0 %vm512_vm0, %v1425_v4 }
 0x2a3   : > { %v1430_v10 = vadd.f32 %v3813_v0, %v1429_v9 }
 0x2a4   : > { %1573 = vst.msk [vmem:[%s3820_s16 + $0x28] sm:$0xff] %vm512_vm0, %v1435_v8 }
 0x2a5   : > { %1572 = vst.msk [vmem:[%s3820_s16 + $0x20] sm:$0xff] %vm512_vm0, %v1430_v10  ;;  %v3262_v11 = vpop.f32.mrb[22].mxu0  ;;  %3309 = vmatprep.mubr.msk.f32.mxu1 %vm512_vm0, %v1430_v10  ;;  %3361 = vmatprep.mubr.msk.f32.mxu0 %vm512_vm0, %v1430_v10 }
 0x2a6   : > { %v1445_v12 = vadd.f32 %v3262_v11, %v3813_v0  ;;  %v1439_v13 = vpop.f32.mrb[23].mxu0  ;;  %3310 = vmatmul.mubr.msk.f32.gmra.mrb[52].mxu1 %vm512_vm0, %v1435_v8  ;;  %3362 = vmatmul.mubr.msk.f32.gmra.mrb[52].mxu0 %vm512_vm0, %v1435_v8 }
 0x2a7   : > { %v1440_v14 = vadd.f32 %v3813_v0, %v1439_v13 }
 0x2a8   : > { %1575 = vst.msk [vmem:[%s3820_s16 + $0x38] sm:$0xff] %vm512_vm0, %v1445_v12 }
 0x2a9   : > { %1574 = vst.msk [vmem:[%s3820_s16 + $0x30] sm:$0xff] %vm512_vm0, %v1440_v14  ;;  %v3265_v15 = vpop.f32.mrb[24].mxu0  ;;  %3312 = vmatprep.mubr.msk.f32.mxu1 %vm512_vm0, %v1440_v14  ;;  %3364 = vmatprep.mubr.msk.f32.mxu0 %vm512_vm0, %v1440_v14 }
 0x2aa   : > { %v1455_v16 = vadd.f32 %v3265_v15, %v3813_v0  ;;  %v1449_v17 = vpop.f32.mrb[25].mxu0  ;;  %3313 = vmatmul.mubr.msk.f32.gmra.mrb[54].mxu1 %vm512_vm0, %v1445_v12  ;;  %3365 = vmatmul.mubr.msk.f32.gmra.mrb[54].mxu0 %vm512_vm0, %v1445_v12 }
 0x2ab   : > { %v1450_v18 = vadd.f32 %v3813_v0, %v1449_v17 }
 0x2ac   : > { %1577 = vst.msk [vmem:[%s3820_s16 + $0x48] sm:$0xff] %vm512_vm0, %v1455_v16 }
 0x2ad   : > { %1576 = vst.msk [vmem:[%s3820_s16 + $0x40] sm:$0xff] %vm512_vm0, %v1450_v18  ;;  %v3268_v19 = vpop.f32.mrb[26].mxu0  ;;  %3315 = vmatprep.mubr.msk.f32.mxu1 %vm512_vm0, %v1450_v18  ;;  %3367 = vmatprep.mubr.msk.f32.mxu0 %vm512_vm0, %v1450_v18 }
 0x2ae   : > { %v1465_v20 = vadd.f32 %v3268_v19, %v3813_v0  ;;  %v1459_v21 = vpop.f32.mrb[27].mxu0  ;;  %3316 = vmatmul.mubr.msk.f32.gmra.mrb[56].mxu1 %vm512_vm0, %v1455_v16  ;;  %3368 = vmatmul.mubr.msk.f32.gmra.mrb[56].mxu0 %vm512_vm0, %v1455_v16 }
 0x2af   : > { %v1460_v22 = vadd.f32 %v3813_v0, %v1459_v21 }
 0x2b0   : > { %1579 = vst.msk [vmem:[%s3820_s16 + $0x58] sm:$0xff] %vm512_vm0, %v1465_v20 }
 0x2b1   : > { %1578 = vst.msk [vmem:[%s3820_s16 + $0x50] sm:$0xff] %vm512_vm0, %v1460_v22  ;;  %v3271_v23 = vpop.f32.mrb[28].mxu0  ;;  %3318 = vmatprep.mubr.msk.f32.mxu1 %vm512_vm0, %v1460_v22  ;;  %3370 = vmatprep.mubr.msk.f32.mxu0 %vm512_vm0, %v1460_v22 }
 0x2b2   : > { %v1475_v24 = vadd.f32 %v3271_v23, %v3813_v0  ;;  %v1469_v25 = vpop.f32.mrb[29].mxu0  ;;  %3319 = vmatmul.mubr.msk.f32.gmra.mrb[58].mxu1 %vm512_vm0, %v1465_v20  ;;  %3371 = vmatmul.mubr.msk.f32.gmra.mrb[58].mxu0 %vm512_vm0, %v1465_v20 }
 0x2b3   : > { %v1470_v53 = vadd.f32 %v3813_v0, %v1469_v25 }
 0x2b4   : > { %1581 = vst.msk [vmem:[%s3820_s16 + $0x68] sm:$0xff] %vm512_vm0, %v1475_v24 }
 0x2b5   : > { %1580 = vst.msk [vmem:[%s3820_s16 + $0x60] sm:$0xff] %vm512_vm0, %v1470_v53  ;;  %v3274_v26 = vpop.f32.mrb[30].mxu0  ;;  %3321 = vmatprep.mubr.msk.f32.mxu1 %vm512_vm0, %v1470_v53  ;;  %3373 = vmatprep.mubr.msk.f32.mxu0 %vm512_vm0, %v1470_v53 }
 0x2b6   : > { %v1485_v27 = vadd.f32 %v3274_v26, %v3813_v0  ;;  %v1479_v29 = vpop.f32.mrb[31].mxu0  ;;  %3322 = vmatmul.mubr.msk.f32.gmra.mrb[60].mxu1 %vm512_vm0, %v1475_v24  ;;  %3374 = vmatmul.mubr.msk.f32.gmra.mrb[60].mxu0 %vm512_vm0, %v1475_v24 }
 0x2b7   : > { %v1480_v30 = vadd.f32 %v3813_v0, %v1479_v29 }
 0x2b8   : > { %1583 = vst.msk [vmem:[%s3820_s16 + $0x78] sm:$0xff] %vm512_vm0, %v1485_v27 }
 0x2b9   : > { %1582 = vst.msk [vmem:[%s3820_s16 + $0x70] sm:$0xff] %vm512_vm0, %v1480_v30  ;;  %v3277_v31 = vpop.f32.mrb[32].mxu0  ;;  %3324 = vmatprep.mubr.msk.f32.mxu1 %vm512_vm0, %v1480_v30  ;;  %3376 = vmatprep.mubr.msk.f32.mxu0 %vm512_vm0, %v1480_v30 }
 0x2ba   : > { %v1495_v32 = vadd.f32 %v3277_v31, %v3813_v0  ;;  %v1489_v33 = vpop.f32.mrb[33].mxu0  ;;  %3325 = vmatmul.mubr.msk.f32.gmra.mrb[62].mxu1 %vm512_vm0, %v1485_v27  ;;  %3377 = vmatmul.mubr.msk.f32.gmra.mrb[62].mxu0 %vm512_vm0, %v1485_v27 }
 0x2bb   : > { %v1490_v34 = vadd.f32 %v3813_v0, %v1489_v33 }
 0x2bc   : > { %1585 = vst.msk [vmem:[%s3820_s16 + $0x88] sm:$0xff] %vm512_vm0, %v1495_v32 }
 0x2bd   : > { %1584 = vst.msk [vmem:[%s3820_s16 + $0x80] sm:$0xff] %vm512_vm0, %v1490_v34  ;;  %v3280_v35 = vpop.f32.mrb[34].mxu0  ;;  %3327 = vmatprep.mubr.msk.f32.mxu1 %vm512_vm0, %v1490_v34  ;;  %3379 = vmatprep.mubr.msk.f32.mxu0 %vm512_vm0, %v1490_v34 }
 0x2be   : > { %v1505_v36 = vadd.f32 %v3280_v35, %v3813_v0  ;;  %v1499_v37 = vpop.f32.mrb[35].mxu0  ;;  %3328 = vmatmul.mubr.msk.f32.gmra.mrb[64].mxu1 %vm512_vm0, %v1495_v32  ;;  %3380 = vmatmul.mubr.msk.f32.gmra.mrb[64].mxu0 %vm512_vm0, %v1495_v32 }
 0x2bf   : > { %v1500_v38 = vadd.f32 %v3813_v0, %v1499_v37 }
 0x2c0   : > { %1587 = vst.msk [vmem:[%s3820_s16 + $0x98] sm:$0xff] %vm512_vm0, %v1505_v36 }
 0x2c1   : > { %1586 = vst.msk [vmem:[%s3820_s16 + $0x90] sm:$0xff] %vm512_vm0, %v1500_v38  ;;  %v3283_v39 = vpop.f32.mrb[36].mxu0  ;;  %3330 = vmatprep.mubr.msk.f32.mxu1 %vm512_vm0, %v1500_v38  ;;  %3382 = vmatprep.mubr.msk.f32.mxu0 %vm512_vm0, %v1500_v38 }
 0x2c2   : > { %v1515_v40 = vadd.f32 %v3283_v39, %v3813_v0  ;;  %v1509_v41 = vpop.f32.mrb[37].mxu0  ;;  %3331 = vmatmul.mubr.msk.f32.gmra.mrb[66].mxu1 %vm512_vm0, %v1505_v36  ;;  %3383 = vmatmul.mubr.msk.f32.gmra.mrb[66].mxu0 %vm512_vm0, %v1505_v36 }
 0x2c3   : > { %v1510_v42 = vadd.f32 %v3813_v0, %v1509_v41 }
 0x2c4   : > { %1589 = vst.msk [vmem:[%s3820_s16 + $0xa8] sm:$0xff] %vm512_vm0, %v1515_v40 }
 0x2c5   : > { %1588 = vst.msk [vmem:[%s3820_s16 + $0xa0] sm:$0xff] %vm512_vm0, %v1510_v42  ;;  %v3286_v43 = vpop.f32.mrb[38].mxu0  ;;  %3333 = vmatprep.mubr.msk.f32.mxu1 %vm512_vm0, %v1510_v42  ;;  %3385 = vmatprep.mubr.msk.f32.mxu0 %vm512_vm0, %v1510_v42 }
 0x2c6   : > { %v1525_v44 = vadd.f32 %v3286_v43, %v3813_v0  ;;  %v1519_v45 = vpop.f32.mrb[39].mxu0  ;;  %3334 = vmatmul.mubr.msk.f32.gmra.mrb[68].mxu1 %vm512_vm0, %v1515_v40  ;;  %3386 = vmatmul.mubr.msk.f32.gmra.mrb[68].mxu0 %vm512_vm0, %v1515_v40 }
 0x2c7   : > { %v1520_v46 = vadd.f32 %v3813_v0, %v1519_v45 }
 0x2c8   : > { %1591 = vst.msk [vmem:[%s3820_s16 + $0xb8] sm:$0xff] %vm512_vm0, %v1525_v44 }
 0x2c9   : > { %1590 = vst.msk [vmem:[%s3820_s16 + $0xb0] sm:$0xff] %vm512_vm0, %v1520_v46  ;;  %v3289_v47 = vpop.f32.mrb[40].mxu0  ;;  %3336 = vmatprep.mubr.msk.f32.mxu1 %vm512_vm0, %v1520_v46  ;;  %3388 = vmatprep.mubr.msk.f32.mxu0 %vm512_vm0, %v1520_v46 }
 0x2ca   : > { %v1535_v48 = vadd.f32 %v3289_v47, %v3813_v0  ;;  %v1529_v49 = vpop.f32.mrb[41].mxu0  ;;  %3337 = vmatmul.mubr.msk.f32.gmra.mrb[70].mxu1 %vm512_vm0, %v1525_v44  ;;  %3389 = vmatmul.mubr.msk.f32.gmra.mrb[70].mxu0 %vm512_vm0, %v1525_v44 }
 0x2cb   : > { %v1530_v50 = vadd.f32 %v3813_v0, %v1529_v49 }
 0x2cc   : > { %1593 = vst.msk [vmem:[%s3820_s16 + $0xc8] sm:$0xff] %vm512_vm0, %v1535_v48 }
 0x2cd   : > { %1592 = vst.msk [vmem:[%s3820_s16 + $0xc0] sm:$0xff] %vm512_vm0, %v1530_v50  ;;  %v3292_v51 = vpop.f32.mrb[42].mxu0  ;;  %3339 = vmatprep.mubr.msk.f32.mxu1 %vm512_vm0, %v1530_v50  ;;  %3391 = vmatprep.mubr.msk.f32.mxu0 %vm512_vm0, %v1530_v50 }
 0x2ce   : > { %v1545_v52 = vadd.f32 %v3292_v51, %v3813_v0  ;;  %v1539_v54 = vpop.f32.mrb[43].mxu0  ;;  %3340 = vmatmul.mubr.msk.f32.gmra.mrb[72].mxu1 %vm512_vm0, %v1535_v48  ;;  %3392 = vmatmul.mubr.msk.f32.gmra.mrb[72].mxu0 %vm512_vm0, %v1535_v48 }
 0x2cf   : > { %v1540_v55 = vadd.f32 %v3813_v0, %v1539_v54 }
 0x2d0   : > { %1595 = vst.msk [vmem:[%s3820_s16 + $0xd8] sm:$0xff] %vm512_vm0, %v1545_v52 }
 0x2d1   : > { %1594 = vst.msk [vmem:[%s3820_s16 + $0xd0] sm:$0xff] %vm512_vm0, %v1540_v55  ;;  %v3295_v56 = vpop.f32.mrb[44].mxu0  ;;  %3342 = vmatprep.mubr.msk.f32.mxu1 %vm512_vm0, %v1540_v55  ;;  %3394 = vmatprep.mubr.msk.f32.mxu0 %vm512_vm0, %v1540_v55 }
 0x2d2   : > { %v1555_v57 = vadd.f32 %v3295_v56, %v3813_v0  ;;  %v1549_v58 = vpop.f32.mrb[45].mxu0  ;;  %3343 = vmatmul.mubr.msk.f32.gmra.mrb[74].mxu1 %vm512_vm0, %v1545_v52  ;;  %3395 = vmatmul.mubr.msk.f32.gmra.mrb[74].mxu0 %vm512_vm0, %v1545_v52 }
 0x2d3   : > { %v1550_v59 = vadd.f32 %v3813_v0, %v1549_v58 }
 0x2d4   : > { %1597 = vst.msk [vmem:[%s3820_s16 + $0xe8] sm:$0xff] %vm512_vm0, %v1555_v57 }
 0x2d5   : > { %1596 = vst.msk [vmem:[%s3820_s16 + $0xe0] sm:$0xff] %vm512_vm0, %v1550_v59  ;;  %v3298_v60 = vpop.f32.mrb[46].mxu0  ;;  %3345 = vmatprep.mubr.msk.f32.mxu1 %vm512_vm0, %v1550_v59  ;;  %3397 = vmatprep.mubr.msk.f32.mxu0 %vm512_vm0, %v1550_v59 }
 0x2d6   : > { %v1565_v61 = vadd.f32 %v3298_v60, %v3813_v0  ;;  %v1559_v62 = vpop.f32.mrb[47].mxu0  ;;  %3346 = vmatmul.mubr.msk.f32.gmra.mrb[76].mxu1 %vm512_vm0, %v1555_v57  ;;  %3398 = vmatmul.mubr.msk.f32.gmra.mrb[76].mxu0 %vm512_vm0, %v1555_v57 }
 0x2d7   : > { %v1560_v28 = vadd.f32 %v3813_v0, %v1559_v62  ;;  %v3990_v0 = vld [vmem:[%s4208_s10] ss:$0 sm:$0xff] }
 0x2d8   : > { %1599 = vst.msk [vmem:[%s3820_s16 + $0xf8] sm:$0xff] %vm512_vm0, %v1565_v61 }
 0x2d9   : > { %1598 = vst.msk [vmem:[%s3820_s16 + $0xf0] sm:$0xff] %vm512_vm0, %v1560_v28  ;;  %3348 = vmatprep.mubr.msk.f32.mxu1 %vm512_vm0, %v1560_v28  ;;  %3400 = vmatprep.mubr.msk.f32.mxu0 %vm512_vm0, %v1560_v28 }
 0x2da   : > { %3349 = vmatmul.mubr.msk.f32.gmra.mrb[78].mxu1 %vm512_vm0, %v1565_v61  ;;  %3401 = vmatmul.mubr.msk.f32.gmra.mrb[78].mxu0 %vm512_vm0, %v1565_v61 }
 0x371   : > { %v3305_v1 = vpop.f32.mrb[48].mxu1  ;;  %v3357_v2 = vpop.f32.mrb[48].mxu0 }
 0x372   : > { %v1777_v3 = vadd.f32 %v3305_v1, %v3985_v63  ;;  %v2172_v4 = vadd.f32 %v3357_v2, %v3990_v0  ;;  %v1771_v5 = vpop.f32.mrb[49].mxu1  ;;  %v2166_v6 = vpop.f32.mrb[49].mxu0 }
 0x373   : > { %v1772_v7 = vadd.f32 %v3985_v63, %v1771_v5  ;;  %v2167_v8 = vadd.f32 %v3990_v0, %v2166_v6 }
 0x374   : > { %v2886_v9 = vpack.c.bf16 %v1777_v3, %v1777_v3  ;;  %v2326_v10 = vmul.f32 0.25, %v2172_v4 }
 0x375   : > { %v2885_v11 = vpack.c.bf16 %v1772_v7, %v1772_v7  ;;  %v2325_v12 = vmul.f32 0.25, %v2167_v8  ;;  %v3308_v13 = vpop.f32.mrb[50].mxu1  ;;  %v3360_v14 = vpop.f32.mrb[50].mxu0 }
 0x376   : > { %2060 = vst.msk [vmem:[%s3998_s24 + $0x4] sm:$0xf] %vm2058_vm3, %v2886_v9  ;;  %v2918_v15 = vpack.c.bf16 %v2326_v10, %v2326_v10  ;;  %v1787_v16 = vadd.f32 %v3308_v13, %v3985_v63  ;;  %v2182_v17 = vadd.f32 %v3360_v14, %v3990_v0  ;;  %v1781_v18 = vpop.f32.mrb[51].mxu1  ;;  %v2176_v19 = vpop.f32.mrb[51].mxu0 }
 0x377   : > { %2059 = vst.msk [vmem:[%s3998_s24] sm:$0xf] %vm2058_vm3, %v2885_v11  ;;  %v2917_v20 = vpack.c.bf16 %v2325_v12, %v2325_v12  ;;  %v1782_v21 = vadd.f32 %v3985_v63, %v1781_v18  ;;  %v2177_v22 = vadd.f32 %v3990_v0, %v2176_v19 }
 0x378   : > { %2486 = vst.msk [vmem:[%s4005_s27 + $0x4] sm:$0xf] %vm2058_vm3, %v2918_v15  ;;  %v2888_v23 = vpack.c.bf16 %v1787_v16, %v1787_v16  ;;  %v2328_v24 = vmul.f32 0.25, %v2182_v17 }
 0x379   : > { %2485 = vst.msk [vmem:[%s4005_s27] sm:$0xf] %vm2058_vm3, %v2917_v20  ;;  %v2887_v25 = vpack.c.bf16 %v1782_v21, %v1782_v21  ;;  %v2327_v53 = vmul.f32 0.25, %v2177_v22  ;;  %v3311_v26 = vpop.f32.mrb[52].mxu1  ;;  %v3363_v27 = vpop.f32.mrb[52].mxu0 }
 0x37a   : > { %2062 = vst.msk [vmem:[%s3998_s24 + $0xc] sm:$0xf] %vm2058_vm3, %v2888_v23  ;;  %v2920_v29 = vpack.c.bf16 %v2328_v24, %v2328_v24  ;;  %v1797_v30 = vadd.f32 %v3311_v26, %v3985_v63  ;;  %v2192_v31 = vadd.f32 %v3363_v27, %v3990_v0  ;;  %v1791_v32 = vpop.f32.mrb[53].mxu1  ;;  %v2186_v33 = vpop.f32.mrb[53].mxu0 }
 0x37b   : > { %2061 = vst.msk [vmem:[%s3998_s24 + $0x8] sm:$0xf] %vm2058_vm3, %v2887_v25  ;;  %v2919_v34 = vpack.c.bf16 %v2327_v53, %v2327_v53  ;;  %v1792_v35 = vadd.f32 %v3985_v63, %v1791_v32  ;;  %v2187_v36 = vadd.f32 %v3990_v0, %v2186_v33 }
 0x37c   : > { %2488 = vst.msk [vmem:[%s4005_s27 + $0xc] sm:$0xf] %vm2058_vm3, %v2920_v29  ;;  %v2890_v37 = vpack.c.bf16 %v1797_v30, %v1797_v30  ;;  %v2330_v38 = vmul.f32 0.25, %v2192_v31 }
 0x37d   : > { %2487 = vst.msk [vmem:[%s4005_s27 + $0x8] sm:$0xf] %vm2058_vm3, %v2919_v34  ;;  %v2889_v39 = vpack.c.bf16 %v1792_v35, %v1792_v35  ;;  %v2329_v40 = vmul.f32 0.25, %v2187_v36  ;;  %v3314_v41 = vpop.f32.mrb[54].mxu1  ;;  %v3366_v42 = vpop.f32.mrb[54].mxu0 }
 0x37e   : > { %2064 = vst.msk [vmem:[%s3998_s24 + $0x14] sm:$0xf] %vm2058_vm3, %v2890_v37  ;;  %v2922_v43 = vpack.c.bf16 %v2330_v38, %v2330_v38  ;;  %v1807_v44 = vadd.f32 %v3314_v41, %v3985_v63  ;;  %v2202_v45 = vadd.f32 %v3366_v42, %v3990_v0  ;;  %v1801_v46 = vpop.f32.mrb[55].mxu1  ;;  %v2196_v47 = vpop.f32.mrb[55].mxu0 }
 0x37f   : > { %2063 = vst.msk [vmem:[%s3998_s24 + $0x10] sm:$0xf] %vm2058_vm3, %v2889_v39  ;;  %v2921_v48 = vpack.c.bf16 %v2329_v40, %v2329_v40  ;;  %v1802_v49 = vadd.f32 %v3985_v63, %v1801_v46  ;;  %v2197_v50 = vadd.f32 %v3990_v0, %v2196_v47 }
 0x380   : > { %2490 = vst.msk [vmem:[%s4005_s27 + $0x14] sm:$0xf] %vm2058_vm3, %v2922_v43  ;;  %v2892_v51 = vpack.c.bf16 %v1807_v44, %v1807_v44  ;;  %v2332_v52 = vmul.f32 0.25, %v2202_v45 }
 0x381   : > { %2489 = vst.msk [vmem:[%s4005_s27 + $0x10] sm:$0xf] %vm2058_vm3, %v2921_v48  ;;  %v2891_v54 = vpack.c.bf16 %v1802_v49, %v1802_v49  ;;  %v2331_v55 = vmul.f32 0.25, %v2197_v50  ;;  %v3317_v56 = vpop.f32.mrb[56].mxu1  ;;  %v3369_v57 = vpop.f32.mrb[56].mxu0 }
 0x382   : > { %2066 = vst.msk [vmem:[%s3998_s24 + $0x1c] sm:$0xf] %vm2058_vm3, %v2892_v51  ;;  %v2924_v58 = vpack.c.bf16 %v2332_v52, %v2332_v52  ;;  %v1817_v59 = vadd.f32 %v3317_v56, %v3985_v63  ;;  %v2212_v60 = vadd.f32 %v3369_v57, %v3990_v0  ;;  %v1811_v61 = vpop.f32.mrb[57].mxu1  ;;  %v2206_v62 = vpop.f32.mrb[57].mxu0 }
 0x383   : > { %2065 = vst.msk [vmem:[%s3998_s24 + $0x18] sm:$0xf] %vm2058_vm3, %v2891_v54  ;;  %v2923_v28 = vpack.c.bf16 %v2331_v55, %v2331_v55  ;;  %v1812_v1 = vadd.f32 %v3985_v63, %v1811_v61  ;;  %v2207_v2 = vadd.f32 %v3990_v0, %v2206_v62 }
 0x384   : > { %2492 = vst.msk [vmem:[%s4005_s27 + $0x1c] sm:$0xf] %vm2058_vm3, %v2924_v58  ;;  %v2894_v3 = vpack.c.bf16 %v1817_v59, %v1817_v59  ;;  %v2334_v4 = vmul.f32 0.25, %v2212_v60 }
 0x385   : > { %2491 = vst.msk [vmem:[%s4005_s27 + $0x18] sm:$0xf] %vm2058_vm3, %v2923_v28  ;;  %v2893_v5 = vpack.c.bf16 %v1812_v1, %v1812_v1  ;;  %v2333_v6 = vmul.f32 0.25, %v2207_v2  ;;  %v3320_v7 = vpop.f32.mrb[58].mxu1  ;;  %v3372_v8 = vpop.f32.mrb[58].mxu0 }
 0x386   : > { %2068 = vst.msk [vmem:[%s3998_s24 + $0x24] sm:$0xf] %vm2058_vm3, %v2894_v3  ;;  %v2926_v9 = vpack.c.bf16 %v2334_v4, %v2334_v4  ;;  %v1827_v10 = vadd.f32 %v3320_v7, %v3985_v63  ;;  %v2222_v11 = vadd.f32 %v3372_v8, %v3990_v0  ;;  %v1821_v12 = vpop.f32.mrb[59].mxu1  ;;  %v2216_v13 = vpop.f32.mrb[59].mxu0 }
 0x387   : > { %2067 = vst.msk [vmem:[%s3998_s24 + $0x20] sm:$0xf] %vm2058_vm3, %v2893_v5  ;;  %v2925_v14 = vpack.c.bf16 %v2333_v6, %v2333_v6  ;;  %v1822_v15 = vadd.f32 %v3985_v63, %v1821_v12  ;;  %v2217_v16 = vadd.f32 %v3990_v0, %v2216_v13 }
 0x388   : > { %2494 = vst.msk [vmem:[%s4005_s27 + $0x24] sm:$0xf] %vm2058_vm3, %v2926_v9  ;;  %v2896_v17 = vpack.c.bf16 %v1827_v10, %v1827_v10  ;;  %v2336_v18 = vmul.f32 0.25, %v2222_v11 }
 0x389   : > { %2493 = vst.msk [vmem:[%s4005_s27 + $0x20] sm:$0xf] %vm2058_vm3, %v2925_v14  ;;  %v2895_v19 = vpack.c.bf16 %v1822_v15, %v1822_v15  ;;  %v2335_v20 = vmul.f32 0.25, %v2217_v16  ;;  %v3323_v21 = vpop.f32.mrb[60].mxu1  ;;  %v3375_v22 = vpop.f32.mrb[60].mxu0 }
 0x38a   : > { %2070 = vst.msk [vmem:[%s3998_s24 + $0x2c] sm:$0xf] %vm2058_vm3, %v2896_v17  ;;  %v2928_v23 = vpack.c.bf16 %v2336_v18, %v2336_v18  ;;  %v1837_v24 = vadd.f32 %v3323_v21, %v3985_v63  ;;  %v2232_v25 = vadd.f32 %v3375_v22, %v3990_v0  ;;  %v1831_v53 = vpop.f32.mrb[61].mxu1  ;;  %v2226_v26 = vpop.f32.mrb[61].mxu0 }
 0x38b   : > { %2069 = vst.msk [vmem:[%s3998_s24 + $0x28] sm:$0xf] %vm2058_vm3, %v2895_v19  ;;  %v2927_v27 = vpack.c.bf16 %v2335_v20, %v2335_v20  ;;  %v1832_v29 = vadd.f32 %v3985_v63, %v1831_v53  ;;  %v2227_v30 = vadd.f32 %v3990_v0, %v2226_v26 }
 0x38c   : > { %2496 = vst.msk [vmem:[%s4005_s27 + $0x2c] sm:$0xf] %vm2058_vm3, %v2928_v23  ;;  %v2898_v31 = vpack.c.bf16 %v1837_v24, %v1837_v24  ;;  %v2338_v32 = vmul.f32 0.25, %v2232_v25 }
 0x38d   : > { %2495 = vst.msk [vmem:[%s4005_s27 + $0x28] sm:$0xf] %vm2058_vm3, %v2927_v27  ;;  %v2897_v33 = vpack.c.bf16 %v1832_v29, %v1832_v29  ;;  %v2337_v34 = vmul.f32 0.25, %v2227_v30  ;;  %v3326_v35 = vpop.f32.mrb[62].mxu1  ;;  %v3378_v36 = vpop.f32.mrb[62].mxu0 }
 0x38e   : > { %2072 = vst.msk [vmem:[%s3998_s24 + $0x34] sm:$0xf] %vm2058_vm3, %v2898_v31  ;;  %v2930_v37 = vpack.c.bf16 %v2338_v32, %v2338_v32  ;;  %v1847_v38 = vadd.f32 %v3326_v35, %v3985_v63  ;;  %v2242_v39 = vadd.f32 %v3378_v36, %v3990_v0  ;;  %v1841_v40 = vpop.f32.mrb[63].mxu1  ;;  %v2236_v41 = vpop.f32.mrb[63].mxu0 }
 0x38f   : > { %2071 = vst.msk [vmem:[%s3998_s24 + $0x30] sm:$0xf] %vm2058_vm3, %v2897_v33  ;;  %v2929_v42 = vpack.c.bf16 %v2337_v34, %v2337_v34  ;;  %v1842_v43 = vadd.f32 %v3985_v63, %v1841_v40  ;;  %v2237_v44 = vadd.f32 %v3990_v0, %v2236_v41 }
 0x390   : > { %2498 = vst.msk [vmem:[%s4005_s27 + $0x34] sm:$0xf] %vm2058_vm3, %v2930_v37  ;;  %v2900_v45 = vpack.c.bf16 %v1847_v38, %v1847_v38  ;;  %v2340_v46 = vmul.f32 0.25, %v2242_v39 }
 0x391   : > { %2497 = vst.msk [vmem:[%s4005_s27 + $0x30] sm:$0xf] %vm2058_vm3, %v2929_v42  ;;  %v2899_v47 = vpack.c.bf16 %v1842_v43, %v1842_v43  ;;  %v2339_v48 = vmul.f32 0.25, %v2237_v44  ;;  %v3329_v49 = vpop.f32.mrb[64].mxu1  ;;  %v3381_v50 = vpop.f32.mrb[64].mxu0 }
 0x392   : > { %2074 = vst.msk [vmem:[%s3998_s24 + $0x3c] sm:$0xf] %vm2058_vm3, %v2900_v45  ;;  %v2932_v51 = vpack.c.bf16 %v2340_v46, %v2340_v46  ;;  %v1857_v52 = vadd.f32 %v3329_v49, %v3985_v63  ;;  %v2252_v54 = vadd.f32 %v3381_v50, %v3990_v0  ;;  %v1851_v55 = vpop.f32.mrb[65].mxu1  ;;  %v2246_v56 = vpop.f32.mrb[65].mxu0 }
 0x393   : > { %2073 = vst.msk [vmem:[%s3998_s24 + $0x38] sm:$0xf] %vm2058_vm3, %v2899_v47  ;;  %v2931_v57 = vpack.c.bf16 %v2339_v48, %v2339_v48  ;;  %v1852_v58 = vadd.f32 %v3985_v63, %v1851_v55  ;;  %v2247_v59 = vadd.f32 %v3990_v0, %v2246_v56 }
 0x394   : > { %2500 = vst.msk [vmem:[%s4005_s27 + $0x3c] sm:$0xf] %vm2058_vm3, %v2932_v51  ;;  %v2902_v60 = vpack.c.bf16 %v1857_v52, %v1857_v52  ;;  %v2342_v61 = vmul.f32 0.25, %v2252_v54 }
 0x395   : > { %2499 = vst.msk [vmem:[%s4005_s27 + $0x38] sm:$0xf] %vm2058_vm3, %v2931_v57  ;;  %v2901_v62 = vpack.c.bf16 %v1852_v58, %v1852_v58  ;;  %v2341_v28 = vmul.f32 0.25, %v2247_v59  ;;  %v3332_v1 = vpop.f32.mrb[66].mxu1  ;;  %v3384_v2 = vpop.f32.mrb[66].mxu0 }
 0x396   : > { %2076 = vst.msk [vmem:[%s3998_s24 + $0x44] sm:$0xf] %vm2058_vm3, %v2902_v60  ;;  %v2934_v3 = vpack.c.bf16 %v2342_v61, %v2342_v61  ;;  %v1867_v4 = vadd.f32 %v3332_v1, %v3985_v63  ;;  %v2262_v5 = vadd.f32 %v3384_v2, %v3990_v0  ;;  %v1861_v6 = vpop.f32.mrb[67].mxu1  ;;  %v2256_v7 = vpop.f32.mrb[67].mxu0 }
 0x397   : > { %2075 = vst.msk [vmem:[%s3998_s24 + $0x40] sm:$0xf] %vm2058_vm3, %v2901_v62  ;;  %v2933_v8 = vpack.c.bf16 %v2341_v28, %v2341_v28  ;;  %v1862_v9 = vadd.f32 %v3985_v63, %v1861_v6  ;;  %v2257_v10 = vadd.f32 %v3990_v0, %v2256_v7 }
 0x398   : > { %2502 = vst.msk [vmem:[%s4005_s27 + $0x44] sm:$0xf] %vm2058_vm3, %v2934_v3  ;;  %v2904_v11 = vpack.c.bf16 %v1867_v4, %v1867_v4  ;;  %v2344_v12 = vmul.f32 0.25, %v2262_v5 }
 0x399   : > { %2501 = vst.msk [vmem:[%s4005_s27 + $0x40] sm:$0xf] %vm2058_vm3, %v2933_v8  ;;  %v2903_v13 = vpack.c.bf16 %v1862_v9, %v1862_v9  ;;  %v2343_v14 = vmul.f32 0.25, %v2257_v10  ;;  %v3335_v15 = vpop.f32.mrb[68].mxu1  ;;  %v3387_v16 = vpop.f32.mrb[68].mxu0 }
 0x39a   : > { %2078 = vst.msk [vmem:[%s3998_s24 + $0x4c] sm:$0xf] %vm2058_vm3, %v2904_v11  ;;  %v2936_v17 = vpack.c.bf16 %v2344_v12, %v2344_v12  ;;  %v1877_v18 = vadd.f32 %v3335_v15, %v3985_v63  ;;  %v2272_v19 = vadd.f32 %v3387_v16, %v3990_v0  ;;  %v1871_v20 = vpop.f32.mrb[69].mxu1  ;;  %v2266_v21 = vpop.f32.mrb[69].mxu0 }
 0x39b   : > { %2077 = vst.msk [vmem:[%s3998_s24 + $0x48] sm:$0xf] %vm2058_vm3, %v2903_v13  ;;  %v2935_v22 = vpack.c.bf16 %v2343_v14, %v2343_v14  ;;  %v1872_v23 = vadd.f32 %v3985_v63, %v1871_v20  ;;  %v2267_v24 = vadd.f32 %v3990_v0, %v2266_v21 }
 0x39c   : > { %2504 = vst.msk [vmem:[%s4005_s27 + $0x4c] sm:$0xf] %vm2058_vm3, %v2936_v17  ;;  %v2906_v25 = vpack.c.bf16 %v1877_v18, %v1877_v18  ;;  %v2346_v53 = vmul.f32 0.25, %v2272_v19 }
 0x39d   : > { %2503 = vst.msk [vmem:[%s4005_s27 + $0x48] sm:$0xf] %vm2058_vm3, %v2935_v22  ;;  %v2905_v26 = vpack.c.bf16 %v1872_v23, %v1872_v23  ;;  %v2345_v27 = vmul.f32 0.25, %v2267_v24  ;;  %v3338_v29 = vpop.f32.mrb[70].mxu1  ;;  %v3390_v30 = vpop.f32.mrb[70].mxu0 }
 0x39e   : > { %2080 = vst.msk [vmem:[%s3998_s24 + $0x54] sm:$0xf] %vm2058_vm3, %v2906_v25  ;;  %v2938_v31 = vpack.c.bf16 %v2346_v53, %v2346_v53  ;;  %v1887_v32 = vadd.f32 %v3338_v29, %v3985_v63  ;;  %v2282_v33 = vadd.f32 %v3390_v30, %v3990_v0  ;;  %v1881_v34 = vpop.f32.mrb[71].mxu1  ;;  %v2276_v35 = vpop.f32.mrb[71].mxu0 }
 0x39f   : > { %2079 = vst.msk [vmem:[%s3998_s24 + $0x50] sm:$0xf] %vm2058_vm3, %v2905_v26  ;;  %v2937_v36 = vpack.c.bf16 %v2345_v27, %v2345_v27  ;;  %v1882_v37 = vadd.f32 %v3985_v63, %v1881_v34  ;;  %v2277_v38 = vadd.f32 %v3990_v0, %v2276_v35 }
 0x3a0   : > { %2506 = vst.msk [vmem:[%s4005_s27 + $0x54] sm:$0xf] %vm2058_vm3, %v2938_v31  ;;  %v2908_v39 = vpack.c.bf16 %v1887_v32, %v1887_v32  ;;  %v2348_v40 = vmul.f32 0.25, %v2282_v33 }
 0x3a1   : > { %2505 = vst.msk [vmem:[%s4005_s27 + $0x50] sm:$0xf] %vm2058_vm3, %v2937_v36  ;;  %v2907_v41 = vpack.c.bf16 %v1882_v37, %v1882_v37  ;;  %v2347_v42 = vmul.f32 0.25, %v2277_v38  ;;  %v3341_v43 = vpop.f32.mrb[72].mxu1  ;;  %v3393_v44 = vpop.f32.mrb[72].mxu0 }
 0x3a2   : > { %2082 = vst.msk [vmem:[%s3998_s24 + $0x5c] sm:$0xf] %vm2058_vm3, %v2908_v39  ;;  %v2940_v45 = vpack.c.bf16 %v2348_v40, %v2348_v40  ;;  %v1897_v46 = vadd.f32 %v3341_v43, %v3985_v63  ;;  %v2292_v47 = vadd.f32 %v3393_v44, %v3990_v0  ;;  %v1891_v48 = vpop.f32.mrb[73].mxu1  ;;  %v2286_v49 = vpop.f32.mrb[73].mxu0 }
 0x3a3   : > { %2081 = vst.msk [vmem:[%s3998_s24 + $0x58] sm:$0xf] %vm2058_vm3, %v2907_v41  ;;  %v2939_v50 = vpack.c.bf16 %v2347_v42, %v2347_v42  ;;  %v1892_v51 = vadd.f32 %v3985_v63, %v1891_v48  ;;  %v2287_v52 = vadd.f32 %v3990_v0, %v2286_v49 }
 0x3a4   : > { %2508 = vst.msk [vmem:[%s4005_s27 + $0x5c] sm:$0xf] %vm2058_vm3, %v2940_v45  ;;  %v2910_v54 = vpack.c.bf16 %v1897_v46, %v1897_v46  ;;  %v2350_v55 = vmul.f32 0.25, %v2292_v47 }
 0x3a5   : > { %2507 = vst.msk [vmem:[%s4005_s27 + $0x58] sm:$0xf] %vm2058_vm3, %v2939_v50  ;;  %v2909_v56 = vpack.c.bf16 %v1892_v51, %v1892_v51  ;;  %v2349_v57 = vmul.f32 0.25, %v2287_v52  ;;  %v3344_v58 = vpop.f32.mrb[74].mxu1  ;;  %v3396_v59 = vpop.f32.mrb[74].mxu0 }
 0x3a6   : > { %2084 = vst.msk [vmem:[%s3998_s24 + $0x64] sm:$0xf] %vm2058_vm3, %v2910_v54  ;;  %v2942_v60 = vpack.c.bf16 %v2350_v55, %v2350_v55  ;;  %v1907_v61 = vadd.f32 %v3344_v58, %v3985_v63  ;;  %v2302_v62 = vadd.f32 %v3396_v59, %v3990_v0  ;;  %v1901_v28 = vpop.f32.mrb[75].mxu1  ;;  %v2296_v1 = vpop.f32.mrb[75].mxu0 }
 0x3a7   : > { %2083 = vst.msk [vmem:[%s3998_s24 + $0x60] sm:$0xf] %vm2058_vm3, %v2909_v56  ;;  %v2941_v2 = vpack.c.bf16 %v2349_v57, %v2349_v57  ;;  %v1902_v3 = vadd.f32 %v3985_v63, %v1901_v28  ;;  %v2297_v4 = vadd.f32 %v3990_v0, %v2296_v1 }
 0x3a8   : > { %2510 = vst.msk [vmem:[%s4005_s27 + $0x64] sm:$0xf] %vm2058_vm3, %v2942_v60  ;;  %v2912_v5 = vpack.c.bf16 %v1907_v61, %v1907_v61  ;;  %v2352_v6 = vmul.f32 0.25, %v2302_v62 }
 0x3a9   : > { %2509 = vst.msk [vmem:[%s4005_s27 + $0x60] sm:$0xf] %vm2058_vm3, %v2941_v2  ;;  %v2911_v7 = vpack.c.bf16 %v1902_v3, %v1902_v3  ;;  %v2351_v8 = vmul.f32 0.25, %v2297_v4  ;;  %v3347_v9 = vpop.f32.mrb[76].mxu1  ;;  %v3399_v10 = vpop.f32.mrb[76].mxu0 }
 0x3aa   : > { %2086 = vst.msk [vmem:[%s3998_s24 + $0x6c] sm:$0xf] %vm2058_vm3, %v2912_v5  ;;  %v2944_v11 = vpack.c.bf16 %v2352_v6, %v2352_v6  ;;  %v1917_v12 = vadd.f32 %v3347_v9, %v3985_v63  ;;  %v2312_v13 = vadd.f32 %v3399_v10, %v3990_v0  ;;  %v1911_v14 = vpop.f32.mrb[77].mxu1  ;;  %v2306_v15 = vpop.f32.mrb[77].mxu0 }
 0x3ab   : > { %2085 = vst.msk [vmem:[%s3998_s24 + $0x68] sm:$0xf] %vm2058_vm3, %v2911_v7  ;;  %v2943_v16 = vpack.c.bf16 %v2351_v8, %v2351_v8  ;;  %v1912_v17 = vadd.f32 %v3985_v63, %v1911_v14  ;;  %v2307_v18 = vadd.f32 %v3990_v0, %v2306_v15 }
 0x3ac   : > { %2512 = vst.msk [vmem:[%s4005_s27 + $0x6c] sm:$0xf] %vm2058_vm3, %v2944_v11  ;;  %v2914_v19 = vpack.c.bf16 %v1917_v12, %v1917_v12  ;;  %v2354_v20 = vmul.f32 0.25, %v2312_v13 }
 0x3ad   : > { %2511 = vst.msk [vmem:[%s4005_s27 + $0x68] sm:$0xf] %vm2058_vm3, %v2943_v16  ;;  %v2913_v21 = vpack.c.bf16 %v1912_v17, %v1912_v17  ;;  %v2353_v22 = vmul.f32 0.25, %v2307_v18  ;;  %v3350_v23 = vpop.f32.mrb[78].mxu1  ;;  %v3402_v24 = vpop.f32.mrb[78].mxu0 }
 0x3ae   : > { %2088 = vst.msk [vmem:[%s3998_s24 + $0x74] sm:$0xf] %vm2058_vm3, %v2914_v19  ;;  %v2946_v25 = vpack.c.bf16 %v2354_v20, %v2354_v20  ;;  %v1927_v53 = vadd.f32 %v3350_v23, %v3985_v63  ;;  %v2322_v26 = vadd.f32 %v3402_v24, %v3990_v0  ;;  %v1921_v27 = vpop.f32.mrb[79].mxu1  ;;  %v2316_v29 = vpop.f32.mrb[79].mxu0 }
 0x3af   : > { %2087 = vst.msk [vmem:[%s3998_s24 + $0x70] sm:$0xf] %vm2058_vm3, %v2913_v21  ;;  %v2945_v30 = vpack.c.bf16 %v2353_v22, %v2353_v22  ;;  %v1922_v31 = vadd.f32 %v3985_v63, %v1921_v27  ;;  %v2317_v32 = vadd.f32 %v3990_v0, %v2316_v29 }
 0x3b0   : > { %2514 = vst.msk [vmem:[%s4005_s27 + $0x74] sm:$0xf] %vm2058_vm3, %v2946_v25  ;;  %v2916_v33 = vpack.c.bf16 %v1927_v53, %v1927_v53  ;;  %v2356_v34 = vmul.f32 0.25, %v2322_v26 }
 0x3b1   : > { %2513 = vst.msk [vmem:[%s4005_s27 + $0x70] sm:$0xf] %vm2058_vm3, %v2945_v30  ;;  %v2915_v35 = vpack.c.bf16 %v1922_v31, %v1922_v31  ;;  %v2355_v36 = vmul.f32 0.25, %v2317_v32 }
 0x3b2   : > { %2090 = vst.msk [vmem:[%s3998_s24 + $0x7c] sm:$0xf] %vm2058_vm3, %v2916_v33  ;;  %v2948_v37 = vpack.c.bf16 %v2356_v34, %v2356_v34 }
 0x3b3   : > { %2089 = vst.msk [vmem:[%s3998_s24 + $0x78] sm:$0xf] %vm2058_vm3, %v2915_v35  ;;  %v2947_v38 = vpack.c.bf16 %v2355_v36, %v2355_v36 }
 0x3b4   : > { %2516 = vst.msk [vmem:[%s4005_s27 + $0x7c] sm:$0xf] %vm2058_vm3, %v2948_v37 }
 0x3b5   : > { %2515 = vst.msk [vmem:[%s4005_s27 + $0x78] sm:$0xf] %vm2058_vm3, %v2947_v38 }
 0x3b6 PF: > { %s24_s25 = sadd.s32 1, %s3455_s25  }
 0x3b7   : > { %p21_p4 = scmp.ge.s32.totalorder %s24_s25, 4  }
 0x3b9   :  { %23 = sbr.rel (!%p21_p4) target bundleno = 1 (0x1), region = 118 }

</bundles_post_ra>
